<compile_context>
chip_gen: v6e
topology: v6e:2x2x1
jax: 0.10.0
libtpu: 0.0.40
codegen_flags: <defaults>
</compile_context>

<pallas_src>
import numpy as np
import jax
import jax.numpy as jnp
from jax.experimental import pallas as pl
from jax.experimental.pallas import tpu as pltpu

SPIKE_THRESH = 0.5
C123 = 64            # channels of conv layers 1-3
C45 = 128            # channels of conv layers 4-5
OUT_LANES = 128      # lane-dense padded width of the per-step log-softmax slab


# ----------------------------------------------------------------------------
# geometry / permutations
# ----------------------------------------------------------------------------
def _geometry(B, Cin, H, W, nhid, nout):
    ho1, wo1 = (H + 2 - 3) // 2 + 1, (W + 2 - 3) // 2 + 1        # k3 c64 s2 p1
    ho3, wo3 = ho1, wo1                                          # k3 s1 / k1 s1
    ho4, wo4 = (ho3 + 2 - 3) // 2 + 1, (wo3 + 2 - 3) // 2 + 1    # d-k3 c128 s2
    ho5, wo5 = (ho4 - 1) // 2 + 1, (wo4 - 1) // 2 + 1            # k1 c128 s2
    return dict(B=B, Cin=Cin, H=H, W=W, nhid=nhid, nout=nout,
                ho1=ho1, wo1=wo1, ho3=ho3, wo3=wo3, ho4=ho4, wo4=wo4,
                ho5=ho5, wo5=wo5,
                P1=B * ho1 * wo1, K1=9 * Cin,
                NPOS4=ho4 * wo4, NPOS5=ho5 * wo5,
                f_size=ho5 * wo5 * C45)


def _perms(g):
    # multiplier-2 depthwise channel packing: packed[grp*64 + j] = pytorch[2j+grp]
    perm_pack = np.concatenate([np.arange(0, C45, 2), np.arange(1, C45, 2)])
    perm_unpack = np.argsort(perm_pack)
    # recurrent input rows: kernel row p*C45 + c  <->  PyTorch flatten c*NPOS5 + p
    npos5 = g['NPOS5']
    win_perm = (np.arange(C45)[None, :] * npos5
                + np.arange(npos5)[:, None]).reshape(-1)
    return perm_pack, perm_unpack, win_perm


# ----------------------------------------------------------------------------
# parameters (PyTorch layout) and packing into kernel operands
# ----------------------------------------------------------------------------
def init_params(key, g):
    Cin, nhid, nout = g['Cin'], g['nhid'], g['nout']

    def unif(k, shape, fan_in):
        return (jax.random.uniform(k, shape, jnp.float32, -1.0, 1.0)
                / np.sqrt(fan_in))

    ks = jax.random.split(key, 13)
    p = {}
    p['W1'] = unif(ks[0], (C123, Cin, 3, 3), Cin * 9)            # k3 c64 s2
    p['b1'] = unif(ks[1], (C123,), Cin * 9)
    p['tau1'] = jnp.full((C123,), 3.0, jnp.float32)
    p['W2'] = unif(ks[2], (C123, 1, 3, 3), 9)                    # d-k3 c64 s1
    p['b2'] = unif(ks[3], (C123,), 9)
    p['tau2'] = jnp.full((C123,), 3.0, jnp.float32)
    p['W3'] = unif(ks[4], (C123, C123, 1, 1), C123)              # k1 c64 s1
    p['b3'] = unif(ks[5], (C123,), C123)
    p['tau3'] = jnp.full((C123,), 3.0, jnp.float32)
    p['W4'] = unif(ks[6], (C45, 1, 3, 3), 9)                     # d-k3 c128 s2
    p['b4'] = unif(ks[7], (C45,), 9)
    p['tau4'] = jnp.full((C45,), 3.0, jnp.float32)
    p['W5'] = unif(ks[8], (C45, C45, 1, 1), C45)                 # k1 c128 s2
    p['b5'] = unif(ks[9], (C45,), C45)
    p['tau5'] = jnp.full((C45,), 3.0, jnp.float32)
    # recurrent cell (rows indexed by the PyTorch (C,H,W) flatten order)
    p['W_in'] = unif(ks[10], (g['f_size'], nhid), g['f_size'])
    p['W_rec'] = unif(ks[11], (nhid, nhid), nhid)
    p['b_r'] = unif(ks[12], (nhid,), g['f_size'])
    p['tau_r'] = jnp.full((nhid,), 3.0, jnp.float32)
    # readout linear is zero-initialised in the reference; tau_m_o = 5.0
    p['W_o'] = jnp.zeros((nhid, nout), jnp.float32)
    p['b_o'] = jnp.zeros((nout,), jnp.float32)
    p['tau_o'] = jnp.full((nout,), 5.0, jnp.float32)
    return p


def pack_params(p, g):
    perm_pack, _, win_perm = _perms(g)
    sig = jax.nn.sigmoid

    def ba(b, tau, perm=None):
        out = jnp.stack([b, sig(tau)], axis=0)          # row0 = bias, row1 = alpha
        return out[:, perm] if perm is not None else out

    w1 = jnp.transpose(p['W1'], (2, 3, 1, 0)).reshape(9 * g['Cin'], C123)
    return dict(
        w1=w1.astype(jnp.bfloat16),
        ba1=ba(p['b1'], p['tau1']),
        w2=p['W2'].reshape(C123, 9).T,                            # (9, 64) f32
        ba2=ba(p['b2'], p['tau2']),
        w3=p['W3'][:, :, 0, 0].T.astype(jnp.bfloat16),            # (in, out)
        ba3=ba(p['b3'], p['tau3']),
        w4=p['W4'].reshape(C45, 9).T[:, perm_pack],               # (9, 128) packed
        ba4=ba(p['b4'], p['tau4'], perm_pack),
        w5=p['W5'][:, :, 0, 0].T[perm_pack, :].astype(jnp.bfloat16),
        ba5=ba(p['b5'], p['tau5']),
        w_in=p['W_in'][win_perm, :].astype(jnp.bfloat16),
        w_rec=p['W_rec'].astype(jnp.bfloat16),
        ba_r=ba(p['b_r'], p['tau_r']),
        w_o=p['W_o'],
        ba_o=ba(p['b_o'], p['tau_o']),
    )


def init_hidden(key, g):
    """Mirrors SeqModel.init_hidden (PyTorch NCHW shapes, 16 entries)."""
    B, nhid, nout = g['B'], g['nhid'], g['nout']
    layer_sizes = [(C123, g['ho1'], g['wo1']), (C123, g['ho1'], g['wo1']),
                   (C123, g['ho3'], g['wo3']), (C45, g['ho4'], g['wo4']),
                   (C45, g['ho5'], g['wo5']), (nhid,), (nout,)]
    states = []
    for ls in layer_sizes:
        key, k1 = jax.random.split(key)
        states.append(jax.random.uniform(k1, (B,) + ls, jnp.float32))
        states.append(jnp.zeros((B,) + ls, jnp.float32))
    states.append(jnp.zeros((B, nout), jnp.float32))   # h[-2] output membrane
    states.append(jnp.zeros((B, nout), jnp.float32))   # h[-1]
    return tuple(states)


# ----------------------------------------------------------------------------
# fused Pallas forward (whole network, whole sequence)
# ----------------------------------------------------------------------------
def make_forward(g, L):
    B, Cin, nhid, nout = g['B'], g['Cin'], g['nhid'], g['nout']
    ho1, wo1 = g['ho1'], g['wo1']
    ho3, wo3 = g['ho3'], g['wo3']
    ho4, wo4 = g['ho4'], g['wo4']
    ho5, wo5 = g['ho5'], g['wo5']
    P1, K1 = g['P1'], g['K1']
    NPOS4, NPOS5 = g['NPOS4'], g['NPOS5']
    f_size = g['f_size']
    perm_pack, perm_unpack, _ = _perms(g)
    f32 = jnp.float32

    def kernel(patches_ref,
               w1_ref, ba1_ref, w2_ref, ba2_ref, w3_ref, ba3_ref,
               w4_ref, ba4_ref, w5_ref, ba5_ref,
               win_ref, wrec_ref, bar_ref, wo_ref, bao_ref,
               st123_0_ref, st4_0_ref, st5_0_ref, strec_0_ref, memo_0_ref,
               logp_ref, st123_ref, st4_ref, st5_ref, strec_ref, memo_ref,
               pad2_ref, pad4_ref, cur4_ref):
        t = pl.program_id(0)

        @pl.when(t == 0)
        def _init():
            # hidden states live in VMEM-resident output blocks for the whole
            # sequence; load the incoming hidden once and zero the conv halos.
            st123_ref[...] = st123_0_ref[...]
            st4_ref[...] = st4_0_ref[...]
            st5_ref[...] = st5_0_ref[...]
            strec_ref[...] = strec_0_ref[...]
            memo_ref[...] = memo_0_ref[...]
            pad2_ref[...] = jnp.zeros_like(pad2_ref)
            pad4_ref[...] = jnp.zeros_like(pad4_ref)

        def lif(mem, spk, cur, ba_ref):
            bias = ba_ref[0:1, :]
            alpha = ba_ref[1:2, :]          # sigmoid(tau) precomputed host-side
            m = mem * alpha * (1.0 - spk) + (1.0 - alpha) * (cur + bias)
            s = (m > SPIKE_THRESH).astype(jnp.float32)
            return m, s

        # ---- layer 1: 3x3 s2 conv (host im2col) + LIF ---------------------
        cur1 = jnp.dot(patches_ref[0], w1_ref[...],
                       preferred_element_type=jnp.float32)
        m1, s1 = lif(st123_ref[0], st123_ref[1], cur1, ba1_ref)
        st123_ref[0] = m1
        st123_ref[1] = s1

        # ---- layer 2: 3x3 s1 depthwise conv (9 shifted VPU FMAs) + LIF ----
        pad2_ref[:, 1:1 + ho1, 1:1 + wo1, :] = s1.reshape(B, ho1, wo1, C123)
        w2 = w2_ref[...]
        acc2 = jnp.zeros((B, ho1, wo1, C123), jnp.float32)
        for di in range(3):
            for dj in range(3):
                k = di * 3 + dj
                acc2 = acc2 + (pad2_ref[:, di:di + ho1, dj:dj + wo1, :]
                               * w2[k:k + 1, :])
        m2, s2 = lif(st123_ref[2], st123_ref[3], acc2.reshape(P1, C123),
                     ba2_ref)
        st123_ref[2] = m2
        st123_ref[3] = s2

        # ---- layer 3: 1x1 conv + LIF --------------------------------------
        cur3 = jnp.dot(s2.astype(jnp.bfloat16), w3_ref[...],
                       preferred_element_type=jnp.float32)
        m3, s3 = lif(st123_ref[4], st123_ref[5], cur3, ba3_ref)
        st123_ref[4] = m3
        st123_ref[5] = s3

        # ---- layer 4: 3x3 s2 depthwise conv (64 -> 128, mult 2) + LIF -----
        # channels packed [copy0 | copy1]; compute the stride-1 result on the
        # full grid then pick the even positions (stride 2).
        s3_4d = s3.reshape(B, ho3, wo3, C123)
        pad4_ref[:, 1:1 + ho3, 1:1 + wo3, 0:C123] = s3_4d
        pad4_ref[:, 1:1 + ho3, 1:1 + wo3, C123:C45] = s3_4d
        w4 = w4_ref[...]
        acc4 = jnp.zeros((B, ho3, wo3, C45), jnp.float32)
        for di in range(3):
            for dj in range(3):
                k = di * 3 + dj
                acc4 = acc4 + (pad4_ref[:, di:di + ho3, dj:dj + wo3, :]
                               * w4[k:k + 1, :])
        for yo in range(ho4):
            for xo in range(wo4):
                cur4_ref[yo * wo4 + xo] = acc4[:, 2 * yo, 2 * xo, :]
        b4 = ba4_ref[0:1, :]
        a4 = ba4_ref[1:2, :]
        mem4 = st4_ref[0]
        spk4 = st4_ref[1]
        m4 = mem4 * a4 * (1.0 - spk4) + (1.0 - a4) * (cur4_ref[...] + b4)
        s4 = (m4 > SPIKE_THRESH).astype(jnp.float32)
        st4_ref[0] = m4
        st4_ref[1] = s4

        # ---- layer 5: 1x1 s2 conv + LIF, fused with f_spike @ W_in --------
        b5 = ba5_ref[0:1, :]
        a5 = ba5_ref[1:2, :]
        w5 = w5_ref[...]
        f_in = jnp.zeros((B, nhid), jnp.float32)
        for p in range(NPOS5):
            y5, x5 = p // wo5, p % wo5
            pos4 = (2 * y5) * wo4 + (2 * x5)
            cur = jnp.dot(s4[pos4].astype(jnp.bfloat16), w5,
                          preferred_element_type=jnp.float32)
            mem = st5_ref[0, p]
            spk = st5_ref[1, p]
            m = mem * a5 * (1.0 - spk) + (1.0 - a5) * (cur + b5)
            s = (m > SPIKE_THRESH).astype(jnp.float32)
            st5_ref[0, p] = m
            st5_ref[1, p] = s
            f_in = f_in + jnp.dot(s.astype(jnp.bfloat16),
                                  win_ref[p * C45:(p + 1) * C45, :],
                                  preferred_element_type=jnp.float32)

        # ---- recurrent LIF cell (snn1, is_rec=True) ------------------------
        b_r = bar_ref[0:1, :]
        a_r = bar_ref[1:2, :]
        mem_r = strec_ref[0]
        spk_r = strec_ref[1]
        dense = (f_in
                 + jnp.dot(spk_r.astype(jnp.bfloat16), wrec_ref[...],
                           preferred_element_type=jnp.float32)
                 + b_r)
        m_r = mem_r * a_r * (1.0 - spk_r) + (1.0 - a_r) * dense
        s_r = (m_r > SPIKE_THRESH).astype(jnp.float32)
        strec_ref[0] = m_r
        strec_ref[1] = s_r

        # ---- readout: zero-init linear + leaky integrator + log_softmax ----
        b_o = bao_ref[0:1, :]
        a_o = bao_ref[1:2, :]                       # sigmoid(tau_m_o)
        dense3 = jnp.dot(s_r, wo_ref[...],
                         preferred_element_type=jnp.float32) + b_o
        memo = memo_ref[...]
        memo = memo + (dense3 - memo) * a_o
        memo_ref[...] = memo
        zmax = jnp.max(memo, axis=-1, keepdims=True)
        z = memo - zmax
        logp = z - jnp.log(jnp.sum(jnp.exp(z), axis=-1, keepdims=True))
        logp_ref[...] = jnp.zeros_like(logp_ref)    # lane-dense output slab
        logp_ref[0, :, 0:nout] = logp

    def full_spec(shape):
        nd = len(shape)
        return pl.BlockSpec(shape, lambda *_: (0,) * nd)

    grid_spec = pltpu.PrefetchScalarGridSpec(
        num_scalar_prefetch=0,
        grid=(L,),
        in_specs=[
            pl.BlockSpec((1, P1, K1), lambda t: (t, 0, 0)),      # im2col patches
            full_spec((K1, C123)), full_spec((2, C123)),         # w1, ba1
            full_spec((9, C123)), full_spec((2, C123)),          # w2, ba2
            full_spec((C123, C123)), full_spec((2, C123)),       # w3, ba3
            full_spec((9, C45)), full_spec((2, C45)),            # w4, ba4
            full_spec((C45, C45)), full_spec((2, C45)),          # w5, ba5
            full_spec((f_size, nhid)), full_spec((nhid, nhid)),  # w_in, w_rec
            full_spec((2, nhid)),                                # ba_r
            full_spec((nhid, nout)), full_spec((2, nout)),       # w_o, ba_o
            full_spec((6, P1, C123)),                            # init states 1-3
            full_spec((2, NPOS4, B, C45)),                       # init state 4
            full_spec((2, NPOS5, B, C45)),                       # init state 5
            full_spec((2, B, nhid)),                             # init rec state
            full_spec((B, nout)),                                # init out mem
        ],
        out_specs=[
            pl.BlockSpec((1, B, OUT_LANES), lambda t: (t, 0, 0)),
            full_spec((6, P1, C123)),
            full_spec((2, NPOS4, B, C45)),
            full_spec((2, NPOS5, B, C45)),
            full_spec((2, B, nhid)),
            full_spec((B, nout)),
        ],
        scratch_shapes=[
            pltpu.VMEM((B, ho1 + 2, wo1 + 2, C123), f32),   # layer-2 halo
            pltpu.VMEM((B, ho3 + 2, wo3 + 2, C45), f32),    # layer-4 halo
            pltpu.VMEM((NPOS4, B, C45), f32),               # layer-4 current
        ],
    )

    fused = pl.pallas_call(
        kernel,
        out_shape=(
            jax.ShapeDtypeStruct((L, B, OUT_LANES), f32),
            jax.ShapeDtypeStruct((6, P1, C123), f32),
            jax.ShapeDtypeStruct((2, NPOS4, B, C45), f32),
            jax.ShapeDtypeStruct((2, NPOS5, B, C45), f32),
            jax.ShapeDtypeStruct((2, B, nhid), f32),
            jax.ShapeDtypeStruct((B, nout), f32),
        ),
        grid_spec=grid_spec,
        compiler_params=pltpu.CompilerParams(
            dimension_semantics=("arbitrary",),      # time recurrence is serial
            vmem_limit_bytes=32 * 1024 * 1024),
    )

    def im2col_layer1(frames):
        # frames: (L, B, H, W, Cin) -> (L, B*ho1*wo1, 9*Cin), tap-major
        xp = jnp.pad(frames, ((0, 0), (0, 0), (1, 1), (1, 1), (0, 0)))
        taps = []
        for di in range(3):
            for dj in range(3):
                taps.append(xp[:, :, di:di + 2 * ho1 - 1:2,
                               dj:dj + 2 * wo1 - 1:2, :])
        pt = jnp.stack(taps, axis=4)                 # (L, B, ho1, wo1, 9, Cin)
        return pt.reshape(L, P1, K1)

    def forward(kp, inputs, hidden):
        # inputs: (B, L, Cin, H, W) -- same contract as the PyTorch module
        frames = jnp.transpose(inputs, (1, 0, 3, 4, 2))
        patches = im2col_layer1(frames).astype(jnp.bfloat16)

        def conv123_in(h):          # (B, 64, h, w) NCHW -> (P1, 64)
            return jnp.transpose(h, (0, 2, 3, 1)).reshape(P1, C123)

        def st4_in(h):              # (B,128,ho4,wo4) -> (NPOS4,B,128) packed
            x = jnp.transpose(h, (0, 2, 3, 1))[..., perm_pack]
            return jnp.transpose(x.reshape(B, NPOS4, C45), (1, 0, 2))

        def st5_in(h):              # (B,128,ho5,wo5) -> (NPOS5,B,128)
            x = jnp.transpose(h, (0, 2, 3, 1)).reshape(B, NPOS5, C45)
            return jnp.transpose(x, (1, 0, 2))

        st123_0 = jnp.stack([conv123_in(hidden[i]) for i in range(6)], axis=0)
        st4_0 = jnp.stack([st4_in(hidden[6]), st4_in(hidden[7])], axis=0)
        st5_0 = jnp.stack([st5_in(hidden[8]), st5_in(hidden[9])], axis=0)
        strec_0 = jnp.stack([hidden[10], hidden[11]], axis=0)
        memo_0 = hidden[14]

        logp_pad, st123, st4, st5, strec, memo = fused(
            patches,
            kp['w1'], kp['ba1'], kp['w2'], kp['ba2'], kp['w3'], kp['ba3'],
            kp['w4'], kp['ba4'], kp['w5'], kp['ba5'],
            kp['w_in'], kp['w_rec'], kp['ba_r'], kp['w_o'], kp['ba_o'],
            st123_0, st4_0, st5_0, strec_0, memo_0)

        logp = logp_pad[:, :, :nout]                 # (L, B, nout)

        def conv123_out(x):
            return jnp.transpose(x.reshape(B, ho1, wo1, C123), (0, 3, 1, 2))

        def st4_out(x):
            y = jnp.transpose(x, (1, 0, 2)).reshape(B, ho4, wo4, C45)
            y = y[..., perm_unpack]
            return jnp.transpose(y, (0, 3, 1, 2))

        def st5_out(x):
            y = jnp.transpose(x, (1, 0, 2)).reshape(B, ho5, wo5, C45)
            return jnp.transpose(y, (0, 3, 1, 2))

        new_hidden = (
            conv123_out(st123[0]), conv123_out(st123[1]),
            conv123_out(st123[2]), conv123_out(st123[3]),
            conv123_out(st123[4]), conv123_out(st123[5]),
            st4_out(st4[0]), st4_out(st4[1]),
            st5_out(st5[0]), st5_out(st5[1]),
            strec[0], strec[1],
            hidden[12], hidden[13],      # allocated-but-unused entries (as in ref)
            memo, memo,                  # h[-2] = output membrane, h[-1] = h[-2]
        )
        recon_loss = jnp.zeros((1,), jnp.float32)
        return logp, new_hidden, recon_loss

    return jax.jit(forward)


# ----------------------------------------------------------------------------
if __name__ == "__main__":
    key = jax.random.PRNGKey(0)
    k_par, k_hid, k_in = jax.random.split(key, 3)

    B, L, Cin, H, W = 2, 4, 2, 16, 16      # small DVS-like frames (B,L,C,H,W)
    nhid, nout = 32, 10

    g = _geometry(B, Cin, H, W, nhid, nout)
    params = init_params(k_par, g)
    kp = pack_params(params, g)
    hidden = init_hidden(k_hid, g)
    x = jax.random.normal(k_in, (B, L, Cin, H, W), jnp.float32)

    forward = make_forward(g, L)
    logp, hidden_out, recon = forward(kp, x, hidden)
    outputs = [logp[i] for i in range(L)]           # per-step (B, nout), as in ref

    jax.block_until_ready(logp)
    jax.block_until_ready(hidden_out)
    assert logp.shape == (L, B, nout)
    assert bool(jnp.all(jnp.isfinite(logp)))
    print("KERNEL_OK")
</pallas_src>

<mosaic_0001>
module attributes {stable_mosaic.version = 11 : i64} {
  func.func @kernel(%arg0: i32, %arg1: memref<1x128x18xbf16, #tpu.memory_space<vmem>>, %arg2: memref<18x64xbf16, #tpu.memory_space<vmem>>, %arg3: memref<2x64xf32, #tpu.memory_space<vmem>>, %arg4: memref<9x64xf32, #tpu.memory_space<vmem>>, %arg5: memref<2x64xf32, #tpu.memory_space<vmem>>, %arg6: memref<64x64xbf16, #tpu.memory_space<vmem>>, %arg7: memref<2x64xf32, #tpu.memory_space<vmem>>, %arg8: memref<9x128xf32, #tpu.memory_space<vmem>>, %arg9: memref<2x128xf32, #tpu.memory_space<vmem>>, %arg10: memref<128x128xbf16, #tpu.memory_space<vmem>>, %arg11: memref<2x128xf32, #tpu.memory_space<vmem>>, %arg12: memref<512x32xbf16, #tpu.memory_space<vmem>>, %arg13: memref<32x32xbf16, #tpu.memory_space<vmem>>, %arg14: memref<2x32xf32, #tpu.memory_space<vmem>>, %arg15: memref<32x10xf32, #tpu.memory_space<vmem>>, %arg16: memref<2x10xf32, #tpu.memory_space<vmem>>, %arg17: memref<6x128x64xf32, #tpu.memory_space<vmem>>, %arg18: memref<2x16x2x128xf32, #tpu.memory_space<vmem>>, %arg19: memref<2x4x2x128xf32, #tpu.memory_space<vmem>>, %arg20: memref<2x2x32xf32, #tpu.memory_space<vmem>>, %arg21: memref<2x10xf32, #tpu.memory_space<vmem>>, %arg22: memref<1x2x128xf32, #tpu.memory_space<vmem>>, %arg23: memref<6x128x64xf32, #tpu.memory_space<vmem>>, %arg24: memref<2x16x2x128xf32, #tpu.memory_space<vmem>>, %arg25: memref<2x4x2x128xf32, #tpu.memory_space<vmem>>, %arg26: memref<2x2x32xf32, #tpu.memory_space<vmem>>, %arg27: memref<2x10xf32, #tpu.memory_space<vmem>>, %arg28: memref<2x10x10x64xf32, #tpu.memory_space<vmem>>, %arg29: memref<2x10x10x128xf32, #tpu.memory_space<vmem>>, %arg30: memref<16x2x128xf32, #tpu.memory_space<vmem>>) attributes {dimension_semantics = [#tpu.dimension_semantics<arbitrary>], iteration_bounds = array<i64: 4>, scalar_prefetch = 0 : i64, scratch_operands = 3 : i64, tpu.core_type = #tpu.core_type<tc>, window_params = [{transform_indices = @transform_0, window_bounds = array<i64: 1, 128, 18>}, {pipeline_mode = #tpu.pipeline_mode<synchronous>, transform_indices = @transform_1, window_bounds = array<i64: 18, 64>}, {pipeline_mode = #tpu.pipeline_mode<synchronous>, transform_indices = @transform_2, window_bounds = array<i64: 2, 64>}, {pipeline_mode = #tpu.pipeline_mode<synchronous>, transform_indices = @transform_3, window_bounds = array<i64: 9, 64>}, {pipeline_mode = #tpu.pipeline_mode<synchronous>, transform_indices = @transform_4, window_bounds = array<i64: 2, 64>}, {pipeline_mode = #tpu.pipeline_mode<synchronous>, transform_indices = @transform_5, window_bounds = array<i64: 64, 64>}, {pipeline_mode = #tpu.pipeline_mode<synchronous>, transform_indices = @transform_6, window_bounds = array<i64: 2, 64>}, {pipeline_mode = #tpu.pipeline_mode<synchronous>, transform_indices = @transform_7, window_bounds = array<i64: 9, 128>}, {pipeline_mode = #tpu.pipeline_mode<synchronous>, transform_indices = @transform_8, window_bounds = array<i64: 2, 128>}, {pipeline_mode = #tpu.pipeline_mode<synchronous>, transform_indices = @transform_9, window_bounds = array<i64: 128, 128>}, {pipeline_mode = #tpu.pipeline_mode<synchronous>, transform_indices = @transform_10, window_bounds = array<i64: 2, 128>}, {pipeline_mode = #tpu.pipeline_mode<synchronous>, transform_indices = @transform_11, window_bounds = array<i64: 512, 32>}, {pipeline_mode = #tpu.pipeline_mode<synchronous>, transform_indices = @transform_12, window_bounds = array<i64: 32, 32>}, {pipeline_mode = #tpu.pipeline_mode<synchronous>, transform_indices = @transform_13, window_bounds = array<i64: 2, 32>}, {pipeline_mode = #tpu.pipeline_mode<synchronous>, transform_indices = @transform_14, window_bounds = array<i64: 32, 10>}, {pipeline_mode = #tpu.pipeline_mode<synchronous>, transform_indices = @transform_15, window_bounds = array<i64: 2, 10>}, {pipeline_mode = #tpu.pipeline_mode<synchronous>, transform_indices = @transform_16, window_bounds = array<i64: 6, 128, 64>}, {pipeline_mode = #tpu.pipeline_mode<synchronous>, transform_indices = @transform_17, window_bounds = array<i64: 2, 16, 2, 128>}, {pipeline_mode = #tpu.pipeline_mode<synchronous>, transform_indices = @transform_18, window_bounds = array<i64: 2, 4, 2, 128>}, {pipeline_mode = #tpu.pipeline_mode<synchronous>, transform_indices = @transform_19, window_bounds = array<i64: 2, 2, 32>}, {pipeline_mode = #tpu.pipeline_mode<synchronous>, transform_indices = @transform_20, window_bounds = array<i64: 2, 10>}, {transform_indices = @transform_21, window_bounds = array<i64: 1, 2, 128>}, {pipeline_mode = #tpu.pipeline_mode<synchronous>, transform_indices = @transform_22, window_bounds = array<i64: 6, 128, 64>}, {pipeline_mode = #tpu.pipeline_mode<synchronous>, transform_indices = @transform_23, window_bounds = array<i64: 2, 16, 2, 128>}, {pipeline_mode = #tpu.pipeline_mode<synchronous>, transform_indices = @transform_24, window_bounds = array<i64: 2, 4, 2, 128>}, {pipeline_mode = #tpu.pipeline_mode<synchronous>, transform_indices = @transform_25, window_bounds = array<i64: 2, 2, 32>}, {pipeline_mode = #tpu.pipeline_mode<synchronous>, transform_indices = @transform_26, window_bounds = array<i64: 2, 10>}]} {
    %c0_i32 = arith.constant 0 : i32
    %0 = arith.cmpi eq, %arg0, %c0_i32 : i32
    %1 = arith.extui %0 : i1 to i32
    %c0_i32_0 = arith.constant 0 : i32
    %2 = arith.cmpi ne, %1, %c0_i32_0 : i32
    scf.if %2 {
      %c0_351 = arith.constant 0 : index
      %c0_352 = arith.constant 0 : index
      %c0_353 = arith.constant 0 : index
      %523 = vector.load %arg17[%c0_351, %c0_352, %c0_353] : memref<6x128x64xf32, #tpu.memory_space<vmem>>, vector<6x128x64xf32>
      %c0_354 = arith.constant 0 : index
      %c0_355 = arith.constant 0 : index
      %c0_356 = arith.constant 0 : index
      %524 = vector.load %arg23[%c0_354, %c0_355, %c0_356] : memref<6x128x64xf32, #tpu.memory_space<vmem>>, vector<6x128x64xf32>
      tpu.vector_store %arg23[%c0_354, %c0_355, %c0_356], %523 {strides = array<i32>} : memref<6x128x64xf32, #tpu.memory_space<vmem>>, vector<6x128x64xf32>,
      %c0_357 = arith.constant 0 : index
      %c0_358 = arith.constant 0 : index
      %c0_359 = arith.constant 0 : index
      %c0_360 = arith.constant 0 : index
      %525 = vector.load %arg18[%c0_357, %c0_358, %c0_359, %c0_360] : memref<2x16x2x128xf32, #tpu.memory_space<vmem>>, vector<2x16x2x128xf32>
      %c0_361 = arith.constant 0 : index
      %c0_362 = arith.constant 0 : index
      %c0_363 = arith.constant 0 : index
      %c0_364 = arith.constant 0 : index
      %526 = vector.load %arg24[%c0_361, %c0_362, %c0_363, %c0_364] : memref<2x16x2x128xf32, #tpu.memory_space<vmem>>, vector<2x16x2x128xf32>
      tpu.vector_store %arg24[%c0_361, %c0_362, %c0_363, %c0_364], %525 {strides = array<i32>} : memref<2x16x2x128xf32, #tpu.memory_space<vmem>>, vector<2x16x2x128xf32>,
      %c0_365 = arith.constant 0 : index
      %c0_366 = arith.constant 0 : index
      %c0_367 = arith.constant 0 : index
      %c0_368 = arith.constant 0 : index
      %527 = vector.load %arg19[%c0_365, %c0_366, %c0_367, %c0_368] : memref<2x4x2x128xf32, #tpu.memory_space<vmem>>, vector<2x4x2x128xf32>
      %c0_369 = arith.constant 0 : index
      %c0_370 = arith.constant 0 : index
      %c0_371 = arith.constant 0 : index
      %c0_372 = arith.constant 0 : index
      %528 = vector.load %arg25[%c0_369, %c0_370, %c0_371, %c0_372] : memref<2x4x2x128xf32, #tpu.memory_space<vmem>>, vector<2x4x2x128xf32>
      tpu.vector_store %arg25[%c0_369, %c0_370, %c0_371, %c0_372], %527 {strides = array<i32>} : memref<2x4x2x128xf32, #tpu.memory_space<vmem>>, vector<2x4x2x128xf32>,
      %c0_373 = arith.constant 0 : index
      %c0_374 = arith.constant 0 : index
      %c0_375 = arith.constant 0 : index
      %529 = vector.load %arg20[%c0_373, %c0_374, %c0_375] : memref<2x2x32xf32, #tpu.memory_space<vmem>>, vector<2x2x32xf32>
      %c0_376 = arith.constant 0 : index
      %c0_377 = arith.constant 0 : index
      %c0_378 = arith.constant 0 : index
      %530 = vector.load %arg26[%c0_376, %c0_377, %c0_378] : memref<2x2x32xf32, #tpu.memory_space<vmem>>, vector<2x2x32xf32>
      tpu.vector_store %arg26[%c0_376, %c0_377, %c0_378], %529 {strides = array<i32>} : memref<2x2x32xf32, #tpu.memory_space<vmem>>, vector<2x2x32xf32>,
      %c0_379 = arith.constant 0 : index
      %c0_380 = arith.constant 0 : index
      %531 = vector.load %arg21[%c0_379, %c0_380] : memref<2x10xf32, #tpu.memory_space<vmem>>, vector<2x10xf32>
      %c0_381 = arith.constant 0 : index
      %c0_382 = arith.constant 0 : index
      %532 = vector.load %arg27[%c0_381, %c0_382] : memref<2x10xf32, #tpu.memory_space<vmem>>, vector<2x10xf32>
      tpu.vector_store %arg27[%c0_381, %c0_382], %531 {strides = array<i32>} : memref<2x10xf32, #tpu.memory_space<vmem>>, vector<2x10xf32>,
      %cst_383 = arith.constant 0.000000e+00 : f32
      %533 = vector.broadcast %cst_383 : f32 to vector<2x10x10x64xf32>
      %c0_384 = arith.constant 0 : index
      %c0_385 = arith.constant 0 : index
      %c0_386 = arith.constant 0 : index
      %c0_387 = arith.constant 0 : index
      %534 = vector.load %arg28[%c0_384, %c0_385, %c0_386, %c0_387] : memref<2x10x10x64xf32, #tpu.memory_space<vmem>>, vector<2x10x10x64xf32>
      tpu.vector_store %arg28[%c0_384, %c0_385, %c0_386, %c0_387], %533 {strides = array<i32>} : memref<2x10x10x64xf32, #tpu.memory_space<vmem>>, vector<2x10x10x64xf32>,
      %cst_388 = arith.constant 0.000000e+00 : f32
      %535 = vector.broadcast %cst_388 : f32 to vector<2x10x10x128xf32>
      %c0_389 = arith.constant 0 : index
      %c0_390 = arith.constant 0 : index
      %c0_391 = arith.constant 0 : index
      %c0_392 = arith.constant 0 : index
      %536 = vector.load %arg29[%c0_389, %c0_390, %c0_391, %c0_392] : memref<2x10x10x128xf32, #tpu.memory_space<vmem>>, vector<2x10x10x128xf32>
      tpu.vector_store %arg29[%c0_389, %c0_390, %c0_391, %c0_392], %535 {strides = array<i32>} : memref<2x10x10x128xf32, #tpu.memory_space<vmem>>, vector<2x10x10x128xf32>,
    } else {
    }
    %c0 = arith.constant 0 : index
    %c0_1 = arith.constant 0 : index
    %c0_2 = arith.constant 0 : index
    %3 = vector.load %arg1[%c0, %c0_1, %c0_2] : memref<1x128x18xbf16, #tpu.memory_space<vmem>>, vector<1x128x18xbf16>
    %4 = vector.shape_cast %3 : vector<1x128x18xbf16> to vector<128x18xbf16>
    %c0_3 = arith.constant 0 : index
    %c0_4 = arith.constant 0 : index
    %5 = vector.load %arg2[%c0_3, %c0_4] : memref<18x64xbf16, #tpu.memory_space<vmem>>, vector<18x64xbf16>
    %cst = arith.constant dense<0.000000e+00> : vector<128x64xf32>
    %6 = tpu.matmul %4, %5, %cst {dimension_numbers = #tpu.dot_dimension_numbers<[1], [0], [0], [1], [0, 0, 1, 1], [], []>} : vector<128x18xbf16>, vector<18x64xbf16>, vector<128x64xf32> -> vector<128x64xf32>
    %c0_5 = arith.constant 0 : index
    %c0_6 = arith.constant 0 : index
    %c0_7 = arith.constant 0 : index
    %7 = vector.load %arg23[%c0_5, %c0_6, %c0_7] : memref<6x128x64xf32, #tpu.memory_space<vmem>>, vector<1x128x64xf32>
    %8 = vector.shape_cast %7 : vector<1x128x64xf32> to vector<128x64xf32>
    %c1 = arith.constant 1 : index
    %c0_8 = arith.constant 0 : index
    %c0_9 = arith.constant 0 : index
    %9 = vector.load %arg23[%c1, %c0_8, %c0_9] : memref<6x128x64xf32, #tpu.memory_space<vmem>>, vector<1x128x64xf32>
    %10 = vector.shape_cast %9 : vector<1x128x64xf32> to vector<128x64xf32>
    %c0_10 = arith.constant 0 : index
    %c0_11 = arith.constant 0 : index
    %11 = vector.load %arg3[%c0_10, %c0_11] : memref<2x64xf32, #tpu.memory_space<vmem>>, vector<1x64xf32>
    %c1_12 = arith.constant 1 : index
    %c0_13 = arith.constant 0 : index
    %12 = vector.load %arg3[%c1_12, %c0_13] : memref<2x64xf32, #tpu.memory_space<vmem>>, vector<1x64xf32>
    %13 = vector.broadcast %12 : vector<1x64xf32> to vector<128x64xf32>
    %14 = arith.mulf %8, %13 : vector<128x64xf32>
    %cst_14 = arith.constant 1.000000e+00 : f32
    %15 = vector.broadcast %cst_14 : f32 to vector<128x64xf32>
    %16 = arith.subf %15, %10 : vector<128x64xf32>
    %17 = arith.mulf %14, %16 : vector<128x64xf32>
    %cst_15 = arith.constant 1.000000e+00 : f32
    %18 = vector.broadcast %cst_15 : f32 to vector<1x64xf32>
    %19 = arith.subf %18, %12 : vector<1x64xf32>
    %20 = vector.broadcast %11 : vector<1x64xf32> to vector<128x64xf32>
    %21 = arith.addf %6, %20 : vector<128x64xf32>
    %22 = vector.broadcast %19 : vector<1x64xf32> to vector<128x64xf32>
    %23 = arith.mulf %22, %21 : vector<128x64xf32>
    %24 = arith.addf %17, %23 : vector<128x64xf32>
    %cst_16 = arith.constant 5.000000e-01 : f32
    %25 = vector.broadcast %cst_16 : f32 to vector<128x64xf32>
    %26 = arith.cmpf ogt, %24, %25 : vector<128x64xf32>
    %27 = arith.extui %26 : vector<128x64xi1> to vector<128x64xi32>
    %28 = arith.sitofp %27 : vector<128x64xi32> to vector<128x64xf32>
    %c0_17 = arith.constant 0 : index
    %c0_18 = arith.constant 0 : index
    %c0_19 = arith.constant 0 : index
    %29 = vector.load %arg23[%c0_17, %c0_18, %c0_19] : memref<6x128x64xf32, #tpu.memory_space<vmem>>, vector<1x128x64xf32>
    %30 = vector.shape_cast %29 : vector<1x128x64xf32> to vector<128x64xf32>
    %31 = vector.shape_cast %24 : vector<128x64xf32> to vector<1x128x64xf32>
    tpu.vector_store %arg23[%c0_17, %c0_18, %c0_19], %31 {strides = array<i32>} : memref<6x128x64xf32, #tpu.memory_space<vmem>>, vector<1x128x64xf32>,
    %c1_20 = arith.constant 1 : index
    %c0_21 = arith.constant 0 : index
    %c0_22 = arith.constant 0 : index
    %32 = vector.load %arg23[%c1_20, %c0_21, %c0_22] : memref<6x128x64xf32, #tpu.memory_space<vmem>>, vector<1x128x64xf32>
    %33 = vector.shape_cast %32 : vector<1x128x64xf32> to vector<128x64xf32>
    %34 = vector.shape_cast %28 : vector<128x64xf32> to vector<1x128x64xf32>
    tpu.vector_store %arg23[%c1_20, %c0_21, %c0_22], %34 {strides = array<i32>} : memref<6x128x64xf32, #tpu.memory_space<vmem>>, vector<1x128x64xf32>,
    %35 = vector.shape_cast %28 : vector<128x64xf32> to vector<2x8x8x64xf32>
    %c0_23 = arith.constant 0 : index
    %c1_24 = arith.constant 1 : index
    %c1_25 = arith.constant 1 : index
    %c0_26 = arith.constant 0 : index
    %36 = vector.load %arg28[%c0_23, %c1_24, %c1_25, %c0_26] : memref<2x10x10x64xf32, #tpu.memory_space<vmem>>, vector<2x8x8x64xf32>
    tpu.vector_store %arg28[%c0_23, %c1_24, %c1_25, %c0_26], %35 {strides = array<i32>} : memref<2x10x10x64xf32, #tpu.memory_space<vmem>>, vector<2x8x8x64xf32>,
    %c0_27 = arith.constant 0 : index
    %c0_28 = arith.constant 0 : index
    %37 = vector.load %arg4[%c0_27, %c0_28] : memref<9x64xf32, #tpu.memory_space<vmem>>, vector<9x64xf32>
    %cst_29 = arith.constant 0.000000e+00 : f32
    %38 = vector.broadcast %cst_29 : f32 to vector<2x8x8x64xf32>
    %c0_30 = arith.constant 0 : index
    %c0_31 = arith.constant 0 : index
    %c0_32 = arith.constant 0 : index
    %c0_33 = arith.constant 0 : index
    %39 = vector.load %arg28[%c0_30, %c0_31, %c0_32, %c0_33] : memref<2x10x10x64xf32, #tpu.memory_space<vmem>>, vector<2x8x8x64xf32>
    %40 = vector.extract_strided_slice %37 {offsets = [0, 0], sizes = [1, 64], strides = [1, 1]} : vector<9x64xf32> to vector<1x64xf32>
    %41 = vector.shape_cast %40 : vector<1x64xf32> to vector<1x1x1x64xf32>
    %42 = vector.broadcast %41 : vector<1x1x1x64xf32> to vector<2x8x8x64xf32>
    %43 = arith.mulf %39, %42 : vector<2x8x8x64xf32>
    %44 = arith.addf %38, %43 : vector<2x8x8x64xf32>
    %c0_34 = arith.constant 0 : index
    %c0_35 = arith.constant 0 : index
    %c1_36 = arith.constant 1 : index
    %c0_37 = arith.constant 0 : index
    %45 = vector.load %arg28[%c0_34, %c0_35, %c1_36, %c0_37] : memref<2x10x10x64xf32, #tpu.memory_space<vmem>>, vector<2x8x8x64xf32>
    %46 = vector.extract_strided_slice %37 {offsets = [1, 0], sizes = [1, 64], strides = [1, 1]} : vector<9x64xf32> to vector<1x64xf32>
    %47 = vector.shape_cast %46 : vector<1x64xf32> to vector<1x1x1x64xf32>
    %48 = vector.broadcast %47 : vector<1x1x1x64xf32> to vector<2x8x8x64xf32>
    %49 = arith.mulf %45, %48 : vector<2x8x8x64xf32>
    %50 = arith.addf %44, %49 : vector<2x8x8x64xf32>
    %c0_38 = arith.constant 0 : index
    %c0_39 = arith.constant 0 : index
    %c2 = arith.constant 2 : index
    %c0_40 = arith.constant 0 : index
    %51 = vector.load %arg28[%c0_38, %c0_39, %c2, %c0_40] : memref<2x10x10x64xf32, #tpu.memory_space<vmem>>, vector<2x8x8x64xf32>
    %52 = vector.extract_strided_slice %37 {offsets = [2, 0], sizes = [1, 64], strides = [1, 1]} : vector<9x64xf32> to vector<1x64xf32>
    %53 = vector.shape_cast %52 : vector<1x64xf32> to vector<1x1x1x64xf32>
    %54 = vector.broadcast %53 : vector<1x1x1x64xf32> to vector<2x8x8x64xf32>
    %55 = arith.mulf %51, %54 : vector<2x8x8x64xf32>
    %56 = arith.addf %50, %55 : vector<2x8x8x64xf32>
    %c0_41 = arith.constant 0 : index
    %c1_42 = arith.constant 1 : index
    %c0_43 = arith.constant 0 : index
    %c0_44 = arith.constant 0 : index
    %57 = vector.load %arg28[%c0_41, %c1_42, %c0_43, %c0_44] : memref<2x10x10x64xf32, #tpu.memory_space<vmem>>, vector<2x8x8x64xf32>
    %58 = vector.extract_strided_slice %37 {offsets = [3, 0], sizes = [1, 64], strides = [1, 1]} : vector<9x64xf32> to vector<1x64xf32>
    %59 = vector.shape_cast %58 : vector<1x64xf32> to vector<1x1x1x64xf32>
    %60 = vector.broadcast %59 : vector<1x1x1x64xf32> to vector<2x8x8x64xf32>
    %61 = arith.mulf %57, %60 : vector<2x8x8x64xf32>
    %62 = arith.addf %56, %61 : vector<2x8x8x64xf32>
    %c0_45 = arith.constant 0 : index
    %c1_46 = arith.constant 1 : index
    %c1_47 = arith.constant 1 : index
    %c0_48 = arith.constant 0 : index
    %63 = vector.load %arg28[%c0_45, %c1_46, %c1_47, %c0_48] : memref<2x10x10x64xf32, #tpu.memory_space<vmem>>, vector<2x8x8x64xf32>
    %64 = vector.extract_strided_slice %37 {offsets = [4, 0], sizes = [1, 64], strides = [1, 1]} : vector<9x64xf32> to vector<1x64xf32>
    %65 = vector.shape_cast %64 : vector<1x64xf32> to vector<1x1x1x64xf32>
    %66 = vector.broadcast %65 : vector<1x1x1x64xf32> to vector<2x8x8x64xf32>
    %67 = arith.mulf %63, %66 : vector<2x8x8x64xf32>
    %68 = arith.addf %62, %67 : vector<2x8x8x64xf32>
    %c0_49 = arith.constant 0 : index
    %c1_50 = arith.constant 1 : index
    %c2_51 = arith.constant 2 : index
    %c0_52 = arith.constant 0 : index
    %69 = vector.load %arg28[%c0_49, %c1_50, %c2_51, %c0_52] : memref<2x10x10x64xf32, #tpu.memory_space<vmem>>, vector<2x8x8x64xf32>
    %70 = vector.extract_strided_slice %37 {offsets = [5, 0], sizes = [1, 64], strides = [1, 1]} : vector<9x64xf32> to vector<1x64xf32>
    %71 = vector.shape_cast %70 : vector<1x64xf32> to vector<1x1x1x64xf32>
    %72 = vector.broadcast %71 : vector<1x1x1x64xf32> to vector<2x8x8x64xf32>
    %73 = arith.mulf %69, %72 : vector<2x8x8x64xf32>
    %74 = arith.addf %68, %73 : vector<2x8x8x64xf32>
    %c0_53 = arith.constant 0 : index
    %c2_54 = arith.constant 2 : index
    %c0_55 = arith.constant 0 : index
    %c0_56 = arith.constant 0 : index
    %75 = vector.load %arg28[%c0_53, %c2_54, %c0_55, %c0_56] : memref<2x10x10x64xf32, #tpu.memory_space<vmem>>, vector<2x8x8x64xf32>
    %76 = vector.extract_strided_slice %37 {offsets = [6, 0], sizes = [1, 64], strides = [1, 1]} : vector<9x64xf32> to vector<1x64xf32>
    %77 = vector.shape_cast %76 : vector<1x64xf32> to vector<1x1x1x64xf32>
    %78 = vector.broadcast %77 : vector<1x1x1x64xf32> to vector<2x8x8x64xf32>
    %79 = arith.mulf %75, %78 : vector<2x8x8x64xf32>
    %80 = arith.addf %74, %79 : vector<2x8x8x64xf32>
    %c0_57 = arith.constant 0 : index
    %c2_58 = arith.constant 2 : index
    %c1_59 = arith.constant 1 : index
    %c0_60 = arith.constant 0 : index
    %81 = vector.load %arg28[%c0_57, %c2_58, %c1_59, %c0_60] : memref<2x10x10x64xf32, #tpu.memory_space<vmem>>, vector<2x8x8x64xf32>
    %82 = vector.extract_strided_slice %37 {offsets = [7, 0], sizes = [1, 64], strides = [1, 1]} : vector<9x64xf32> to vector<1x64xf32>
    %83 = vector.shape_cast %82 : vector<1x64xf32> to vector<1x1x1x64xf32>
    %84 = vector.broadcast %83 : vector<1x1x1x64xf32> to vector<2x8x8x64xf32>
    %85 = arith.mulf %81, %84 : vector<2x8x8x64xf32>
    %86 = arith.addf %80, %85 : vector<2x8x8x64xf32>
    %c0_61 = arith.constant 0 : index
    %c2_62 = arith.constant 2 : index
    %c2_63 = arith.constant 2 : index
    %c0_64 = arith.constant 0 : index
    %87 = vector.load %arg28[%c0_61, %c2_62, %c2_63, %c0_64] : memref<2x10x10x64xf32, #tpu.memory_space<vmem>>, vector<2x8x8x64xf32>
    %88 = vector.extract_strided_slice %37 {offsets = [8, 0], sizes = [1, 64], strides = [1, 1]} : vector<9x64xf32> to vector<1x64xf32>
    %89 = vector.shape_cast %88 : vector<1x64xf32> to vector<1x1x1x64xf32>
    %90 = vector.broadcast %89 : vector<1x1x1x64xf32> to vector<2x8x8x64xf32>
    %91 = arith.mulf %87, %90 : vector<2x8x8x64xf32>
    %92 = arith.addf %86, %91 : vector<2x8x8x64xf32>
    %c2_65 = arith.constant 2 : index
    %c0_66 = arith.constant 0 : index
    %c0_67 = arith.constant 0 : index
    %93 = vector.load %arg23[%c2_65, %c0_66, %c0_67] : memref<6x128x64xf32, #tpu.memory_space<vmem>>, vector<1x128x64xf32>
    %94 = vector.shape_cast %93 : vector<1x128x64xf32> to vector<128x64xf32>
    %c3 = arith.constant 3 : index
    %c0_68 = arith.constant 0 : index
    %c0_69 = arith.constant 0 : index
    %95 = vector.load %arg23[%c3, %c0_68, %c0_69] : memref<6x128x64xf32, #tpu.memory_space<vmem>>, vector<1x128x64xf32>
    %96 = vector.shape_cast %95 : vector<1x128x64xf32> to vector<128x64xf32>
    %97 = vector.shape_cast %92 : vector<2x8x8x64xf32> to vector<128x64xf32>
    %c0_70 = arith.constant 0 : index
    %c0_71 = arith.constant 0 : index
    %98 = vector.load %arg5[%c0_70, %c0_71] : memref<2x64xf32, #tpu.memory_space<vmem>>, vector<1x64xf32>
    %c1_72 = arith.constant 1 : index
    %c0_73 = arith.constant 0 : index
    %99 = vector.load %arg5[%c1_72, %c0_73] : memref<2x64xf32, #tpu.memory_space<vmem>>, vector<1x64xf32>
    %100 = vector.broadcast %99 : vector<1x64xf32> to vector<128x64xf32>
    %101 = arith.mulf %94, %100 : vector<128x64xf32>
    %cst_74 = arith.constant 1.000000e+00 : f32
    %102 = vector.broadcast %cst_74 : f32 to vector<128x64xf32>
    %103 = arith.subf %102, %96 : vector<128x64xf32>
    %104 = arith.mulf %101, %103 : vector<128x64xf32>
    %cst_75 = arith.constant 1.000000e+00 : f32
    %105 = vector.broadcast %cst_75 : f32 to vector<1x64xf32>
    %106 = arith.subf %105, %99 : vector<1x64xf32>
    %107 = vector.broadcast %98 : vector<1x64xf32> to vector<128x64xf32>
    %108 = arith.addf %97, %107 : vector<128x64xf32>
    %109 = vector.broadcast %106 : vector<1x64xf32> to vector<128x64xf32>
    %110 = arith.mulf %109, %108 : vector<128x64xf32>
    %111 = arith.addf %104, %110 : vector<128x64xf32>
    %cst_76 = arith.constant 5.000000e-01 : f32
    %112 = vector.broadcast %cst_76 : f32 to vector<128x64xf32>
    %113 = arith.cmpf ogt, %111, %112 : vector<128x64xf32>
    %114 = arith.extui %113 : vector<128x64xi1> to vector<128x64xi32>
    %115 = arith.sitofp %114 : vector<128x64xi32> to vector<128x64xf32>
    %c2_77 = arith.constant 2 : index
    %c0_78 = arith.constant 0 : index
    %c0_79 = arith.constant 0 : index
    %116 = vector.load %arg23[%c2_77, %c0_78, %c0_79] : memref<6x128x64xf32, #tpu.memory_space<vmem>>, vector<1x128x64xf32>
    %117 = vector.shape_cast %116 : vector<1x128x64xf32> to vector<128x64xf32>
    %118 = vector.shape_cast %111 : vector<128x64xf32> to vector<1x128x64xf32>
    tpu.vector_store %arg23[%c2_77, %c0_78, %c0_79], %118 {strides = array<i32>} : memref<6x128x64xf32, #tpu.memory_space<vmem>>, vector<1x128x64xf32>,
    %c3_80 = arith.constant 3 : index
    %c0_81 = arith.constant 0 : index
    %c0_82 = arith.constant 0 : index
    %119 = vector.load %arg23[%c3_80, %c0_81, %c0_82] : memref<6x128x64xf32, #tpu.memory_space<vmem>>, vector<1x128x64xf32>
    %120 = vector.shape_cast %119 : vector<1x128x64xf32> to vector<128x64xf32>
    %121 = vector.shape_cast %115 : vector<128x64xf32> to vector<1x128x64xf32>
    tpu.vector_store %arg23[%c3_80, %c0_81, %c0_82], %121 {strides = array<i32>} : memref<6x128x64xf32, #tpu.memory_space<vmem>>, vector<1x128x64xf32>,
    %122 = arith.truncf %115 : vector<128x64xf32> to vector<128x64xbf16>
    %c0_83 = arith.constant 0 : index
    %c0_84 = arith.constant 0 : index
    %123 = vector.load %arg6[%c0_83, %c0_84] : memref<64x64xbf16, #tpu.memory_space<vmem>>, vector<64x64xbf16>
    %cst_85 = arith.constant dense<0.000000e+00> : vector<128x64xf32>
    %124 = tpu.matmul %122, %123, %cst_85 {dimension_numbers = #tpu.dot_dimension_numbers<[1], [0], [0], [1], [0, 0, 1, 1], [], []>} : vector<128x64xbf16>, vector<64x64xbf16>, vector<128x64xf32> -> vector<128x64xf32>
    %c4 = arith.constant 4 : index
    %c0_86 = arith.constant 0 : index
    %c0_87 = arith.constant 0 : index
    %125 = vector.load %arg23[%c4, %c0_86, %c0_87] : memref<6x128x64xf32, #tpu.memory_space<vmem>>, vector<1x128x64xf32>
    %126 = vector.shape_cast %125 : vector<1x128x64xf32> to vector<128x64xf32>
    %c5 = arith.constant 5 : index
    %c0_88 = arith.constant 0 : index
    %c0_89 = arith.constant 0 : index
    %127 = vector.load %arg23[%c5, %c0_88, %c0_89] : memref<6x128x64xf32, #tpu.memory_space<vmem>>, vector<1x128x64xf32>
    %128 = vector.shape_cast %127 : vector<1x128x64xf32> to vector<128x64xf32>
    %c0_90 = arith.constant 0 : index
    %c0_91 = arith.constant 0 : index
    %129 = vector.load %arg7[%c0_90, %c0_91] : memref<2x64xf32, #tpu.memory_space<vmem>>, vector<1x64xf32>
    %c1_92 = arith.constant 1 : index
    %c0_93 = arith.constant 0 : index
    %130 = vector.load %arg7[%c1_92, %c0_93] : memref<2x64xf32, #tpu.memory_space<vmem>>, vector<1x64xf32>
    %131 = vector.broadcast %130 : vector<1x64xf32> to vector<128x64xf32>
    %132 = arith.mulf %126, %131 : vector<128x64xf32>
    %cst_94 = arith.constant 1.000000e+00 : f32
    %133 = vector.broadcast %cst_94 : f32 to vector<128x64xf32>
    %134 = arith.subf %133, %128 : vector<128x64xf32>
    %135 = arith.mulf %132, %134 : vector<128x64xf32>
    %cst_95 = arith.constant 1.000000e+00 : f32
    %136 = vector.broadcast %cst_95 : f32 to vector<1x64xf32>
    %137 = arith.subf %136, %130 : vector<1x64xf32>
    %138 = vector.broadcast %129 : vector<1x64xf32> to vector<128x64xf32>
    %139 = arith.addf %124, %138 : vector<128x64xf32>
    %140 = vector.broadcast %137 : vector<1x64xf32> to vector<128x64xf32>
    %141 = arith.mulf %140, %139 : vector<128x64xf32>
    %142 = arith.addf %135, %141 : vector<128x64xf32>
    %cst_96 = arith.constant 5.000000e-01 : f32
    %143 = vector.broadcast %cst_96 : f32 to vector<128x64xf32>
    %144 = arith.cmpf ogt, %142, %143 : vector<128x64xf32>
    %145 = arith.extui %144 : vector<128x64xi1> to vector<128x64xi32>
    %146 = arith.sitofp %145 : vector<128x64xi32> to vector<128x64xf32>
    %c4_97 = arith.constant 4 : index
    %c0_98 = arith.constant 0 : index
    %c0_99 = arith.constant 0 : index
    %147 = vector.load %arg23[%c4_97, %c0_98, %c0_99] : memref<6x128x64xf32, #tpu.memory_space<vmem>>, vector<1x128x64xf32>
    %148 = vector.shape_cast %147 : vector<1x128x64xf32> to vector<128x64xf32>
    %149 = vector.shape_cast %142 : vector<128x64xf32> to vector<1x128x64xf32>
    tpu.vector_store %arg23[%c4_97, %c0_98, %c0_99], %149 {strides = array<i32>} : memref<6x128x64xf32, #tpu.memory_space<vmem>>, vector<1x128x64xf32>,
    %c5_100 = arith.constant 5 : index
    %c0_101 = arith.constant 0 : index
    %c0_102 = arith.constant 0 : index
    %150 = vector.load %arg23[%c5_100, %c0_101, %c0_102] : memref<6x128x64xf32, #tpu.memory_space<vmem>>, vector<1x128x64xf32>
    %151 = vector.shape_cast %150 : vector<1x128x64xf32> to vector<128x64xf32>
    %152 = vector.shape_cast %146 : vector<128x64xf32> to vector<1x128x64xf32>
    tpu.vector_store %arg23[%c5_100, %c0_101, %c0_102], %152 {strides = array<i32>} : memref<6x128x64xf32, #tpu.memory_space<vmem>>, vector<1x128x64xf32>,
    %153 = vector.shape_cast %146 : vector<128x64xf32> to vector<2x8x8x64xf32>
    %c0_103 = arith.constant 0 : index
    %c1_104 = arith.constant 1 : index
    %c1_105 = arith.constant 1 : index
    %c0_106 = arith.constant 0 : index
    %154 = vector.load %arg29[%c0_103, %c1_104, %c1_105, %c0_106] : memref<2x10x10x128xf32, #tpu.memory_space<vmem>>, vector<2x8x8x64xf32>
    tpu.vector_store %arg29[%c0_103, %c1_104, %c1_105, %c0_106], %153 {strides = array<i32>} : memref<2x10x10x128xf32, #tpu.memory_space<vmem>>, vector<2x8x8x64xf32>,
    %c0_107 = arith.constant 0 : index
    %c1_108 = arith.constant 1 : index
    %c1_109 = arith.constant 1 : index
    %c64 = arith.constant 64 : index
    %155 = vector.load %arg29[%c0_107, %c1_108, %c1_109, %c64] : memref<2x10x10x128xf32, #tpu.memory_space<vmem>>, vector<2x8x8x64xf32>
    tpu.vector_store %arg29[%c0_107, %c1_108, %c1_109, %c64], %153 {strides = array<i32>} : memref<2x10x10x128xf32, #tpu.memory_space<vmem>>, vector<2x8x8x64xf32>,
    %c0_110 = arith.constant 0 : index
    %c0_111 = arith.constant 0 : index
    %156 = vector.load %arg8[%c0_110, %c0_111] : memref<9x128xf32, #tpu.memory_space<vmem>>, vector<9x128xf32>
    %cst_112 = arith.constant 0.000000e+00 : f32
    %157 = vector.broadcast %cst_112 : f32 to vector<2x8x8x128xf32>
    %c0_113 = arith.constant 0 : index
    %c0_114 = arith.constant 0 : index
    %c0_115 = arith.constant 0 : index
    %c0_116 = arith.constant 0 : index
    %158 = vector.load %arg29[%c0_113, %c0_114, %c0_115, %c0_116] : memref<2x10x10x128xf32, #tpu.memory_space<vmem>>, vector<2x8x8x128xf32>
    %159 = vector.extract_strided_slice %156 {offsets = [0, 0], sizes = [1, 128], strides = [1, 1]} : vector<9x128xf32> to vector<1x128xf32>
    %160 = vector.shape_cast %159 : vector<1x128xf32> to vector<1x1x1x128xf32>
    %161 = vector.broadcast %160 : vector<1x1x1x128xf32> to vector<2x8x8x128xf32>
    %162 = arith.mulf %158, %161 : vector<2x8x8x128xf32>
    %163 = arith.addf %157, %162 : vector<2x8x8x128xf32>
    %c0_117 = arith.constant 0 : index
    %c0_118 = arith.constant 0 : index
    %c1_119 = arith.constant 1 : index
    %c0_120 = arith.constant 0 : index
    %164 = vector.load %arg29[%c0_117, %c0_118, %c1_119, %c0_120] : memref<2x10x10x128xf32, #tpu.memory_space<vmem>>, vector<2x8x8x128xf32>
    %165 = vector.extract_strided_slice %156 {offsets = [1, 0], sizes = [1, 128], strides = [1, 1]} : vector<9x128xf32> to vector<1x128xf32>
    %166 = vector.shape_cast %165 : vector<1x128xf32> to vector<1x1x1x128xf32>
    %167 = vector.broadcast %166 : vector<1x1x1x128xf32> to vector<2x8x8x128xf32>
    %168 = arith.mulf %164, %167 : vector<2x8x8x128xf32>
    %169 = arith.addf %163, %168 : vector<2x8x8x128xf32>
    %c0_121 = arith.constant 0 : index
    %c0_122 = arith.constant 0 : index
    %c2_123 = arith.constant 2 : index
    %c0_124 = arith.constant 0 : index
    %170 = vector.load %arg29[%c0_121, %c0_122, %c2_123, %c0_124] : memref<2x10x10x128xf32, #tpu.memory_space<vmem>>, vector<2x8x8x128xf32>
    %171 = vector.extract_strided_slice %156 {offsets = [2, 0], sizes = [1, 128], strides = [1, 1]} : vector<9x128xf32> to vector<1x128xf32>
    %172 = vector.shape_cast %171 : vector<1x128xf32> to vector<1x1x1x128xf32>
    %173 = vector.broadcast %172 : vector<1x1x1x128xf32> to vector<2x8x8x128xf32>
    %174 = arith.mulf %170, %173 : vector<2x8x8x128xf32>
    %175 = arith.addf %169, %174 : vector<2x8x8x128xf32>
    %c0_125 = arith.constant 0 : index
    %c1_126 = arith.constant 1 : index
    %c0_127 = arith.constant 0 : index
    %c0_128 = arith.constant 0 : index
    %176 = vector.load %arg29[%c0_125, %c1_126, %c0_127, %c0_128] : memref<2x10x10x128xf32, #tpu.memory_space<vmem>>, vector<2x8x8x128xf32>
    %177 = vector.extract_strided_slice %156 {offsets = [3, 0], sizes = [1, 128], strides = [1, 1]} : vector<9x128xf32> to vector<1x128xf32>
    %178 = vector.shape_cast %177 : vector<1x128xf32> to vector<1x1x1x128xf32>
    %179 = vector.broadcast %178 : vector<1x1x1x128xf32> to vector<2x8x8x128xf32>
    %180 = arith.mulf %176, %179 : vector<2x8x8x128xf32>
    %181 = arith.addf %175, %180 : vector<2x8x8x128xf32>
    %c0_129 = arith.constant 0 : index
    %c1_130 = arith.constant 1 : index
    %c1_131 = arith.constant 1 : index
    %c0_132 = arith.constant 0 : index
    %182 = vector.load %arg29[%c0_129, %c1_130, %c1_131, %c0_132] : memref<2x10x10x128xf32, #tpu.memory_space<vmem>>, vector<2x8x8x128xf32>
    %183 = vector.extract_strided_slice %156 {offsets = [4, 0], sizes = [1, 128], strides = [1, 1]} : vector<9x128xf32> to vector<1x128xf32>
    %184 = vector.shape_cast %183 : vector<1x128xf32> to vector<1x1x1x128xf32>
    %185 = vector.broadcast %184 : vector<1x1x1x128xf32> to vector<2x8x8x128xf32>
    %186 = arith.mulf %182, %185 : vector<2x8x8x128xf32>
    %187 = arith.addf %181, %186 : vector<2x8x8x128xf32>
    %c0_133 = arith.constant 0 : index
    %c1_134 = arith.constant 1 : index
    %c2_135 = arith.constant 2 : index
    %c0_136 = arith.constant 0 : index
    %188 = vector.load %arg29[%c0_133, %c1_134, %c2_135, %c0_136] : memref<2x10x10x128xf32, #tpu.memory_space<vmem>>, vector<2x8x8x128xf32>
    %189 = vector.extract_strided_slice %156 {offsets = [5, 0], sizes = [1, 128], strides = [1, 1]} : vector<9x128xf32> to vector<1x128xf32>
    %190 = vector.shape_cast %189 : vector<1x128xf32> to vector<1x1x1x128xf32>
    %191 = vector.broadcast %190 : vector<1x1x1x128xf32> to vector<2x8x8x128xf32>
    %192 = arith.mulf %188, %191 : vector<2x8x8x128xf32>
    %193 = arith.addf %187, %192 : vector<2x8x8x128xf32>
    %c0_137 = arith.constant 0 : index
    %c2_138 = arith.constant 2 : index
    %c0_139 = arith.constant 0 : index
    %c0_140 = arith.constant 0 : index
    %194 = vector.load %arg29[%c0_137, %c2_138, %c0_139, %c0_140] : memref<2x10x10x128xf32, #tpu.memory_space<vmem>>, vector<2x8x8x128xf32>
    %195 = vector.extract_strided_slice %156 {offsets = [6, 0], sizes = [1, 128], strides = [1, 1]} : vector<9x128xf32> to vector<1x128xf32>
    %196 = vector.shape_cast %195 : vector<1x128xf32> to vector<1x1x1x128xf32>
    %197 = vector.broadcast %196 : vector<1x1x1x128xf32> to vector<2x8x8x128xf32>
    %198 = arith.mulf %194, %197 : vector<2x8x8x128xf32>
    %199 = arith.addf %193, %198 : vector<2x8x8x128xf32>
    %c0_141 = arith.constant 0 : index
    %c2_142 = arith.constant 2 : index
    %c1_143 = arith.constant 1 : index
    %c0_144 = arith.constant 0 : index
    %200 = vector.load %arg29[%c0_141, %c2_142, %c1_143, %c0_144] : memref<2x10x10x128xf32, #tpu.memory_space<vmem>>, vector<2x8x8x128xf32>
    %201 = vector.extract_strided_slice %156 {offsets = [7, 0], sizes = [1, 128], strides = [1, 1]} : vector<9x128xf32> to vector<1x128xf32>
    %202 = vector.shape_cast %201 : vector<1x128xf32> to vector<1x1x1x128xf32>
    %203 = vector.broadcast %202 : vector<1x1x1x128xf32> to vector<2x8x8x128xf32>
    %204 = arith.mulf %200, %203 : vector<2x8x8x128xf32>
    %205 = arith.addf %199, %204 : vector<2x8x8x128xf32>
    %c0_145 = arith.constant 0 : index
    %c2_146 = arith.constant 2 : index
    %c2_147 = arith.constant 2 : index
    %c0_148 = arith.constant 0 : index
    %206 = vector.load %arg29[%c0_145, %c2_146, %c2_147, %c0_148] : memref<2x10x10x128xf32, #tpu.memory_space<vmem>>, vector<2x8x8x128xf32>
    %207 = vector.extract_strided_slice %156 {offsets = [8, 0], sizes = [1, 128], strides = [1, 1]} : vector<9x128xf32> to vector<1x128xf32>
    %208 = vector.shape_cast %207 : vector<1x128xf32> to vector<1x1x1x128xf32>
    %209 = vector.broadcast %208 : vector<1x1x1x128xf32> to vector<2x8x8x128xf32>
    %210 = arith.mulf %206, %209 : vector<2x8x8x128xf32>
    %211 = arith.addf %205, %210 : vector<2x8x8x128xf32>
    %212 = vector.extract_strided_slice %211 {offsets = [0, 0, 0, 0], sizes = [2, 1, 1, 128], strides = [1, 1, 1, 1]} : vector<2x8x8x128xf32> to vector<2x1x1x128xf32>
    %213 = vector.shape_cast %212 : vector<2x1x1x128xf32> to vector<2x128xf32>
    %c0_149 = arith.constant 0 : index
    %c0_150 = arith.constant 0 : index
    %c0_151 = arith.constant 0 : index
    %214 = vector.load %arg30[%c0_149, %c0_150, %c0_151] : memref<16x2x128xf32, #tpu.memory_space<vmem>>, vector<1x2x128xf32>
    %215 = vector.shape_cast %214 : vector<1x2x128xf32> to vector<2x128xf32>
    %216 = vector.shape_cast %213 : vector<2x128xf32> to vector<1x2x128xf32>
    tpu.vector_store %arg30[%c0_149, %c0_150, %c0_151], %216 {strides = array<i32>} : memref<16x2x128xf32, #tpu.memory_space<vmem>>, vector<1x2x128xf32>,
    %217 = vector.extract_strided_slice %211 {offsets = [0, 0, 2, 0], sizes = [2, 1, 1, 128], strides = [1, 1, 1, 1]} : vector<2x8x8x128xf32> to vector<2x1x1x128xf32>
    %218 = vector.shape_cast %217 : vector<2x1x1x128xf32> to vector<2x128xf32>
    %c1_152 = arith.constant 1 : index
    %c0_153 = arith.constant 0 : index
    %c0_154 = arith.constant 0 : index
    %219 = vector.load %arg30[%c1_152, %c0_153, %c0_154] : memref<16x2x128xf32, #tpu.memory_space<vmem>>, vector<1x2x128xf32>
    %220 = vector.shape_cast %219 : vector<1x2x128xf32> to vector<2x128xf32>
    %221 = vector.shape_cast %218 : vector<2x128xf32> to vector<1x2x128xf32>
    tpu.vector_store %arg30[%c1_152, %c0_153, %c0_154], %221 {strides = array<i32>} : memref<16x2x128xf32, #tpu.memory_space<vmem>>, vector<1x2x128xf32>,
    %222 = vector.extract_strided_slice %211 {offsets = [0, 0, 4, 0], sizes = [2, 1, 1, 128], strides = [1, 1, 1, 1]} : vector<2x8x8x128xf32> to vector<2x1x1x128xf32>
    %223 = vector.shape_cast %222 : vector<2x1x1x128xf32> to vector<2x128xf32>
    %c2_155 = arith.constant 2 : index
    %c0_156 = arith.constant 0 : index
    %c0_157 = arith.constant 0 : index
    %224 = vector.load %arg30[%c2_155, %c0_156, %c0_157] : memref<16x2x128xf32, #tpu.memory_space<vmem>>, vector<1x2x128xf32>
    %225 = vector.shape_cast %224 : vector<1x2x128xf32> to vector<2x128xf32>
    %226 = vector.shape_cast %223 : vector<2x128xf32> to vector<1x2x128xf32>
    tpu.vector_store %arg30[%c2_155, %c0_156, %c0_157], %226 {strides = array<i32>} : memref<16x2x128xf32, #tpu.memory_space<vmem>>, vector<1x2x128xf32>,
    %227 = vector.extract_strided_slice %211 {offsets = [0, 0, 6, 0], sizes = [2, 1, 1, 128], strides = [1, 1, 1, 1]} : vector<2x8x8x128xf32> to vector<2x1x1x128xf32>
    %228 = vector.shape_cast %227 : vector<2x1x1x128xf32> to vector<2x128xf32>
    %c3_158 = arith.constant 3 : index
    %c0_159 = arith.constant 0 : index
    %c0_160 = arith.constant 0 : index
    %229 = vector.load %arg30[%c3_158, %c0_159, %c0_160] : memref<16x2x128xf32, #tpu.memory_space<vmem>>, vector<1x2x128xf32>
    %230 = vector.shape_cast %229 : vector<1x2x128xf32> to vector<2x128xf32>
    %231 = vector.shape_cast %228 : vector<2x128xf32> to vector<1x2x128xf32>
    tpu.vector_store %arg30[%c3_158, %c0_159, %c0_160], %231 {strides = array<i32>} : memref<16x2x128xf32, #tpu.memory_space<vmem>>, vector<1x2x128xf32>,
    %232 = vector.extract_strided_slice %211 {offsets = [0, 2, 0, 0], sizes = [2, 1, 1, 128], strides = [1, 1, 1, 1]} : vector<2x8x8x128xf32> to vector<2x1x1x128xf32>
    %233 = vector.shape_cast %232 : vector<2x1x1x128xf32> to vector<2x128xf32>
    %c4_161 = arith.constant 4 : index
    %c0_162 = arith.constant 0 : index
    %c0_163 = arith.constant 0 : index
    %234 = vector.load %arg30[%c4_161, %c0_162, %c0_163] : memref<16x2x128xf32, #tpu.memory_space<vmem>>, vector<1x2x128xf32>
    %235 = vector.shape_cast %234 : vector<1x2x128xf32> to vector<2x128xf32>
    %236 = vector.shape_cast %233 : vector<2x128xf32> to vector<1x2x128xf32>
    tpu.vector_store %arg30[%c4_161, %c0_162, %c0_163], %236 {strides = array<i32>} : memref<16x2x128xf32, #tpu.memory_space<vmem>>, vector<1x2x128xf32>,
    %237 = vector.extract_strided_slice %211 {offsets = [0, 2, 2, 0], sizes = [2, 1, 1, 128], strides = [1, 1, 1, 1]} : vector<2x8x8x128xf32> to vector<2x1x1x128xf32>
    %238 = vector.shape_cast %237 : vector<2x1x1x128xf32> to vector<2x128xf32>
    %c5_164 = arith.constant 5 : index
    %c0_165 = arith.constant 0 : index
    %c0_166 = arith.constant 0 : index
    %239 = vector.load %arg30[%c5_164, %c0_165, %c0_166] : memref<16x2x128xf32, #tpu.memory_space<vmem>>, vector<1x2x128xf32>
    %240 = vector.shape_cast %239 : vector<1x2x128xf32> to vector<2x128xf32>
    %241 = vector.shape_cast %238 : vector<2x128xf32> to vector<1x2x128xf32>
    tpu.vector_store %arg30[%c5_164, %c0_165, %c0_166], %241 {strides = array<i32>} : memref<16x2x128xf32, #tpu.memory_space<vmem>>, vector<1x2x128xf32>,
    %242 = vector.extract_strided_slice %211 {offsets = [0, 2, 4, 0], sizes = [2, 1, 1, 128], strides = [1, 1, 1, 1]} : vector<2x8x8x128xf32> to vector<2x1x1x128xf32>
    %243 = vector.shape_cast %242 : vector<2x1x1x128xf32> to vector<2x128xf32>
    %c6 = arith.constant 6 : index
    %c0_167 = arith.constant 0 : index
    %c0_168 = arith.constant 0 : index
    %244 = vector.load %arg30[%c6, %c0_167, %c0_168] : memref<16x2x128xf32, #tpu.memory_space<vmem>>, vector<1x2x128xf32>
    %245 = vector.shape_cast %244 : vector<1x2x128xf32> to vector<2x128xf32>
    %246 = vector.shape_cast %243 : vector<2x128xf32> to vector<1x2x128xf32>
    tpu.vector_store %arg30[%c6, %c0_167, %c0_168], %246 {strides = array<i32>} : memref<16x2x128xf32, #tpu.memory_space<vmem>>, vector<1x2x128xf32>,
    %247 = vector.extract_strided_slice %211 {offsets = [0, 2, 6, 0], sizes = [2, 1, 1, 128], strides = [1, 1, 1, 1]} : vector<2x8x8x128xf32> to vector<2x1x1x128xf32>
    %248 = vector.shape_cast %247 : vector<2x1x1x128xf32> to vector<2x128xf32>
    %c7 = arith.constant 7 : index
    %c0_169 = arith.constant 0 : index
    %c0_170 = arith.constant 0 : index
    %249 = vector.load %arg30[%c7, %c0_169, %c0_170] : memref<16x2x128xf32, #tpu.memory_space<vmem>>, vector<1x2x128xf32>
    %250 = vector.shape_cast %249 : vector<1x2x128xf32> to vector<2x128xf32>
    %251 = vector.shape_cast %248 : vector<2x128xf32> to vector<1x2x128xf32>
    tpu.vector_store %arg30[%c7, %c0_169, %c0_170], %251 {strides = array<i32>} : memref<16x2x128xf32, #tpu.memory_space<vmem>>, vector<1x2x128xf32>,
    %252 = vector.extract_strided_slice %211 {offsets = [0, 4, 0, 0], sizes = [2, 1, 1, 128], strides = [1, 1, 1, 1]} : vector<2x8x8x128xf32> to vector<2x1x1x128xf32>
    %253 = vector.shape_cast %252 : vector<2x1x1x128xf32> to vector<2x128xf32>
    %c8 = arith.constant 8 : index
    %c0_171 = arith.constant 0 : index
    %c0_172 = arith.constant 0 : index
    %254 = vector.load %arg30[%c8, %c0_171, %c0_172] : memref<16x2x128xf32, #tpu.memory_space<vmem>>, vector<1x2x128xf32>
    %255 = vector.shape_cast %254 : vector<1x2x128xf32> to vector<2x128xf32>
    %256 = vector.shape_cast %253 : vector<2x128xf32> to vector<1x2x128xf32>
    tpu.vector_store %arg30[%c8, %c0_171, %c0_172], %256 {strides = array<i32>} : memref<16x2x128xf32, #tpu.memory_space<vmem>>, vector<1x2x128xf32>,
    %257 = vector.extract_strided_slice %211 {offsets = [0, 4, 2, 0], sizes = [2, 1, 1, 128], strides = [1, 1, 1, 1]} : vector<2x8x8x128xf32> to vector<2x1x1x128xf32>
    %258 = vector.shape_cast %257 : vector<2x1x1x128xf32> to vector<2x128xf32>
    %c9 = arith.constant 9 : index
    %c0_173 = arith.constant 0 : index
    %c0_174 = arith.constant 0 : index
    %259 = vector.load %arg30[%c9, %c0_173, %c0_174] : memref<16x2x128xf32, #tpu.memory_space<vmem>>, vector<1x2x128xf32>
    %260 = vector.shape_cast %259 : vector<1x2x128xf32> to vector<2x128xf32>
    %261 = vector.shape_cast %258 : vector<2x128xf32> to vector<1x2x128xf32>
    tpu.vector_store %arg30[%c9, %c0_173, %c0_174], %261 {strides = array<i32>} : memref<16x2x128xf32, #tpu.memory_space<vmem>>, vector<1x2x128xf32>,
    %262 = vector.extract_strided_slice %211 {offsets = [0, 4, 4, 0], sizes = [2, 1, 1, 128], strides = [1, 1, 1, 1]} : vector<2x8x8x128xf32> to vector<2x1x1x128xf32>
    %263 = vector.shape_cast %262 : vector<2x1x1x128xf32> to vector<2x128xf32>
    %c10 = arith.constant 10 : index
    %c0_175 = arith.constant 0 : index
    %c0_176 = arith.constant 0 : index
    %264 = vector.load %arg30[%c10, %c0_175, %c0_176] : memref<16x2x128xf32, #tpu.memory_space<vmem>>, vector<1x2x128xf32>
    %265 = vector.shape_cast %264 : vector<1x2x128xf32> to vector<2x128xf32>
    %266 = vector.shape_cast %263 : vector<2x128xf32> to vector<1x2x128xf32>
    tpu.vector_store %arg30[%c10, %c0_175, %c0_176], %266 {strides = array<i32>} : memref<16x2x128xf32, #tpu.memory_space<vmem>>, vector<1x2x128xf32>,
    %267 = vector.extract_strided_slice %211 {offsets = [0, 4, 6, 0], sizes = [2, 1, 1, 128], strides = [1, 1, 1, 1]} : vector<2x8x8x128xf32> to vector<2x1x1x128xf32>
    %268 = vector.shape_cast %267 : vector<2x1x1x128xf32> to vector<2x128xf32>
    %c11 = arith.constant 11 : index
    %c0_177 = arith.constant 0 : index
    %c0_178 = arith.constant 0 : index
    %269 = vector.load %arg30[%c11, %c0_177, %c0_178] : memref<16x2x128xf32, #tpu.memory_space<vmem>>, vector<1x2x128xf32>
    %270 = vector.shape_cast %269 : vector<1x2x128xf32> to vector<2x128xf32>
    %271 = vector.shape_cast %268 : vector<2x128xf32> to vector<1x2x128xf32>
    tpu.vector_store %arg30[%c11, %c0_177, %c0_178], %271 {strides = array<i32>} : memref<16x2x128xf32, #tpu.memory_space<vmem>>, vector<1x2x128xf32>,
    %272 = vector.extract_strided_slice %211 {offsets = [0, 6, 0, 0], sizes = [2, 1, 1, 128], strides = [1, 1, 1, 1]} : vector<2x8x8x128xf32> to vector<2x1x1x128xf32>
    %273 = vector.shape_cast %272 : vector<2x1x1x128xf32> to vector<2x128xf32>
    %c12 = arith.constant 12 : index
    %c0_179 = arith.constant 0 : index
    %c0_180 = arith.constant 0 : index
    %274 = vector.load %arg30[%c12, %c0_179, %c0_180] : memref<16x2x128xf32, #tpu.memory_space<vmem>>, vector<1x2x128xf32>
    %275 = vector.shape_cast %274 : vector<1x2x128xf32> to vector<2x128xf32>
    %276 = vector.shape_cast %273 : vector<2x128xf32> to vector<1x2x128xf32>
    tpu.vector_store %arg30[%c12, %c0_179, %c0_180], %276 {strides = array<i32>} : memref<16x2x128xf32, #tpu.memory_space<vmem>>, vector<1x2x128xf32>,
    %277 = vector.extract_strided_slice %211 {offsets = [0, 6, 2, 0], sizes = [2, 1, 1, 128], strides = [1, 1, 1, 1]} : vector<2x8x8x128xf32> to vector<2x1x1x128xf32>
    %278 = vector.shape_cast %277 : vector<2x1x1x128xf32> to vector<2x128xf32>
    %c13 = arith.constant 13 : index
    %c0_181 = arith.constant 0 : index
    %c0_182 = arith.constant 0 : index
    %279 = vector.load %arg30[%c13, %c0_181, %c0_182] : memref<16x2x128xf32, #tpu.memory_space<vmem>>, vector<1x2x128xf32>
    %280 = vector.shape_cast %279 : vector<1x2x128xf32> to vector<2x128xf32>
    %281 = vector.shape_cast %278 : vector<2x128xf32> to vector<1x2x128xf32>
    tpu.vector_store %arg30[%c13, %c0_181, %c0_182], %281 {strides = array<i32>} : memref<16x2x128xf32, #tpu.memory_space<vmem>>, vector<1x2x128xf32>,
    %282 = vector.extract_strided_slice %211 {offsets = [0, 6, 4, 0], sizes = [2, 1, 1, 128], strides = [1, 1, 1, 1]} : vector<2x8x8x128xf32> to vector<2x1x1x128xf32>
    %283 = vector.shape_cast %282 : vector<2x1x1x128xf32> to vector<2x128xf32>
    %c14 = arith.constant 14 : index
    %c0_183 = arith.constant 0 : index
    %c0_184 = arith.constant 0 : index
    %284 = vector.load %arg30[%c14, %c0_183, %c0_184] : memref<16x2x128xf32, #tpu.memory_space<vmem>>, vector<1x2x128xf32>
    %285 = vector.shape_cast %284 : vector<1x2x128xf32> to vector<2x128xf32>
    %286 = vector.shape_cast %283 : vector<2x128xf32> to vector<1x2x128xf32>
    tpu.vector_store %arg30[%c14, %c0_183, %c0_184], %286 {strides = array<i32>} : memref<16x2x128xf32, #tpu.memory_space<vmem>>, vector<1x2x128xf32>,
    %287 = vector.extract_strided_slice %211 {offsets = [0, 6, 6, 0], sizes = [2, 1, 1, 128], strides = [1, 1, 1, 1]} : vector<2x8x8x128xf32> to vector<2x1x1x128xf32>
    %288 = vector.shape_cast %287 : vector<2x1x1x128xf32> to vector<2x128xf32>
    %c15 = arith.constant 15 : index
    %c0_185 = arith.constant 0 : index
    %c0_186 = arith.constant 0 : index
    %289 = vector.load %arg30[%c15, %c0_185, %c0_186] : memref<16x2x128xf32, #tpu.memory_space<vmem>>, vector<1x2x128xf32>
    %290 = vector.shape_cast %289 : vector<1x2x128xf32> to vector<2x128xf32>
    %291 = vector.shape_cast %288 : vector<2x128xf32> to vector<1x2x128xf32>
    tpu.vector_store %arg30[%c15, %c0_185, %c0_186], %291 {strides = array<i32>} : memref<16x2x128xf32, #tpu.memory_space<vmem>>, vector<1x2x128xf32>,
    %c0_187 = arith.constant 0 : index
    %c0_188 = arith.constant 0 : index
    %292 = vector.load %arg9[%c0_187, %c0_188] : memref<2x128xf32, #tpu.memory_space<vmem>>, vector<1x128xf32>
    %c1_189 = arith.constant 1 : index
    %c0_190 = arith.constant 0 : index
    %293 = vector.load %arg9[%c1_189, %c0_190] : memref<2x128xf32, #tpu.memory_space<vmem>>, vector<1x128xf32>
    %c0_191 = arith.constant 0 : index
    %c0_192 = arith.constant 0 : index
    %c0_193 = arith.constant 0 : index
    %c0_194 = arith.constant 0 : index
    %294 = vector.load %arg24[%c0_191, %c0_192, %c0_193, %c0_194] : memref<2x16x2x128xf32, #tpu.memory_space<vmem>>, vector<1x16x2x128xf32>
    %295 = vector.shape_cast %294 : vector<1x16x2x128xf32> to vector<16x2x128xf32>
    %c1_195 = arith.constant 1 : index
    %c0_196 = arith.constant 0 : index
    %c0_197 = arith.constant 0 : index
    %c0_198 = arith.constant 0 : index
    %296 = vector.load %arg24[%c1_195, %c0_196, %c0_197, %c0_198] : memref<2x16x2x128xf32, #tpu.memory_space<vmem>>, vector<1x16x2x128xf32>
    %297 = vector.shape_cast %296 : vector<1x16x2x128xf32> to vector<16x2x128xf32>
    %298 = vector.shape_cast %293 : vector<1x128xf32> to vector<1x1x128xf32>
    %299 = vector.broadcast %298 : vector<1x1x128xf32> to vector<16x2x128xf32>
    %300 = arith.mulf %295, %299 : vector<16x2x128xf32>
    %cst_199 = arith.constant 1.000000e+00 : f32
    %301 = vector.broadcast %cst_199 : f32 to vector<16x2x128xf32>
    %302 = arith.subf %301, %297 : vector<16x2x128xf32>
    %303 = arith.mulf %300, %302 : vector<16x2x128xf32>
    %cst_200 = arith.constant 1.000000e+00 : f32
    %304 = vector.broadcast %cst_200 : f32 to vector<1x128xf32>
    %305 = arith.subf %304, %293 : vector<1x128xf32>
    %c0_201 = arith.constant 0 : index
    %c0_202 = arith.constant 0 : index
    %c0_203 = arith.constant 0 : index
    %306 = vector.load %arg30[%c0_201, %c0_202, %c0_203] : memref<16x2x128xf32, #tpu.memory_space<vmem>>, vector<16x2x128xf32>
    %307 = vector.shape_cast %292 : vector<1x128xf32> to vector<1x1x128xf32>
    %308 = vector.broadcast %307 : vector<1x1x128xf32> to vector<16x2x128xf32>
    %309 = arith.addf %306, %308 : vector<16x2x128xf32>
    %310 = vector.shape_cast %305 : vector<1x128xf32> to vector<1x1x128xf32>
    %311 = vector.broadcast %310 : vector<1x1x128xf32> to vector<16x2x128xf32>
    %312 = arith.mulf %311, %309 : vector<16x2x128xf32>
    %313 = arith.addf %303, %312 : vector<16x2x128xf32>
    %cst_204 = arith.constant 5.000000e-01 : f32
    %314 = vector.broadcast %cst_204 : f32 to vector<16x2x128xf32>
    %315 = arith.cmpf ogt, %313, %314 : vector<16x2x128xf32>
    %316 = arith.extui %315 : vector<16x2x128xi1> to vector<16x2x128xi32>
    %317 = arith.sitofp %316 : vector<16x2x128xi32> to vector<16x2x128xf32>
    %c0_205 = arith.constant 0 : index
    %c0_206 = arith.constant 0 : index
    %c0_207 = arith.constant 0 : index
    %c0_208 = arith.constant 0 : index
    %318 = vector.load %arg24[%c0_205, %c0_206, %c0_207, %c0_208] : memref<2x16x2x128xf32, #tpu.memory_space<vmem>>, vector<1x16x2x128xf32>
    %319 = vector.shape_cast %318 : vector<1x16x2x128xf32> to vector<16x2x128xf32>
    %320 = vector.shape_cast %313 : vector<16x2x128xf32> to vector<1x16x2x128xf32>
    tpu.vector_store %arg24[%c0_205, %c0_206, %c0_207, %c0_208], %320 {strides = array<i32>} : memref<2x16x2x128xf32, #tpu.memory_space<vmem>>, vector<1x16x2x128xf32>,
    %c1_209 = arith.constant 1 : index
    %c0_210 = arith.constant 0 : index
    %c0_211 = arith.constant 0 : index
    %c0_212 = arith.constant 0 : index
    %321 = vector.load %arg24[%c1_209, %c0_210, %c0_211, %c0_212] : memref<2x16x2x128xf32, #tpu.memory_space<vmem>>, vector<1x16x2x128xf32>
    %322 = vector.shape_cast %321 : vector<1x16x2x128xf32> to vector<16x2x128xf32>
    %323 = vector.shape_cast %317 : vector<16x2x128xf32> to vector<1x16x2x128xf32>
    tpu.vector_store %arg24[%c1_209, %c0_210, %c0_211, %c0_212], %323 {strides = array<i32>} : memref<2x16x2x128xf32, #tpu.memory_space<vmem>>, vector<1x16x2x128xf32>,
    %c0_213 = arith.constant 0 : index
    %c0_214 = arith.constant 0 : index
    %324 = vector.load %arg11[%c0_213, %c0_214] : memref<2x128xf32, #tpu.memory_space<vmem>>, vector<1x128xf32>
    %c1_215 = arith.constant 1 : index
    %c0_216 = arith.constant 0 : index
    %325 = vector.load %arg11[%c1_215, %c0_216] : memref<2x128xf32, #tpu.memory_space<vmem>>, vector<1x128xf32>
    %c0_217 = arith.constant 0 : index
    %c0_218 = arith.constant 0 : index
    %326 = vector.load %arg10[%c0_217, %c0_218] : memref<128x128xbf16, #tpu.memory_space<vmem>>, vector<128x128xbf16>
    %cst_219 = arith.constant 0.000000e+00 : f32
    %327 = vector.broadcast %cst_219 : f32 to vector<2x32xf32>
    %328 = vector.extract_strided_slice %317 {offsets = [0, 0, 0], sizes = [1, 2, 128], strides = [1, 1, 1]} : vector<16x2x128xf32> to vector<1x2x128xf32>
    %329 = vector.shape_cast %328 : vector<1x2x128xf32> to vector<2x128xf32>
    %330 = arith.truncf %329 : vector<2x128xf32> to vector<2x128xbf16>
    %cst_220 = arith.constant dense<0.000000e+00> : vector<2x128xf32>
    %331 = tpu.matmul %330, %326, %cst_220 {dimension_numbers = #tpu.dot_dimension_numbers<[1], [0], [0], [1], [0, 0, 1, 1], [], []>} : vector<2x128xbf16>, vector<128x128xbf16>, vector<2x128xf32> -> vector<2x128xf32>
    %c0_221 = arith.constant 0 : index
    %c0_222 = arith.constant 0 : index
    %c0_223 = arith.constant 0 : index
    %c0_224 = arith.constant 0 : index
    %332 = vector.load %arg25[%c0_221, %c0_222, %c0_223, %c0_224] : memref<2x4x2x128xf32, #tpu.memory_space<vmem>>, vector<1x1x2x128xf32>
    %333 = vector.shape_cast %332 : vector<1x1x2x128xf32> to vector<2x128xf32>
    %c1_225 = arith.constant 1 : index
    %c0_226 = arith.constant 0 : index
    %c0_227 = arith.constant 0 : index
    %c0_228 = arith.constant 0 : index
    %334 = vector.load %arg25[%c1_225, %c0_226, %c0_227, %c0_228] : memref<2x4x2x128xf32, #tpu.memory_space<vmem>>, vector<1x1x2x128xf32>
    %335 = vector.shape_cast %334 : vector<1x1x2x128xf32> to vector<2x128xf32>
    %336 = vector.broadcast %325 : vector<1x128xf32> to vector<2x128xf32>
    %337 = arith.mulf %333, %336 : vector<2x128xf32>
    %cst_229 = arith.constant 1.000000e+00 : f32
    %338 = vector.broadcast %cst_229 : f32 to vector<2x128xf32>
    %339 = arith.subf %338, %335 : vector<2x128xf32>
    %340 = arith.mulf %337, %339 : vector<2x128xf32>
    %cst_230 = arith.constant 1.000000e+00 : f32
    %341 = vector.broadcast %cst_230 : f32 to vector<1x128xf32>
    %342 = arith.subf %341, %325 : vector<1x128xf32>
    %343 = vector.broadcast %324 : vector<1x128xf32> to vector<2x128xf32>
    %344 = arith.addf %331, %343 : vector<2x128xf32>
    %345 = vector.broadcast %342 : vector<1x128xf32> to vector<2x128xf32>
    %346 = arith.mulf %345, %344 : vector<2x128xf32>
    %347 = arith.addf %340, %346 : vector<2x128xf32>
    %cst_231 = arith.constant 5.000000e-01 : f32
    %348 = vector.broadcast %cst_231 : f32 to vector<2x128xf32>
    %349 = arith.cmpf ogt, %347, %348 : vector<2x128xf32>
    %350 = arith.extui %349 : vector<2x128xi1> to vector<2x128xi32>
    %351 = arith.sitofp %350 : vector<2x128xi32> to vector<2x128xf32>
    %c0_232 = arith.constant 0 : index
    %c0_233 = arith.constant 0 : index
    %c0_234 = arith.constant 0 : index
    %c0_235 = arith.constant 0 : index
    %352 = vector.load %arg25[%c0_232, %c0_233, %c0_234, %c0_235] : memref<2x4x2x128xf32, #tpu.memory_space<vmem>>, vector<1x1x2x128xf32>
    %353 = vector.shape_cast %352 : vector<1x1x2x128xf32> to vector<2x128xf32>
    %354 = vector.shape_cast %347 : vector<2x128xf32> to vector<1x1x2x128xf32>
    tpu.vector_store %arg25[%c0_232, %c0_233, %c0_234, %c0_235], %354 {strides = array<i32>} : memref<2x4x2x128xf32, #tpu.memory_space<vmem>>, vector<1x1x2x128xf32>,
    %c1_236 = arith.constant 1 : index
    %c0_237 = arith.constant 0 : index
    %c0_238 = arith.constant 0 : index
    %c0_239 = arith.constant 0 : index
    %355 = vector.load %arg25[%c1_236, %c0_237, %c0_238, %c0_239] : memref<2x4x2x128xf32, #tpu.memory_space<vmem>>, vector<1x1x2x128xf32>
    %356 = vector.shape_cast %355 : vector<1x1x2x128xf32> to vector<2x128xf32>
    %357 = vector.shape_cast %351 : vector<2x128xf32> to vector<1x1x2x128xf32>
    tpu.vector_store %arg25[%c1_236, %c0_237, %c0_238, %c0_239], %357 {strides = array<i32>} : memref<2x4x2x128xf32, #tpu.memory_space<vmem>>, vector<1x1x2x128xf32>,
    %358 = arith.truncf %351 : vector<2x128xf32> to vector<2x128xbf16>
    %c0_240 = arith.constant 0 : index
    %c0_241 = arith.constant 0 : index
    %359 = vector.load %arg12[%c0_240, %c0_241] : memref<512x32xbf16, #tpu.memory_space<vmem>>, vector<128x32xbf16>
    %cst_242 = arith.constant dense<0.000000e+00> : vector<2x32xf32>
    %360 = tpu.matmul %358, %359, %cst_242 {dimension_numbers = #tpu.dot_dimension_numbers<[1], [0], [0], [1], [0, 0, 1, 1], [], []>} : vector<2x128xbf16>, vector<128x32xbf16>, vector<2x32xf32> -> vector<2x32xf32>
    %361 = arith.addf %327, %360 : vector<2x32xf32>
    %362 = vector.extract_strided_slice %317 {offsets = [2, 0, 0], sizes = [1, 2, 128], strides = [1, 1, 1]} : vector<16x2x128xf32> to vector<1x2x128xf32>
    %363 = vector.shape_cast %362 : vector<1x2x128xf32> to vector<2x128xf32>
    %364 = arith.truncf %363 : vector<2x128xf32> to vector<2x128xbf16>
    %cst_243 = arith.constant dense<0.000000e+00> : vector<2x128xf32>
    %365 = tpu.matmul %364, %326, %cst_243 {dimension_numbers = #tpu.dot_dimension_numbers<[1], [0], [0], [1], [0, 0, 1, 1], [], []>} : vector<2x128xbf16>, vector<128x128xbf16>, vector<2x128xf32> -> vector<2x128xf32>
    %c0_244 = arith.constant 0 : index
    %c1_245 = arith.constant 1 : index
    %c0_246 = arith.constant 0 : index
    %c0_247 = arith.constant 0 : index
    %366 = vector.load %arg25[%c0_244, %c1_245, %c0_246, %c0_247] : memref<2x4x2x128xf32, #tpu.memory_space<vmem>>, vector<1x1x2x128xf32>
    %367 = vector.shape_cast %366 : vector<1x1x2x128xf32> to vector<2x128xf32>
    %c1_248 = arith.constant 1 : index
    %c1_249 = arith.constant 1 : index
    %c0_250 = arith.constant 0 : index
    %c0_251 = arith.constant 0 : index
    %368 = vector.load %arg25[%c1_248, %c1_249, %c0_250, %c0_251] : memref<2x4x2x128xf32, #tpu.memory_space<vmem>>, vector<1x1x2x128xf32>
    %369 = vector.shape_cast %368 : vector<1x1x2x128xf32> to vector<2x128xf32>
    %370 = vector.broadcast %325 : vector<1x128xf32> to vector<2x128xf32>
    %371 = arith.mulf %367, %370 : vector<2x128xf32>
    %cst_252 = arith.constant 1.000000e+00 : f32
    %372 = vector.broadcast %cst_252 : f32 to vector<2x128xf32>
    %373 = arith.subf %372, %369 : vector<2x128xf32>
    %374 = arith.mulf %371, %373 : vector<2x128xf32>
    %cst_253 = arith.constant 1.000000e+00 : f32
    %375 = vector.broadcast %cst_253 : f32 to vector<1x128xf32>
    %376 = arith.subf %375, %325 : vector<1x128xf32>
    %377 = vector.broadcast %324 : vector<1x128xf32> to vector<2x128xf32>
    %378 = arith.addf %365, %377 : vector<2x128xf32>
    %379 = vector.broadcast %376 : vector<1x128xf32> to vector<2x128xf32>
    %380 = arith.mulf %379, %378 : vector<2x128xf32>
    %381 = arith.addf %374, %380 : vector<2x128xf32>
    %cst_254 = arith.constant 5.000000e-01 : f32
    %382 = vector.broadcast %cst_254 : f32 to vector<2x128xf32>
    %383 = arith.cmpf ogt, %381, %382 : vector<2x128xf32>
    %384 = arith.extui %383 : vector<2x128xi1> to vector<2x128xi32>
    %385 = arith.sitofp %384 : vector<2x128xi32> to vector<2x128xf32>
    %c0_255 = arith.constant 0 : index
    %c1_256 = arith.constant 1 : index
    %c0_257 = arith.constant 0 : index
    %c0_258 = arith.constant 0 : index
    %386 = vector.load %arg25[%c0_255, %c1_256, %c0_257, %c0_258] : memref<2x4x2x128xf32, #tpu.memory_space<vmem>>, vector<1x1x2x128xf32>
    %387 = vector.shape_cast %386 : vector<1x1x2x128xf32> to vector<2x128xf32>
    %388 = vector.shape_cast %381 : vector<2x128xf32> to vector<1x1x2x128xf32>
    tpu.vector_store %arg25[%c0_255, %c1_256, %c0_257, %c0_258], %388 {strides = array<i32>} : memref<2x4x2x128xf32, #tpu.memory_space<vmem>>, vector<1x1x2x128xf32>,
    %c1_259 = arith.constant 1 : index
    %c1_260 = arith.constant 1 : index
    %c0_261 = arith.constant 0 : index
    %c0_262 = arith.constant 0 : index
    %389 = vector.load %arg25[%c1_259, %c1_260, %c0_261, %c0_262] : memref<2x4x2x128xf32, #tpu.memory_space<vmem>>, vector<1x1x2x128xf32>
    %390 = vector.shape_cast %389 : vector<1x1x2x128xf32> to vector<2x128xf32>
    %391 = vector.shape_cast %385 : vector<2x128xf32> to vector<1x1x2x128xf32>
    tpu.vector_store %arg25[%c1_259, %c1_260, %c0_261, %c0_262], %391 {strides = array<i32>} : memref<2x4x2x128xf32, #tpu.memory_space<vmem>>, vector<1x1x2x128xf32>,
    %392 = arith.truncf %385 : vector<2x128xf32> to vector<2x128xbf16>
    %c128 = arith.constant 128 : index
    %c0_263 = arith.constant 0 : index
    %393 = vector.load %arg12[%c128, %c0_263] : memref<512x32xbf16, #tpu.memory_space<vmem>>, vector<128x32xbf16>
    %cst_264 = arith.constant dense<0.000000e+00> : vector<2x32xf32>
    %394 = tpu.matmul %392, %393, %cst_264 {dimension_numbers = #tpu.dot_dimension_numbers<[1], [0], [0], [1], [0, 0, 1, 1], [], []>} : vector<2x128xbf16>, vector<128x32xbf16>, vector<2x32xf32> -> vector<2x32xf32>
    %395 = arith.addf %361, %394 : vector<2x32xf32>
    %396 = vector.extract_strided_slice %317 {offsets = [8, 0, 0], sizes = [1, 2, 128], strides = [1, 1, 1]} : vector<16x2x128xf32> to vector<1x2x128xf32>
    %397 = vector.shape_cast %396 : vector<1x2x128xf32> to vector<2x128xf32>
    %398 = arith.truncf %397 : vector<2x128xf32> to vector<2x128xbf16>
    %cst_265 = arith.constant dense<0.000000e+00> : vector<2x128xf32>
    %399 = tpu.matmul %398, %326, %cst_265 {dimension_numbers = #tpu.dot_dimension_numbers<[1], [0], [0], [1], [0, 0, 1, 1], [], []>} : vector<2x128xbf16>, vector<128x128xbf16>, vector<2x128xf32> -> vector<2x128xf32>
    %c0_266 = arith.constant 0 : index
    %c2_267 = arith.constant 2 : index
    %c0_268 = arith.constant 0 : index
    %c0_269 = arith.constant 0 : index
    %400 = vector.load %arg25[%c0_266, %c2_267, %c0_268, %c0_269] : memref<2x4x2x128xf32, #tpu.memory_space<vmem>>, vector<1x1x2x128xf32>
    %401 = vector.shape_cast %400 : vector<1x1x2x128xf32> to vector<2x128xf32>
    %c1_270 = arith.constant 1 : index
    %c2_271 = arith.constant 2 : index
    %c0_272 = arith.constant 0 : index
    %c0_273 = arith.constant 0 : index
    %402 = vector.load %arg25[%c1_270, %c2_271, %c0_272, %c0_273] : memref<2x4x2x128xf32, #tpu.memory_space<vmem>>, vector<1x1x2x128xf32>
    %403 = vector.shape_cast %402 : vector<1x1x2x128xf32> to vector<2x128xf32>
    %404 = vector.broadcast %325 : vector<1x128xf32> to vector<2x128xf32>
    %405 = arith.mulf %401, %404 : vector<2x128xf32>
    %cst_274 = arith.constant 1.000000e+00 : f32
    %406 = vector.broadcast %cst_274 : f32 to vector<2x128xf32>
    %407 = arith.subf %406, %403 : vector<2x128xf32>
    %408 = arith.mulf %405, %407 : vector<2x128xf32>
    %cst_275 = arith.constant 1.000000e+00 : f32
    %409 = vector.broadcast %cst_275 : f32 to vector<1x128xf32>
    %410 = arith.subf %409, %325 : vector<1x128xf32>
    %411 = vector.broadcast %324 : vector<1x128xf32> to vector<2x128xf32>
    %412 = arith.addf %399, %411 : vector<2x128xf32>
    %413 = vector.broadcast %410 : vector<1x128xf32> to vector<2x128xf32>
    %414 = arith.mulf %413, %412 : vector<2x128xf32>
    %415 = arith.addf %408, %414 : vector<2x128xf32>
    %cst_276 = arith.constant 5.000000e-01 : f32
    %416 = vector.broadcast %cst_276 : f32 to vector<2x128xf32>
    %417 = arith.cmpf ogt, %415, %416 : vector<2x128xf32>
    %418 = arith.extui %417 : vector<2x128xi1> to vector<2x128xi32>
    %419 = arith.sitofp %418 : vector<2x128xi32> to vector<2x128xf32>
    %c0_277 = arith.constant 0 : index
    %c2_278 = arith.constant 2 : index
    %c0_279 = arith.constant 0 : index
    %c0_280 = arith.constant 0 : index
    %420 = vector.load %arg25[%c0_277, %c2_278, %c0_279, %c0_280] : memref<2x4x2x128xf32, #tpu.memory_space<vmem>>, vector<1x1x2x128xf32>
    %421 = vector.shape_cast %420 : vector<1x1x2x128xf32> to vector<2x128xf32>
    %422 = vector.shape_cast %415 : vector<2x128xf32> to vector<1x1x2x128xf32>
    tpu.vector_store %arg25[%c0_277, %c2_278, %c0_279, %c0_280], %422 {strides = array<i32>} : memref<2x4x2x128xf32, #tpu.memory_space<vmem>>, vector<1x1x2x128xf32>,
    %c1_281 = arith.constant 1 : index
    %c2_282 = arith.constant 2 : index
    %c0_283 = arith.constant 0 : index
    %c0_284 = arith.constant 0 : index
    %423 = vector.load %arg25[%c1_281, %c2_282, %c0_283, %c0_284] : memref<2x4x2x128xf32, #tpu.memory_space<vmem>>, vector<1x1x2x128xf32>
    %424 = vector.shape_cast %423 : vector<1x1x2x128xf32> to vector<2x128xf32>
    %425 = vector.shape_cast %419 : vector<2x128xf32> to vector<1x1x2x128xf32>
    tpu.vector_store %arg25[%c1_281, %c2_282, %c0_283, %c0_284], %425 {strides = array<i32>} : memref<2x4x2x128xf32, #tpu.memory_space<vmem>>, vector<1x1x2x128xf32>,
    %426 = arith.truncf %419 : vector<2x128xf32> to vector<2x128xbf16>
    %c256 = arith.constant 256 : index
    %c0_285 = arith.constant 0 : index
    %427 = vector.load %arg12[%c256, %c0_285] : memref<512x32xbf16, #tpu.memory_space<vmem>>, vector<128x32xbf16>
    %cst_286 = arith.constant dense<0.000000e+00> : vector<2x32xf32>
    %428 = tpu.matmul %426, %427, %cst_286 {dimension_numbers = #tpu.dot_dimension_numbers<[1], [0], [0], [1], [0, 0, 1, 1], [], []>} : vector<2x128xbf16>, vector<128x32xbf16>, vector<2x32xf32> -> vector<2x32xf32>
    %429 = arith.addf %395, %428 : vector<2x32xf32>
    %430 = vector.extract_strided_slice %317 {offsets = [10, 0, 0], sizes = [1, 2, 128], strides = [1, 1, 1]} : vector<16x2x128xf32> to vector<1x2x128xf32>
    %431 = vector.shape_cast %430 : vector<1x2x128xf32> to vector<2x128xf32>
    %432 = arith.truncf %431 : vector<2x128xf32> to vector<2x128xbf16>
    %cst_287 = arith.constant dense<0.000000e+00> : vector<2x128xf32>
    %433 = tpu.matmul %432, %326, %cst_287 {dimension_numbers = #tpu.dot_dimension_numbers<[1], [0], [0], [1], [0, 0, 1, 1], [], []>} : vector<2x128xbf16>, vector<128x128xbf16>, vector<2x128xf32> -> vector<2x128xf32>
    %c0_288 = arith.constant 0 : index
    %c3_289 = arith.constant 3 : index
    %c0_290 = arith.constant 0 : index
    %c0_291 = arith.constant 0 : index
    %434 = vector.load %arg25[%c0_288, %c3_289, %c0_290, %c0_291] : memref<2x4x2x128xf32, #tpu.memory_space<vmem>>, vector<1x1x2x128xf32>
    %435 = vector.shape_cast %434 : vector<1x1x2x128xf32> to vector<2x128xf32>
    %c1_292 = arith.constant 1 : index
    %c3_293 = arith.constant 3 : index
    %c0_294 = arith.constant 0 : index
    %c0_295 = arith.constant 0 : index
    %436 = vector.load %arg25[%c1_292, %c3_293, %c0_294, %c0_295] : memref<2x4x2x128xf32, #tpu.memory_space<vmem>>, vector<1x1x2x128xf32>
    %437 = vector.shape_cast %436 : vector<1x1x2x128xf32> to vector<2x128xf32>
    %438 = vector.broadcast %325 : vector<1x128xf32> to vector<2x128xf32>
    %439 = arith.mulf %435, %438 : vector<2x128xf32>
    %cst_296 = arith.constant 1.000000e+00 : f32
    %440 = vector.broadcast %cst_296 : f32 to vector<2x128xf32>
    %441 = arith.subf %440, %437 : vector<2x128xf32>
    %442 = arith.mulf %439, %441 : vector<2x128xf32>
    %cst_297 = arith.constant 1.000000e+00 : f32
    %443 = vector.broadcast %cst_297 : f32 to vector<1x128xf32>
    %444 = arith.subf %443, %325 : vector<1x128xf32>
    %445 = vector.broadcast %324 : vector<1x128xf32> to vector<2x128xf32>
    %446 = arith.addf %433, %445 : vector<2x128xf32>
    %447 = vector.broadcast %444 : vector<1x128xf32> to vector<2x128xf32>
    %448 = arith.mulf %447, %446 : vector<2x128xf32>
    %449 = arith.addf %442, %448 : vector<2x128xf32>
    %cst_298 = arith.constant 5.000000e-01 : f32
    %450 = vector.broadcast %cst_298 : f32 to vector<2x128xf32>
    %451 = arith.cmpf ogt, %449, %450 : vector<2x128xf32>
    %452 = arith.extui %451 : vector<2x128xi1> to vector<2x128xi32>
    %453 = arith.sitofp %452 : vector<2x128xi32> to vector<2x128xf32>
    %c0_299 = arith.constant 0 : index
    %c3_300 = arith.constant 3 : index
    %c0_301 = arith.constant 0 : index
    %c0_302 = arith.constant 0 : index
    %454 = vector.load %arg25[%c0_299, %c3_300, %c0_301, %c0_302] : memref<2x4x2x128xf32, #tpu.memory_space<vmem>>, vector<1x1x2x128xf32>
    %455 = vector.shape_cast %454 : vector<1x1x2x128xf32> to vector<2x128xf32>
    %456 = vector.shape_cast %449 : vector<2x128xf32> to vector<1x1x2x128xf32>
    tpu.vector_store %arg25[%c0_299, %c3_300, %c0_301, %c0_302], %456 {strides = array<i32>} : memref<2x4x2x128xf32, #tpu.memory_space<vmem>>, vector<1x1x2x128xf32>,
    %c1_303 = arith.constant 1 : index
    %c3_304 = arith.constant 3 : index
    %c0_305 = arith.constant 0 : index
    %c0_306 = arith.constant 0 : index
    %457 = vector.load %arg25[%c1_303, %c3_304, %c0_305, %c0_306] : memref<2x4x2x128xf32, #tpu.memory_space<vmem>>, vector<1x1x2x128xf32>
    %458 = vector.shape_cast %457 : vector<1x1x2x128xf32> to vector<2x128xf32>
    %459 = vector.shape_cast %453 : vector<2x128xf32> to vector<1x1x2x128xf32>
    tpu.vector_store %arg25[%c1_303, %c3_304, %c0_305, %c0_306], %459 {strides = array<i32>} : memref<2x4x2x128xf32, #tpu.memory_space<vmem>>, vector<1x1x2x128xf32>,
    %460 = arith.truncf %453 : vector<2x128xf32> to vector<2x128xbf16>
    %c384 = arith.constant 384 : index
    %c0_307 = arith.constant 0 : index
    %461 = vector.load %arg12[%c384, %c0_307] : memref<512x32xbf16, #tpu.memory_space<vmem>>, vector<128x32xbf16>
    %cst_308 = arith.constant dense<0.000000e+00> : vector<2x32xf32>
    %462 = tpu.matmul %460, %461, %cst_308 {dimension_numbers = #tpu.dot_dimension_numbers<[1], [0], [0], [1], [0, 0, 1, 1], [], []>} : vector<2x128xbf16>, vector<128x32xbf16>, vector<2x32xf32> -> vector<2x32xf32>
    %463 = arith.addf %429, %462 : vector<2x32xf32>
    %c0_309 = arith.constant 0 : index
    %c0_310 = arith.constant 0 : index
    %464 = vector.load %arg14[%c0_309, %c0_310] : memref<2x32xf32, #tpu.memory_space<vmem>>, vector<1x32xf32>
    %c1_311 = arith.constant 1 : index
    %c0_312 = arith.constant 0 : index
    %465 = vector.load %arg14[%c1_311, %c0_312] : memref<2x32xf32, #tpu.memory_space<vmem>>, vector<1x32xf32>
    %c0_313 = arith.constant 0 : index
    %c0_314 = arith.constant 0 : index
    %c0_315 = arith.constant 0 : index
    %466 = vector.load %arg26[%c0_313, %c0_314, %c0_315] : memref<2x2x32xf32, #tpu.memory_space<vmem>>, vector<1x2x32xf32>
    %467 = vector.shape_cast %466 : vector<1x2x32xf32> to vector<2x32xf32>
    %c1_316 = arith.constant 1 : index
    %c0_317 = arith.constant 0 : index
    %c0_318 = arith.constant 0 : index
    %468 = vector.load %arg26[%c1_316, %c0_317, %c0_318] : memref<2x2x32xf32, #tpu.memory_space<vmem>>, vector<1x2x32xf32>
    %469 = vector.shape_cast %468 : vector<1x2x32xf32> to vector<2x32xf32>
    %470 = arith.truncf %469 : vector<2x32xf32> to vector<2x32xbf16>
    %c0_319 = arith.constant 0 : index
    %c0_320 = arith.constant 0 : index
    %471 = vector.load %arg13[%c0_319, %c0_320] : memref<32x32xbf16, #tpu.memory_space<vmem>>, vector<32x32xbf16>
    %cst_321 = arith.constant dense<0.000000e+00> : vector<2x32xf32>
    %472 = tpu.matmul %470, %471, %cst_321 {dimension_numbers = #tpu.dot_dimension_numbers<[1], [0], [0], [1], [0, 0, 1, 1], [], []>} : vector<2x32xbf16>, vector<32x32xbf16>, vector<2x32xf32> -> vector<2x32xf32>
    %473 = arith.addf %463, %472 : vector<2x32xf32>
    %474 = vector.broadcast %464 : vector<1x32xf32> to vector<2x32xf32>
    %475 = arith.addf %473, %474 : vector<2x32xf32>
    %476 = vector.broadcast %465 : vector<1x32xf32> to vector<2x32xf32>
    %477 = arith.mulf %467, %476 : vector<2x32xf32>
    %cst_322 = arith.constant 1.000000e+00 : f32
    %478 = vector.broadcast %cst_322 : f32 to vector<2x32xf32>
    %479 = arith.subf %478, %469 : vector<2x32xf32>
    %480 = arith.mulf %477, %479 : vector<2x32xf32>
    %cst_323 = arith.constant 1.000000e+00 : f32
    %481 = vector.broadcast %cst_323 : f32 to vector<1x32xf32>
    %482 = arith.subf %481, %465 : vector<1x32xf32>
    %483 = vector.broadcast %482 : vector<1x32xf32> to vector<2x32xf32>
    %484 = arith.mulf %483, %475 : vector<2x32xf32>
    %485 = arith.addf %480, %484 : vector<2x32xf32>
    %cst_324 = arith.constant 5.000000e-01 : f32
    %486 = vector.broadcast %cst_324 : f32 to vector<2x32xf32>
    %487 = arith.cmpf ogt, %485, %486 : vector<2x32xf32>
    %488 = arith.extui %487 : vector<2x32xi1> to vector<2x32xi32>
    %489 = arith.sitofp %488 : vector<2x32xi32> to vector<2x32xf32>
    %c0_325 = arith.constant 0 : index
    %c0_326 = arith.constant 0 : index
    %c0_327 = arith.constant 0 : index
    %490 = vector.load %arg26[%c0_325, %c0_326, %c0_327] : memref<2x2x32xf32, #tpu.memory_space<vmem>>, vector<1x2x32xf32>
    %491 = vector.shape_cast %490 : vector<1x2x32xf32> to vector<2x32xf32>
    %492 = vector.shape_cast %485 : vector<2x32xf32> to vector<1x2x32xf32>
    tpu.vector_store %arg26[%c0_325, %c0_326, %c0_327], %492 {strides = array<i32>} : memref<2x2x32xf32, #tpu.memory_space<vmem>>, vector<1x2x32xf32>,
    %c1_328 = arith.constant 1 : index
    %c0_329 = arith.constant 0 : index
    %c0_330 = arith.constant 0 : index
    %493 = vector.load %arg26[%c1_328, %c0_329, %c0_330] : memref<2x2x32xf32, #tpu.memory_space<vmem>>, vector<1x2x32xf32>
    %494 = vector.shape_cast %493 : vector<1x2x32xf32> to vector<2x32xf32>
    %495 = vector.shape_cast %489 : vector<2x32xf32> to vector<1x2x32xf32>
    tpu.vector_store %arg26[%c1_328, %c0_329, %c0_330], %495 {strides = array<i32>} : memref<2x2x32xf32, #tpu.memory_space<vmem>>, vector<1x2x32xf32>,
    %c0_331 = arith.constant 0 : index
    %c0_332 = arith.constant 0 : index
    %496 = vector.load %arg16[%c0_331, %c0_332] : memref<2x10xf32, #tpu.memory_space<vmem>>, vector<1x10xf32>
    %c1_333 = arith.constant 1 : index
    %c0_334 = arith.constant 0 : index
    %497 = vector.load %arg16[%c1_333, %c0_334] : memref<2x10xf32, #tpu.memory_space<vmem>>, vector<1x10xf32>
    %c0_335 = arith.constant 0 : index
    %c0_336 = arith.constant 0 : index
    %498 = vector.load %arg15[%c0_335, %c0_336] : memref<32x10xf32, #tpu.memory_space<vmem>>, vector<32x10xf32>
    %cst_337 = arith.constant dense<0.000000e+00> : vector<2x10xf32>
    %499 = tpu.matmul %489, %498, %cst_337 {dimension_numbers = #tpu.dot_dimension_numbers<[1], [0], [0], [1], [0, 0, 1, 1], [], []>} : vector<2x32xf32>, vector<32x10xf32>, vector<2x10xf32> -> vector<2x10xf32>
    %500 = vector.broadcast %496 : vector<1x10xf32> to vector<2x10xf32>
    %501 = arith.addf %499, %500 : vector<2x10xf32>
    %c0_338 = arith.constant 0 : index
    %c0_339 = arith.constant 0 : index
    %502 = vector.load %arg27[%c0_338, %c0_339] : memref<2x10xf32, #tpu.memory_space<vmem>>, vector<2x10xf32>
    %503 = arith.subf %501, %502 : vector<2x10xf32>
    %504 = vector.broadcast %497 : vector<1x10xf32> to vector<2x10xf32>
    %505 = arith.mulf %503, %504 : vector<2x10xf32>
    %506 = arith.addf %502, %505 : vector<2x10xf32>
    %c0_340 = arith.constant 0 : index
    %c0_341 = arith.constant 0 : index
    %507 = vector.load %arg27[%c0_340, %c0_341] : memref<2x10xf32, #tpu.memory_space<vmem>>, vector<2x10xf32>
    tpu.vector_store %arg27[%c0_340, %c0_341], %506 {strides = array<i32>} : memref<2x10xf32, #tpu.memory_space<vmem>>, vector<2x10xf32>,
    %cst_342 = arith.constant dense<0xFF800000> : vector<2xf32>
    %508 = vector.multi_reduction <maximumf>, %506, %cst_342 [1] : vector<2x10xf32> to vector<2xf32>
    %509 = vector.shape_cast %508 : vector<2xf32> to vector<2x1xf32>
    %510 = vector.broadcast %509 : vector<2x1xf32> to vector<2x10xf32>
    %511 = arith.subf %506, %510 : vector<2x10xf32>
    %512 = math.exp %511 : vector<2x10xf32>
    %cst_343 = arith.constant dense<0.000000e+00> : vector<2xf32>
    %513 = vector.multi_reduction <add>, %512, %cst_343 [1] : vector<2x10xf32> to vector<2xf32>
    %514 = vector.shape_cast %513 : vector<2xf32> to vector<2x1xf32>
    %515 = math.log %514 : vector<2x1xf32>
    %516 = vector.broadcast %515 : vector<2x1xf32> to vector<2x10xf32>
    %517 = arith.subf %511, %516 : vector<2x10xf32>
    %cst_344 = arith.constant 0.000000e+00 : f32
    %518 = vector.broadcast %cst_344 : f32 to vector<1x2x128xf32>
    %c0_345 = arith.constant 0 : index
    %c0_346 = arith.constant 0 : index
    %c0_347 = arith.constant 0 : index
    %519 = vector.load %arg22[%c0_345, %c0_346, %c0_347] : memref<1x2x128xf32, #tpu.memory_space<vmem>>, vector<1x2x128xf32>
    tpu.vector_store %arg22[%c0_345, %c0_346, %c0_347], %518 {strides = array<i32>} : memref<1x2x128xf32, #tpu.memory_space<vmem>>, vector<1x2x128xf32>,
    %c0_348 = arith.constant 0 : index
    %c0_349 = arith.constant 0 : index
    %c0_350 = arith.constant 0 : index
    %520 = vector.load %arg22[%c0_348, %c0_349, %c0_350] : memref<1x2x128xf32, #tpu.memory_space<vmem>>, vector<1x2x10xf32>
    %521 = vector.shape_cast %520 : vector<1x2x10xf32> to vector<2x10xf32>
    %522 = vector.shape_cast %517 : vector<2x10xf32> to vector<1x2x10xf32>
    tpu.vector_store %arg22[%c0_348, %c0_349, %c0_350], %522 {strides = array<i32>} : memref<1x2x128xf32, #tpu.memory_space<vmem>>, vector<1x2x10xf32>,
    return
  }
  func.func @transform_0(%arg0: i32) -> (i32, i32, i32) {
    %c0_i32 = arith.constant 0 : i32
    %c0_i32_0 = arith.constant 0 : i32
    %c0_i32_1 = arith.constant 0 : i32
    return %arg0, %c0_i32, %c0_i32_0 : i32, i32, i32
  }
  func.func @transform_1(%arg0: i32) -> (i32, i32) {
    %c0_i32 = arith.constant 0 : i32
    %c0_i32_0 = arith.constant 0 : i32
    %c0_i32_1 = arith.constant 0 : i32
    return %c0_i32, %c0_i32_0 : i32, i32
  }
  func.func @transform_2(%arg0: i32) -> (i32, i32) {
    %c0_i32 = arith.constant 0 : i32
    %c0_i32_0 = arith.constant 0 : i32
    %c0_i32_1 = arith.constant 0 : i32
    return %c0_i32, %c0_i32_0 : i32, i32
  }
  func.func @transform_3(%arg0: i32) -> (i32, i32) {
    %c0_i32 = arith.constant 0 : i32
    %c0_i32_0 = arith.constant 0 : i32
    %c0_i32_1 = arith.constant 0 : i32
    return %c0_i32, %c0_i32_0 : i32, i32
  }
  func.func @transform_4(%arg0: i32) -> (i32, i32) {
    %c0_i32 = arith.constant 0 : i32
    %c0_i32_0 = arith.constant 0 : i32
    %c0_i32_1 = arith.constant 0 : i32
    return %c0_i32, %c0_i32_0 : i32, i32
  }
  func.func @transform_5(%arg0: i32) -> (i32, i32) {
    %c0_i32 = arith.constant 0 : i32
    %c0_i32_0 = arith.constant 0 : i32
    %c0_i32_1 = arith.constant 0 : i32
    return %c0_i32, %c0_i32_0 : i32, i32
  }
  func.func @transform_6(%arg0: i32) -> (i32, i32) {
    %c0_i32 = arith.constant 0 : i32
    %c0_i32_0 = arith.constant 0 : i32
    %c0_i32_1 = arith.constant 0 : i32
    return %c0_i32, %c0_i32_0 : i32, i32
  }
  func.func @transform_7(%arg0: i32) -> (i32, i32) {
    %c0_i32 = arith.constant 0 : i32
    %c0_i32_0 = arith.constant 0 : i32
    %c0_i32_1 = arith.constant 0 : i32
    return %c0_i32, %c0_i32_0 : i32, i32
  }
  func.func @transform_8(%arg0: i32) -> (i32, i32) {
    %c0_i32 = arith.constant 0 : i32
    %c0_i32_0 = arith.constant 0 : i32
    %c0_i32_1 = arith.constant 0 : i32
    return %c0_i32, %c0_i32_0 : i32, i32
  }
  func.func @transform_9(%arg0: i32) -> (i32, i32) {
    %c0_i32 = arith.constant 0 : i32
    %c0_i32_0 = arith.constant 0 : i32
    %c0_i32_1 = arith.constant 0 : i32
    return %c0_i32, %c0_i32_0 : i32, i32
  }
  func.func @transform_10(%arg0: i32) -> (i32, i32) {
    %c0_i32 = arith.constant 0 : i32
    %c0_i32_0 = arith.constant 0 : i32
    %c0_i32_1 = arith.constant 0 : i32
    return %c0_i32, %c0_i32_0 : i32, i32
  }
  func.func @transform_11(%arg0: i32) -> (i32, i32) {
    %c0_i32 = arith.constant 0 : i32
    %c0_i32_0 = arith.constant 0 : i32
    %c0_i32_1 = arith.constant 0 : i32
    return %c0_i32, %c0_i32_0 : i32, i32
  }
  func.func @transform_12(%arg0: i32) -> (i32, i32) {
    %c0_i32 = arith.constant 0 : i32
    %c0_i32_0 = arith.constant 0 : i32
    %c0_i32_1 = arith.constant 0 : i32
    return %c0_i32, %c0_i32_0 : i32, i32
  }
  func.func @transform_13(%arg0: i32) -> (i32, i32) {
    %c0_i32 = arith.constant 0 : i32
    %c0_i32_0 = arith.constant 0 : i32
    %c0_i32_1 = arith.constant 0 : i32
    return %c0_i32, %c0_i32_0 : i32, i32
  }
  func.func @transform_14(%arg0: i32) -> (i32, i32) {
    %c0_i32 = arith.constant 0 : i32
    %c0_i32_0 = arith.constant 0 : i32
    %c0_i32_1 = arith.constant 0 : i32
    return %c0_i32, %c0_i32_0 : i32, i32
  }
  func.func @transform_15(%arg0: i32) -> (i32, i32) {
    %c0_i32 = arith.constant 0 : i32
    %c0_i32_0 = arith.constant 0 : i32
    %c0_i32_1 = arith.constant 0 : i32
    return %c0_i32, %c0_i32_0 : i32, i32
  }
  func.func @transform_16(%arg0: i32) -> (i32, i32, i32) {
    %c0_i32 = arith.constant 0 : i32
    %c0_i32_0 = arith.constant 0 : i32
    %c0_i32_1 = arith.constant 0 : i32
    %c0_i32_2 = arith.constant 0 : i32
    return %c0_i32, %c0_i32_0, %c0_i32_1 : i32, i32, i32
  }
  func.func @transform_17(%arg0: i32) -> (i32, i32, i32, i32) {
    %c0_i32 = arith.constant 0 : i32
    %c0_i32_0 = arith.constant 0 : i32
    %c0_i32_1 = arith.constant 0 : i32
    %c0_i32_2 = arith.constant 0 : i32
    %c0_i32_3 = arith.constant 0 : i32
    return %c0_i32, %c0_i32_0, %c0_i32_1, %c0_i32_2 : i32, i32, i32, i32
  }
  func.func @transform_18(%arg0: i32) -> (i32, i32, i32, i32) {
    %c0_i32 = arith.constant 0 : i32
    %c0_i32_0 = arith.constant 0 : i32
    %c0_i32_1 = arith.constant 0 : i32
    %c0_i32_2 = arith.constant 0 : i32
    %c0_i32_3 = arith.constant 0 : i32
    return %c0_i32, %c0_i32_0, %c0_i32_1, %c0_i32_2 : i32, i32, i32, i32
  }
  func.func @transform_19(%arg0: i32) -> (i32, i32, i32) {
    %c0_i32 = arith.constant 0 : i32
    %c0_i32_0 = arith.constant 0 : i32
    %c0_i32_1 = arith.constant 0 : i32
    %c0_i32_2 = arith.constant 0 : i32
    return %c0_i32, %c0_i32_0, %c0_i32_1 : i32, i32, i32
  }
  func.func @transform_20(%arg0: i32) -> (i32, i32) {
    %c0_i32 = arith.constant 0 : i32
    %c0_i32_0 = arith.constant 0 : i32
    %c0_i32_1 = arith.constant 0 : i32
    return %c0_i32, %c0_i32_0 : i32, i32
  }
  func.func @transform_21(%arg0: i32) -> (i32, i32, i32) {
    %c0_i32 = arith.constant 0 : i32
    %c0_i32_0 = arith.constant 0 : i32
    %c0_i32_1 = arith.constant 0 : i32
    return %arg0, %c0_i32, %c0_i32_0 : i32, i32, i32
  }
  func.func @transform_22(%arg0: i32) -> (i32, i32, i32) {
    %c0_i32 = arith.constant 0 : i32
    %c0_i32_0 = arith.constant 0 : i32
    %c0_i32_1 = arith.constant 0 : i32
    %c0_i32_2 = arith.constant 0 : i32
    return %c0_i32, %c0_i32_0, %c0_i32_1 : i32, i32, i32
  }
  func.func @transform_23(%arg0: i32) -> (i32, i32, i32, i32) {
    %c0_i32 = arith.constant 0 : i32
    %c0_i32_0 = arith.constant 0 : i32
    %c0_i32_1 = arith.constant 0 : i32
    %c0_i32_2 = arith.constant 0 : i32
    %c0_i32_3 = arith.constant 0 : i32
    return %c0_i32, %c0_i32_0, %c0_i32_1, %c0_i32_2 : i32, i32, i32, i32
  }
  func.func @transform_24(%arg0: i32) -> (i32, i32, i32, i32) {
    %c0_i32 = arith.constant 0 : i32
    %c0_i32_0 = arith.constant 0 : i32
    %c0_i32_1 = arith.constant 0 : i32
    %c0_i32_2 = arith.constant 0 : i32
    %c0_i32_3 = arith.constant 0 : i32
    return %c0_i32, %c0_i32_0, %c0_i32_1, %c0_i32_2 : i32, i32, i32, i32
  }
  func.func @transform_25(%arg0: i32) -> (i32, i32, i32) {
    %c0_i32 = arith.constant 0 : i32
    %c0_i32_0 = arith.constant 0 : i32
    %c0_i32_1 = arith.constant 0 : i32
    %c0_i32_2 = arith.constant 0 : i32
    return %c0_i32, %c0_i32_0, %c0_i32_1 : i32, i32, i32
  }
  func.func @transform_26(%arg0: i32) -> (i32, i32) {
    %c0_i32 = arith.constant 0 : i32
    %c0_i32_0 = arith.constant 0 : i32
    %c0_i32_1 = arith.constant 0 : i32
    return %c0_i32, %c0_i32_0 : i32, i32
  }
}

</mosaic_0001>

<bundles_post_ra>
// kernel: forward.1
= control target key start
LH: loop header
LB: loop body
LE: loop exit
PB: predicated region body
PF: predicated region fallthrough
CT: control target
= control target key end

     0   :  { %s8693_s0 = inlined_call_operand.vmem [shape: bf16[4,128,18], index: 0, kind: input, shape index: {}]   ;;  %s8694_s1 = inlined_call_operand.vmem [shape: bf16[18,64], index: 1, kind: input, shape index: {}]   ;;  %s8695_s2 = inlined_call_operand.vmem [shape: f32[2,64], index: 2, kind: input, shape index: {}]   ;;  %s8696_s3 = inlined_call_operand.vmem [shape: f32[9,64], index: 3, kind: input, shape index: {}]   ;;  %s8697_s4 = inlined_call_operand.vmem [shape: f32[2,64], index: 4, kind: input, shape index: {}]   ;;  %s8698_s5 = inlined_call_operand.vmem [shape: bf16[64,64], index: 5, kind: input, shape index: {}]   ;;  %s8699_s6 = inlined_call_operand.vmem [shape: f32[2,64], index: 6, kind: input, shape index: {}]   ;;  %s8700_s7 = inlined_call_operand.vmem [shape: f32[9,128], index: 7, kind: input, shape index: {}]   ;;  %s8701_s8 = inlined_call_operand.vmem [shape: f32[2,128], index: 8, kind: input, shape index: {}]   ;;  %s8702_s9 = inlined_call_operand.vmem [shape: bf16[128,128], index: 9, kind: input, shape index: {}]   ;;  %s8703_s10 = inlined_call_operand.vmem [shape: f32[2,128], index: 10, kind: input, shape index: {}]   ;;  %s8704_s11 = inlined_call_operand.vmem [shape: bf16[512,32], index: 11, kind: input, shape index: {}]   ;;  %s8705_s12 = inlined_call_operand.vmem [shape: bf16[32,32], index: 12, kind: input, shape index: {}]   ;;  %s8706_s13 = inlined_call_operand.vmem [shape: f32[2,32], index: 13, kind: input, shape index: {}]   ;;  %s8707_s14 = inlined_call_operand.vmem [shape: f32[32,10], index: 14, kind: input, shape index: {}]   ;;  %s8708_s15 = inlined_call_operand.vmem [shape: f32[2,10], index: 15, kind: input, shape index: {}]   ;;  %s8709_s16 = inlined_call_operand.vmem [shape: f32[6,128,64], index: 16, kind: input, shape index: {}]   ;;  %s8710_s17 = inlined_call_operand.vmem [shape: f32[2,16,2,128], index: 17, kind: input, shape index: {}]   ;;  %s8711_s18 = inlined_call_operand.vmem [shape: f32[2,4,2,128], index: 18, kind: input, shape index: {}]   ;;  %s8712_s19 = inlined_call_operand.vmem [shape: f32[2,2,32], index: 19, kind: input, shape index: {}]   ;;  %s8713_s20 = inlined_call_operand.vmem [shape: f32[2,10], index: 20, kind: input, shape index: {}]   ;;  %s8714_s21 = inlined_call_operand.hbm [shape: f32[4,2,128], index: 21, kind: output, shape index: {0}]   ;;  %s8715_s22 = inlined_call_operand.vmem [shape: f32[6,128,64], index: 22, kind: output, shape index: {1}]   ;;  %s8716_s23 = inlined_call_operand.vmem [shape: f32[2,16,2,128], index: 23, kind: output, shape index: {2}]   ;;  %s8717_s24 = inlined_call_operand.vmem [shape: f32[2,4,2,128], index: 24, kind: output, shape index: {3}]   ;;  %s8718_s25 = inlined_call_operand.vmem [shape: f32[2,2,32], index: 25, kind: output, shape index: {4}]   ;;  %s8719_s26 = inlined_call_operand.vmem [shape: f32[2,10], index: 26, kind: output, shape index: {5}]  }
   0x1   :  { %8764 = sst [smem:[#allocation20_spill]] %s8693_s0 }
   0x2   :  { %8765 = sst [smem:[#allocation21_spill]] %s8694_s1 }
   0x3   :  { %8766 = sst [smem:[#allocation22_spill]] %s8695_s2 }
   0x4   :  { %8767 = sst [smem:[#allocation23_spill]] %s8696_s3 }
   0x5   :  { %8768 = sst [smem:[#allocation24_spill]] %s8697_s4 }
   0x6   :  { %8769 = sst [smem:[#allocation25_spill]] %s8698_s5 }
   0x7   :  { %8770 = sst [smem:[#allocation26_spill]] %s8699_s6 }
   0x8   :  { %8771 = sst [smem:[#allocation27_spill]] %s8700_s7 }
   0x9   :  { %8772 = sst [smem:[#allocation28_spill]] %s8701_s8 }
   0xa   :  { %8773 = sst [smem:[#allocation29_spill]] %s8702_s9 }
   0xb   :  { %8774 = sst [smem:[#allocation30_spill]] %s8703_s10 }
   0xc   :  { %8775 = sst [smem:[#allocation31_spill]] %s8709_s16 }
   0xd   :  { %8776 = sst [smem:[#allocation32_spill]] %s8710_s17 }
   0xe   :  { %8777 = sst [smem:[#allocation33_spill]] %s8711_s18 }
   0xf   :  { %8778 = sst [smem:[#allocation34_spill]] %s8714_s21 }
  0x10   :  { %32 = vsyncpa [#allocation6], 0 }
  0x11   :  { %34 = vsyncpa [#allocation6 + $0x1], 0  ;;  %s5370_s27 = smov 0   ;;  %s5372_s3 = smov 0  }
  0x12   :  { %s5374_s7 = smov 0   ;;  %s5376_s28 = smov 0  }
  0x13 LB: > { %8779 = sst [smem:[#allocation8_spill]] %s5215_s27  ;;  %s5391_s8 = sadd.s32 4294967295, %s5227_s28   ;;  %s5227_s28 = sphi %s5376_s28, %s8844_s28   ;;  %s5223_s7 = sphi %s5374_s7, %s8846_s7   ;;  %s5219_s3 = sphi %s5372_s3, %s8848_s3   ;;  %s5215_s27 = sphi %s5370_s27, %s8847_s27  }
  0x14   : > { %8780 = sst [smem:[#allocation9_spill]] %s5223_s7  ;;  %s4323_s4 = sadd.s32 4294967294, %s5227_s28  }
  0x15   : > { %8781 = sst [smem:[#allocation10_spill]] %s5227_s28  ;;  %s5395_s29 = sadd.s32 1, %s5227_s28  }
  0x16   : > { %8782 = sst [smem:[#allocation11_spill]] %s5395_s29  ;;  %s493_s0 = sadd.s32 1, %s5223_s7 }
  0x17   : > { %s490_s9 = ssub.s32 %s5227_s28, %s5395_s29  ;;  %p503_p0 = scmp.ne.s32.totalorder %s5223_s7, %s5219_s3 }
  0x18   : > { %p491_p1 = scmp.eq.s32.totalorder %s490_s9, 0  ;;  %p504_p2 = scmp.eq.s32.totalorder %s5391_s8, 3 }
  0x19   : > { %p509_p3 = scmp.ne.s32.totalorder %s5219_s3, %s5215_s27  ;;  %p510_p4 = scmp.eq.s32.totalorder %s4323_s4, 3 }
  0x1a   : > { %s5406_s30 = scalar_select %p491_p1, %s5223_s7, %s493_s0  }
  0x1b   : > { %p5408_p5 = por %p504_p2, %p503_p0  ;;  %p5412_p6 = por %p510_p4, %p509_p3 }
  0x1c   : > { %8783 = sst [smem:[#allocation12_spill]] %s5406_s30  ;;  %p4326_p7 = scmp.ge.s32.totalorder %s5227_s28, 1 }
  0x1d   : > { %s8785_s5 = scalar_select %p5412_p6, 1, 0 }
  0x1e   : > { %p701_p8 = scmp.lt.s32.totalorder %s5227_s28, 5 }
  0x1f   : > { %8786 = sst [smem:[#allocation13_spill]] %s8785_s5 }
  0x20   : > { %p702_p9 = pnand %p4326_p7, %p701_p8 }
  0x22   : > { %705 = sbr.rel (%p702_p9) target bundleno = 2035 (0x7f3), region = 104 }
  0x27   : > { %s8737_s10 = sand.u32 1, %s5219_s3   ;;  %p771_p10 = scmp.lt.s32.totalorder %s5391_s8, 3 }
  0x28   : > { %s4327_s6 = sshll.u32 %s8737_s10, 1  ;;  %s8787_s30 = sld [smem:[#allocation20_spill]] }
  0x29   : > { %s772_s1 = scalar_select %p771_p10, %s5391_s8, 3 }
  0x2a   : > { %s5428_s29 = scalar_lea.vmem [#allocation5], %s4327_s6  ;;  %p4330_p11 = scmp.ne.s32.totalorder %s5391_s8, 0 }
  0x2b   : > { %s4712_s4 = sshll.u32 %s772_s1, 6  ;;  %s8788_s16 = sld [smem:[#allocation31_spill]] (!%p4330_p11) }
  0x2c   : > { %780 = sbr.rel (%p4330_p11) target bundleno = 143 (0x8f), region = 108  ;;  %s8789_s17 = sld [smem:[#allocation32_spill]] (!%p4330_p11) }
  0x2d   : > { %s8790_s18 = sld [smem:[#allocation33_spill]] (!%p4330_p11) }
  0x2e   : > { %s5426_s7 = scalar_lea.vmem %s8787_s30, %s4712_s4 }
  0x31   : > { %v781_v0 = vld [vmem:[%s8788_s16] sm:$0xff]  ;;  %vm877_vm0 = vcmask 523264   ;;  %v782_v1 = vld [vmem:[%s8788_s16 + $0x8] sm:$0xff]  ;;  %v783_v2 = vld [vmem:[%s8788_s16 + $0x10] sm:$0xff]  ;;  %vm1063_vm1 = vcmask 517120   ;;  %v5229_v9 = vmov 0.0  }
  0x32   : > { %878 = vst.msk [vmem:[%s8715_s22] sm:$0xff] %vm877_vm0, %v781_v0  ;;  %879 = vst.msk [vmem:[%s8715_s22 + $0x8] sm:$0xff] %vm877_vm0, %v782_v1  ;;  %v784_v3 = vld [vmem:[%s8788_s16 + $0x18] sm:$0xff]  ;;  %v785_v4 = vld [vmem:[%s8788_s16 + $0x20] sm:$0xff]  ;;  %vm1056_vm2 = vcmask 254976   ;;  %vm1060_vm3 = vcmask 74752  }
  0x33   : > { %880 = vst.msk [vmem:[%s8715_s22 + $0x10] sm:$0xff] %vm877_vm0, %v783_v2  ;;  %v786_v5 = vld [vmem:[%s8788_s16 + $0x28] sm:$0xff]  ;;  %881 = vst.msk [vmem:[%s8715_s22 + $0x18] sm:$0xff] %vm877_vm0, %v784_v3  ;;  %v5476_v6 = vld [vmem:[%s8788_s16 + $0x30] sm:$0xff] }
  0x34   : > { %882 = vst.msk [vmem:[%s8715_s22 + $0x20] sm:$0xff] %vm877_vm0, %v785_v4  ;;  %883 = vst.msk [vmem:[%s8715_s22 + $0x28] sm:$0xff] %vm877_vm0, %v786_v5  ;;  %v5481_v7 = vld [vmem:[%s8788_s16 + $0x38] sm:$0xff]  ;;  %v5486_v8 = vld [vmem:[%s8788_s16 + $0x40] sm:$0xff] }
  0x35   : > { %1062 = vst.msk [vmem:[#allocation2] sm:$0xff] %vm877_vm0, %v5229_v9  ;;  %1065 = vst.msk [vmem:[#allocation2 + $0x10] sm:$0xff] %vm877_vm0, %v5229_v9  ;;  %v790_v10 = vld [vmem:[%s8788_s16 + $0x48] sm:$0xff]  ;;  %v791_v11 = vld [vmem:[%s8788_s16 + $0x50] sm:$0xff] }
  0x36   : > { %1067 = vst.msk [vmem:[#allocation2 + $0x20] sm:$0xff] %vm877_vm0, %v5229_v9  ;;  %1069 = vst.msk [vmem:[#allocation2 + $0x30] sm:$0xff] %vm877_vm0, %v5229_v9  ;;  %v792_v12 = vld [vmem:[%s8788_s16 + $0x58] sm:$0xff]  ;;  %v793_v13 = vld [vmem:[%s8788_s16 + $0x60] sm:$0xff] }
  0x37   : > { %1071 = vst.msk [vmem:[#allocation2 + $0x40] sm:$0xff] %vm877_vm0, %v5229_v9  ;;  %1073 = vst.msk [vmem:[#allocation2 + $0x50] sm:$0xff] %vm877_vm0, %v5229_v9  ;;  %v794_v14 = vld [vmem:[%s8788_s16 + $0x68] sm:$0xff]  ;;  %v795_v15 = vld [vmem:[%s8788_s16 + $0x70] sm:$0xff] }
  0x38   : > { %1075 = vst.msk [vmem:[#allocation2 + $0x60] sm:$0xff] %vm877_vm0, %v5229_v9  ;;  %1077 = vst.msk [vmem:[#allocation2 + $0x70] sm:$0xff] %vm877_vm0, %v5229_v9  ;;  %v796_v16 = vld [vmem:[%s8788_s16 + $0x78] sm:$0xff]  ;;  %v797_v17 = vld [vmem:[%s8788_s16 + $0x80] sm:$0xff] }
  0x39   : > { %1079 = vst.msk [vmem:[#allocation2 + $0x80] sm:$0xff] %vm877_vm0, %v5229_v9  ;;  %1081 = vst.msk [vmem:[#allocation2 + $0x90] sm:$0xff] %vm877_vm0, %v5229_v9  ;;  %v798_v18 = vld [vmem:[%s8788_s16 + $0x88] sm:$0xff]  ;;  %v799_v19 = vld [vmem:[%s8788_s16 + $0x90] sm:$0xff] }
  0x3a   : > { %1083 = vst.msk [vmem:[#allocation2 + $0xa0] sm:$0xff] %vm877_vm0, %v5229_v9  ;;  %1085 = vst.msk [vmem:[#allocation2 + $0xb0] sm:$0xff] %vm877_vm0, %v5229_v9  ;;  %v800_v20 = vld [vmem:[%s8788_s16 + $0x98] sm:$0xff]  ;;  %v801_v21 = vld [vmem:[%s8788_s16 + $0xa0] sm:$0xff] }
  0x3b   : > { %1087 = vst.msk [vmem:[#allocation2 + $0xc0] sm:$0xff] %vm877_vm0, %v5229_v9  ;;  %1089 = vst.msk [vmem:[#allocation2 + $0xd0] sm:$0xff] %vm877_vm0, %v5229_v9  ;;  %v802_v22 = vld [vmem:[%s8788_s16 + $0xa8] sm:$0xff]  ;;  %v803_v23 = vld [vmem:[%s8788_s16 + $0xb0] sm:$0xff] }
  0x3c   : > { %1091 = vst.msk [vmem:[#allocation2 + $0xe0] sm:$0xff] %vm877_vm0, %v5229_v9  ;;  %1093 = vst.msk [vmem:[#allocation2 + $0xf0] sm:$0xff] %vm877_vm0, %v5229_v9  ;;  %v804_v24 = vld [vmem:[%s8788_s16 + $0xb8] sm:$0xff]  ;;  %v805_v25 = vld [vmem:[%s8788_s16 + $0xc0] sm:$0xff] }
  0x3d   : > { %1095 = vst.msk [vmem:[#allocation2 + $0x100] sm:$0xff] %vm877_vm0, %v5229_v9  ;;  %1097 = vst.msk [vmem:[#allocation2 + $0x110] sm:$0xff] %vm877_vm0, %v5229_v9  ;;  %v806_v26 = vld [vmem:[%s8788_s16 + $0xc8] sm:$0xff]  ;;  %v807_v27 = vld [vmem:[%s8788_s16 + $0xd0] sm:$0xff] }
  0x3e   : > { %1099 = vst.msk [vmem:[#allocation2 + $0x120] sm:$0xff] %vm877_vm0, %v5229_v9  ;;  %1101 = vst.msk [vmem:[#allocation2 + $0x130] sm:$0xff] %vm877_vm0, %v5229_v9  ;;  %v808_v28 = vld [vmem:[%s8788_s16 + $0xd8] sm:$0xff]  ;;  %v809_v29 = vld [vmem:[%s8788_s16 + $0xe0] sm:$0xff] }
  0x3f   : > { %1103 = vst [vmem:[#allocation3] sm:$0xff] %v5229_v9  ;;  %1104 = vst [vmem:[#allocation3 + $0x8] sm:$0x3] %v5229_v9  ;;  %v810_v30 = vld [vmem:[%s8788_s16 + $0xe8] sm:$0xff]  ;;  %v811_v31 = vld [vmem:[%s8788_s16 + $0xf0] sm:$0xff] }
  0x40   : > { %1105 = vst [vmem:[#allocation3 + $0x10] sm:$0xff] %v5229_v9  ;;  %1106 = vst [vmem:[#allocation3 + $0x18] sm:$0x3] %v5229_v9  ;;  %v812_v32 = vld [vmem:[%s8788_s16 + $0xf8] sm:$0xff]  ;;  %v813_v33 = vld [vmem:[%s8788_s16 + $0x100] sm:$0xff] }
  0x41   : > { %1107 = vst [vmem:[#allocation3 + $0x20] sm:$0xff] %v5229_v9  ;;  %1108 = vst [vmem:[#allocation3 + $0x28] sm:$0x3] %v5229_v9  ;;  %v814_v34 = vld [vmem:[%s8788_s16 + $0x108] sm:$0xff]  ;;  %v815_v35 = vld [vmem:[%s8788_s16 + $0x110] sm:$0xff] }
  0x42   : > { %1109 = vst [vmem:[#allocation3 + $0x30] sm:$0xff] %v5229_v9  ;;  %1110 = vst [vmem:[#allocation3 + $0x38] sm:$0x3] %v5229_v9  ;;  %v816_v36 = vld [vmem:[%s8788_s16 + $0x118] sm:$0xff]  ;;  %v817_v37 = vld [vmem:[%s8788_s16 + $0x120] sm:$0xff] }
  0x43   : > { %1111 = vst [vmem:[#allocation3 + $0x40] sm:$0xff] %v5229_v9  ;;  %1112 = vst [vmem:[#allocation3 + $0x48] sm:$0x3] %v5229_v9  ;;  %v818_v38 = vld [vmem:[%s8788_s16 + $0x128] sm:$0xff]  ;;  %v819_v39 = vld [vmem:[%s8788_s16 + $0x130] sm:$0xff] }
  0x44   : > { %1113 = vst [vmem:[#allocation3 + $0x50] sm:$0xff] %v5229_v9  ;;  %1114 = vst [vmem:[#allocation3 + $0x58] sm:$0x3] %v5229_v9  ;;  %v820_v40 = vld [vmem:[%s8788_s16 + $0x138] sm:$0xff]  ;;  %v821_v41 = vld [vmem:[%s8788_s16 + $0x140] sm:$0xff] }
  0x45   : > { %1115 = vst [vmem:[#allocation3 + $0x60] sm:$0xff] %v5229_v9  ;;  %1116 = vst [vmem:[#allocation3 + $0x68] sm:$0x3] %v5229_v9  ;;  %v822_v42 = vld [vmem:[%s8788_s16 + $0x148] sm:$0xff]  ;;  %v823_v43 = vld [vmem:[%s8788_s16 + $0x150] sm:$0xff] }
  0x46   : > { %1117 = vst [vmem:[#allocation3 + $0x70] sm:$0xff] %v5229_v9  ;;  %1118 = vst [vmem:[#allocation3 + $0x78] sm:$0x3] %v5229_v9  ;;  %v824_v44 = vld [vmem:[%s8788_s16 + $0x158] sm:$0xff]  ;;  %v825_v45 = vld [vmem:[%s8788_s16 + $0x160] sm:$0xff] }
  0x47   : > { %1119 = vst [vmem:[#allocation3 + $0x80] sm:$0xff] %v5229_v9  ;;  %1120 = vst [vmem:[#allocation3 + $0x88] sm:$0x3] %v5229_v9  ;;  %v826_v46 = vld [vmem:[%s8788_s16 + $0x168] sm:$0xff]  ;;  %v827_v47 = vld [vmem:[%s8788_s16 + $0x170] sm:$0xff] }
  0x48   : > { %1123 = vst [vmem:[#allocation3 + $0xa0] sm:$0xff] %v5229_v9  ;;  %1124 = vst [vmem:[#allocation3 + $0xa8] sm:$0x3] %v5229_v9  ;;  %v828_v48 = vld [vmem:[%s8788_s16 + $0x178] sm:$0xff]  ;;  %v829_v49 = vld [vmem:[%s8788_s16 + $0x180] sm:$0xff] }
  0x49   : > { %1125 = vst [vmem:[#allocation3 + $0xb0] sm:$0xff] %v5229_v9  ;;  %1126 = vst [vmem:[#allocation3 + $0xb8] sm:$0x3] %v5229_v9  ;;  %v830_v50 = vld [vmem:[%s8788_s16 + $0x188] sm:$0xff]  ;;  %v831_v51 = vld [vmem:[%s8788_s16 + $0x190] sm:$0xff] }
  0x4a   : > { %1127 = vst [vmem:[#allocation3 + $0xc0] sm:$0xff] %v5229_v9  ;;  %1128 = vst [vmem:[#allocation3 + $0xc8] sm:$0x3] %v5229_v9  ;;  %v832_v52 = vld [vmem:[%s8788_s16 + $0x198] sm:$0xff]  ;;  %v833_v53 = vld [vmem:[%s8788_s16 + $0x1a0] sm:$0xff] }
  0x4b   : > { %1129 = vst [vmem:[#allocation3 + $0xd0] sm:$0xff] %v5229_v9  ;;  %1130 = vst [vmem:[#allocation3 + $0xd8] sm:$0x3] %v5229_v9  ;;  %v834_v54 = vld [vmem:[%s8788_s16 + $0x1a8] sm:$0xff]  ;;  %v835_v55 = vld [vmem:[%s8788_s16 + $0x1b0] sm:$0xff] }
  0x4c   : > { %1131 = vst [vmem:[#allocation3 + $0xe0] sm:$0xff] %v5229_v9  ;;  %1132 = vst [vmem:[#allocation3 + $0xe8] sm:$0x3] %v5229_v9  ;;  %v836_v56 = vld [vmem:[%s8788_s16 + $0x1b8] sm:$0xff]  ;;  %v837_v57 = vld [vmem:[%s8788_s16 + $0x1c0] sm:$0xff] }
  0x4d   : > { %1133 = vst [vmem:[#allocation3 + $0xf0] sm:$0xff] %v5229_v9  ;;  %1134 = vst [vmem:[#allocation3 + $0xf8] sm:$0x3] %v5229_v9  ;;  %v838_v58 = vld [vmem:[%s8788_s16 + $0x1c8] sm:$0xff]  ;;  %v839_v59 = vld [vmem:[%s8788_s16 + $0x1d0] sm:$0xff] }
  0x4e   : > { %1135 = vst [vmem:[#allocation3 + $0x100] sm:$0xff] %v5229_v9  ;;  %1136 = vst [vmem:[#allocation3 + $0x108] sm:$0x3] %v5229_v9  ;;  %v840_v60 = vld [vmem:[%s8788_s16 + $0x1d8] sm:$0xff]  ;;  %v841_v61 = vld [vmem:[%s8788_s16 + $0x1e0] sm:$0xff] }
  0x4f   : > { %1137 = vst [vmem:[#allocation3 + $0x110] sm:$0xff] %v5229_v9  ;;  %1138 = vst [vmem:[#allocation3 + $0x118] sm:$0x3] %v5229_v9  ;;  %v842_v62 = vld [vmem:[%s8788_s16 + $0x1e8] sm:$0xff]  ;;  %v843_v63 = vld [vmem:[%s8788_s16 + $0x1f0] sm:$0xff] }
  0x50   : > { %1139 = vst [vmem:[#allocation3 + $0x120] sm:$0xff] %v5229_v9  ;;  %1140 = vst [vmem:[#allocation3 + $0x128] sm:$0x3] %v5229_v9  ;;  %v844_v0 = vld [vmem:[%s8788_s16 + $0x1f8] sm:$0xff]  ;;  %v845_v1 = vld [vmem:[%s8788_s16 + $0x200] sm:$0xff] }
  0x51   : > { %1064 = vst.msk [vmem:[#allocation2 + $0x8] sm:$0x3] %vm1063_vm1, %v5229_v9  ;;  %1066 = vst.msk [vmem:[#allocation2 + $0x18] sm:$0x3] %vm1063_vm1, %v5229_v9  ;;  %v846_v2 = vld [vmem:[%s8788_s16 + $0x208] sm:$0xff]  ;;  %v847_v3 = vld [vmem:[%s8788_s16 + $0x210] sm:$0xff] }
  0x52   : > { %1068 = vst.msk [vmem:[#allocation2 + $0x28] sm:$0x3] %vm1063_vm1, %v5229_v9  ;;  %1070 = vst.msk [vmem:[#allocation2 + $0x38] sm:$0x3] %vm1063_vm1, %v5229_v9  ;;  %v848_v4 = vld [vmem:[%s8788_s16 + $0x218] sm:$0xff]  ;;  %v849_v5 = vld [vmem:[%s8788_s16 + $0x220] sm:$0xff] }
  0x53   : > { %1072 = vst.msk [vmem:[#allocation2 + $0x48] sm:$0x3] %vm1063_vm1, %v5229_v9  ;;  %1074 = vst.msk [vmem:[#allocation2 + $0x58] sm:$0x3] %vm1063_vm1, %v5229_v9 }
  0x54   : > { %1076 = vst.msk [vmem:[#allocation2 + $0x68] sm:$0x3] %vm1063_vm1, %v5229_v9  ;;  %1078 = vst.msk [vmem:[#allocation2 + $0x78] sm:$0x3] %vm1063_vm1, %v5229_v9 }
  0x55   : > { %1080 = vst.msk [vmem:[#allocation2 + $0x88] sm:$0x3] %vm1063_vm1, %v5229_v9  ;;  %1082 = vst.msk [vmem:[#allocation2 + $0x98] sm:$0x3] %vm1063_vm1, %v5229_v9 }
  0x56   : > { %1084 = vst.msk [vmem:[#allocation2 + $0xa8] sm:$0x3] %vm1063_vm1, %v5229_v9  ;;  %1086 = vst.msk [vmem:[#allocation2 + $0xb8] sm:$0x3] %vm1063_vm1, %v5229_v9 }
  0x57   : > { %1088 = vst.msk [vmem:[#allocation2 + $0xc8] sm:$0x3] %vm1063_vm1, %v5229_v9  ;;  %1090 = vst.msk [vmem:[#allocation2 + $0xd8] sm:$0x3] %vm1063_vm1, %v5229_v9 }
  0x58   : > { %1092 = vst.msk [vmem:[#allocation2 + $0xe8] sm:$0x3] %vm1063_vm1, %v5229_v9  ;;  %1094 = vst.msk [vmem:[#allocation2 + $0xf8] sm:$0x3] %vm1063_vm1, %v5229_v9 }
  0x59   : > { %1096 = vst.msk [vmem:[#allocation2 + $0x108] sm:$0x3] %vm1063_vm1, %v5229_v9  ;;  %1098 = vst.msk [vmem:[#allocation2 + $0x118] sm:$0x3] %vm1063_vm1, %v5229_v9 }
  0x5a   : > { %1100 = vst.msk [vmem:[#allocation2 + $0x128] sm:$0x3] %vm1063_vm1, %v5229_v9  ;;  %1102 = vst.msk [vmem:[#allocation2 + $0x138] sm:$0x3] %vm1063_vm1, %v5229_v9  ;;  %v853_v9 = vld [vmem:[%s8788_s16 + $0x240] sm:$0xff] }
  0x5b   : > { %884 = vst.msk [vmem:[%s8715_s22 + $0x30] sm:$0xff] %vm877_vm0, %v5476_v6  ;;  %885 = vst.msk [vmem:[%s8715_s22 + $0x38] sm:$0xff] %vm877_vm0, %v5481_v7  ;;  %v850_v6 = vld [vmem:[%s8788_s16 + $0x228] sm:$0xff]  ;;  %v851_v7 = vld [vmem:[%s8788_s16 + $0x230] sm:$0xff] }
  0x5c   : > { %886 = vst.msk [vmem:[%s8715_s22 + $0x40] sm:$0xff] %vm877_vm0, %v5486_v8  ;;  %887 = vst.msk [vmem:[%s8715_s22 + $0x48] sm:$0xff] %vm877_vm0, %v790_v10  ;;  %v852_v8 = vld [vmem:[%s8788_s16 + $0x238] sm:$0xff]  ;;  %v854_v10 = vld [vmem:[%s8788_s16 + $0x248] sm:$0xff] }
  0x5d   : > { %888 = vst.msk [vmem:[%s8715_s22 + $0x50] sm:$0xff] %vm877_vm0, %v791_v11  ;;  %889 = vst.msk [vmem:[%s8715_s22 + $0x58] sm:$0xff] %vm877_vm0, %v792_v12  ;;  %v855_v11 = vld [vmem:[%s8788_s16 + $0x250] sm:$0xff]  ;;  %v856_v12 = vld [vmem:[%s8788_s16 + $0x258] sm:$0xff] }
  0x5e   : > { %890 = vst.msk [vmem:[%s8715_s22 + $0x60] sm:$0xff] %vm877_vm0, %v793_v13  ;;  %891 = vst.msk [vmem:[%s8715_s22 + $0x68] sm:$0xff] %vm877_vm0, %v794_v14  ;;  %v857_v13 = vld [vmem:[%s8788_s16 + $0x260] sm:$0xff]  ;;  %v858_v14 = vld [vmem:[%s8788_s16 + $0x268] sm:$0xff] }
  0x5f   : > { %892 = vst.msk [vmem:[%s8715_s22 + $0x70] sm:$0xff] %vm877_vm0, %v795_v15  ;;  %893 = vst.msk [vmem:[%s8715_s22 + $0x78] sm:$0xff] %vm877_vm0, %v796_v16  ;;  %v859_v15 = vld [vmem:[%s8788_s16 + $0x270] sm:$0xff]  ;;  %v860_v16 = vld [vmem:[%s8788_s16 + $0x278] sm:$0xff] }
  0x60   : > { %894 = vst.msk [vmem:[%s8715_s22 + $0x80] sm:$0xff] %vm877_vm0, %v797_v17  ;;  %895 = vst.msk [vmem:[%s8715_s22 + $0x88] sm:$0xff] %vm877_vm0, %v798_v18  ;;  %v861_v17 = vld [vmem:[%s8788_s16 + $0x280] sm:$0xff]  ;;  %v862_v18 = vld [vmem:[%s8788_s16 + $0x288] sm:$0xff] }
  0x61   : > { %896 = vst.msk [vmem:[%s8715_s22 + $0x90] sm:$0xff] %vm877_vm0, %v799_v19  ;;  %897 = vst.msk [vmem:[%s8715_s22 + $0x98] sm:$0xff] %vm877_vm0, %v800_v20  ;;  %v863_v19 = vld [vmem:[%s8788_s16 + $0x290] sm:$0xff]  ;;  %v864_v20 = vld [vmem:[%s8788_s16 + $0x298] sm:$0xff] }
  0x62   : > { %898 = vst.msk [vmem:[%s8715_s22 + $0xa0] sm:$0xff] %vm877_vm0, %v801_v21  ;;  %899 = vst.msk [vmem:[%s8715_s22 + $0xa8] sm:$0xff] %vm877_vm0, %v802_v22  ;;  %v865_v21 = vld [vmem:[%s8788_s16 + $0x2a0] sm:$0xff]  ;;  %v866_v22 = vld [vmem:[%s8788_s16 + $0x2a8] sm:$0xff] }
  0x63   : > { %900 = vst.msk [vmem:[%s8715_s22 + $0xb0] sm:$0xff] %vm877_vm0, %v803_v23  ;;  %901 = vst.msk [vmem:[%s8715_s22 + $0xb8] sm:$0xff] %vm877_vm0, %v804_v24  ;;  %v867_v23 = vld [vmem:[%s8788_s16 + $0x2b0] sm:$0xff]  ;;  %v868_v24 = vld [vmem:[%s8788_s16 + $0x2b8] sm:$0xff] }
  0x64   : > { %902 = vst.msk [vmem:[%s8715_s22 + $0xc0] sm:$0xff] %vm877_vm0, %v805_v25  ;;  %903 = vst.msk [vmem:[%s8715_s22 + $0xc8] sm:$0xff] %vm877_vm0, %v806_v26  ;;  %v869_v25 = vld [vmem:[%s8788_s16 + $0x2c0] sm:$0xff]  ;;  %v870_v26 = vld [vmem:[%s8788_s16 + $0x2c8] sm:$0xff] }
  0x65   : > { %904 = vst.msk [vmem:[%s8715_s22 + $0xd0] sm:$0xff] %vm877_vm0, %v807_v27  ;;  %905 = vst.msk [vmem:[%s8715_s22 + $0xd8] sm:$0xff] %vm877_vm0, %v808_v28  ;;  %v871_v27 = vld [vmem:[%s8788_s16 + $0x2d0] sm:$0xff]  ;;  %v872_v28 = vld [vmem:[%s8788_s16 + $0x2d8] sm:$0xff] }
  0x66   : > { %906 = vst.msk [vmem:[%s8715_s22 + $0xe0] sm:$0xff] %vm877_vm0, %v809_v29  ;;  %907 = vst.msk [vmem:[%s8715_s22 + $0xe8] sm:$0xff] %vm877_vm0, %v810_v30  ;;  %v873_v29 = vld [vmem:[%s8788_s16 + $0x2e0] sm:$0xff]  ;;  %v874_v30 = vld [vmem:[%s8788_s16 + $0x2e8] sm:$0xff] }
  0x67   : > { %908 = vst.msk [vmem:[%s8715_s22 + $0xf0] sm:$0xff] %vm877_vm0, %v811_v31  ;;  %909 = vst.msk [vmem:[%s8715_s22 + $0xf8] sm:$0xff] %vm877_vm0, %v812_v32  ;;  %v875_v31 = vld [vmem:[%s8788_s16 + $0x2f0] sm:$0xff]  ;;  %v876_v32 = vld [vmem:[%s8788_s16 + $0x2f8] sm:$0xff] }
  0x68   : > { %910 = vst.msk [vmem:[%s8715_s22 + $0x100] sm:$0xff] %vm877_vm0, %v813_v33  ;;  %911 = vst.msk [vmem:[%s8715_s22 + $0x108] sm:$0xff] %vm877_vm0, %v814_v34  ;;  %v974_v33 = vld [vmem:[%s8789_s17] sm:$0xff]   ;;  %v978_v34 = vld [vmem:[%s8789_s17 + $0x8] sm:$0xff]  }
  0x69   : > { %912 = vst.msk [vmem:[%s8715_s22 + $0x110] sm:$0xff] %vm877_vm0, %v815_v35  ;;  %913 = vst.msk [vmem:[%s8715_s22 + $0x118] sm:$0xff] %vm877_vm0, %v816_v36  ;;  %v982_v35 = vld [vmem:[%s8789_s17 + $0x10] sm:$0xff]   ;;  %v986_v36 = vld [vmem:[%s8789_s17 + $0x18] sm:$0xff]  }
  0x6a   : > { %914 = vst.msk [vmem:[%s8715_s22 + $0x120] sm:$0xff] %vm877_vm0, %v817_v37  ;;  %915 = vst.msk [vmem:[%s8715_s22 + $0x128] sm:$0xff] %vm877_vm0, %v818_v38  ;;  %v990_v37 = vld [vmem:[%s8789_s17 + $0x20] sm:$0xff]   ;;  %v994_v38 = vld [vmem:[%s8789_s17 + $0x28] sm:$0xff]  }
  0x6b   : > { %916 = vst.msk [vmem:[%s8715_s22 + $0x130] sm:$0xff] %vm877_vm0, %v819_v39  ;;  %917 = vst.msk [vmem:[%s8715_s22 + $0x138] sm:$0xff] %vm877_vm0, %v820_v40  ;;  %v998_v39 = vld [vmem:[%s8789_s17 + $0x30] sm:$0xff]   ;;  %v1002_v40 = vld [vmem:[%s8789_s17 + $0x38] sm:$0xff]  }
  0x6c   : > { %918 = vst.msk [vmem:[%s8715_s22 + $0x140] sm:$0xff] %vm877_vm0, %v821_v41  ;;  %919 = vst.msk [vmem:[%s8715_s22 + $0x148] sm:$0xff] %vm877_vm0, %v822_v42  ;;  %v1038_v41 = vld [vmem:[%s8790_s18] sm:$0xff]   ;;  %v1042_v42 = vld [vmem:[%s8790_s18 + $0x8] sm:$0xff]  }
  0x6d   : > { %920 = vst.msk [vmem:[%s8715_s22 + $0x150] sm:$0xff] %vm877_vm0, %v823_v43  ;;  %921 = vst.msk [vmem:[%s8715_s22 + $0x158] sm:$0xff] %vm877_vm0, %v824_v44  ;;  %v1054_v43 = vld [vmem:[%s8712_s19] sm:$0x3]  ;;  %v1055_v44 = vld [vmem:[%s8712_s19 + $0x2] sm:$0x3] }
  0x6e   : > { %922 = vst.msk [vmem:[%s8715_s22 + $0x160] sm:$0xff] %vm877_vm0, %v825_v45  ;;  %923 = vst.msk [vmem:[%s8715_s22 + $0x168] sm:$0xff] %vm877_vm0, %v826_v46  ;;  %v1059_v45 = vld [vmem:[%s8713_s20] sm:$0x3] }
  0x6f   : > { %924 = vst.msk [vmem:[%s8715_s22 + $0x170] sm:$0xff] %vm877_vm0, %v827_v47  ;;  %925 = vst.msk [vmem:[%s8715_s22 + $0x178] sm:$0xff] %vm877_vm0, %v828_v48 }
  0x70   : > { %926 = vst.msk [vmem:[%s8715_s22 + $0x180] sm:$0xff] %vm877_vm0, %v829_v49  ;;  %927 = vst.msk [vmem:[%s8715_s22 + $0x188] sm:$0xff] %vm877_vm0, %v830_v50 }
  0x71   : > { %928 = vst.msk [vmem:[%s8715_s22 + $0x190] sm:$0xff] %vm877_vm0, %v831_v51  ;;  %929 = vst.msk [vmem:[%s8715_s22 + $0x198] sm:$0xff] %vm877_vm0, %v832_v52 }
  0x72   : > { %930 = vst.msk [vmem:[%s8715_s22 + $0x1a0] sm:$0xff] %vm877_vm0, %v833_v53  ;;  %931 = vst.msk [vmem:[%s8715_s22 + $0x1a8] sm:$0xff] %vm877_vm0, %v834_v54 }
  0x73   : > { %932 = vst.msk [vmem:[%s8715_s22 + $0x1b0] sm:$0xff] %vm877_vm0, %v835_v55  ;;  %933 = vst.msk [vmem:[%s8715_s22 + $0x1b8] sm:$0xff] %vm877_vm0, %v836_v56 }
  0x74   : > { %934 = vst.msk [vmem:[%s8715_s22 + $0x1c0] sm:$0xff] %vm877_vm0, %v837_v57  ;;  %935 = vst.msk [vmem:[%s8715_s22 + $0x1c8] sm:$0xff] %vm877_vm0, %v838_v58 }
  0x75   : > { %936 = vst.msk [vmem:[%s8715_s22 + $0x1d0] sm:$0xff] %vm877_vm0, %v839_v59  ;;  %937 = vst.msk [vmem:[%s8715_s22 + $0x1d8] sm:$0xff] %vm877_vm0, %v840_v60 }
  0x76   : > { %938 = vst.msk [vmem:[%s8715_s22 + $0x1e0] sm:$0xff] %vm877_vm0, %v841_v61  ;;  %939 = vst.msk [vmem:[%s8715_s22 + $0x1e8] sm:$0xff] %vm877_vm0, %v842_v62 }
  0x77   : > { %940 = vst.msk [vmem:[%s8715_s22 + $0x1f0] sm:$0xff] %vm877_vm0, %v843_v63  ;;  %941 = vst.msk [vmem:[%s8715_s22 + $0x1f8] sm:$0xff] %vm877_vm0, %v844_v0 }
  0x78   : > { %942 = vst.msk [vmem:[%s8715_s22 + $0x200] sm:$0xff] %vm877_vm0, %v845_v1  ;;  %943 = vst.msk [vmem:[%s8715_s22 + $0x208] sm:$0xff] %vm877_vm0, %v846_v2 }
  0x79   : > { %944 = vst.msk [vmem:[%s8715_s22 + $0x210] sm:$0xff] %vm877_vm0, %v847_v3  ;;  %945 = vst.msk [vmem:[%s8715_s22 + $0x218] sm:$0xff] %vm877_vm0, %v848_v4 }
  0x7a   : > { %946 = vst.msk [vmem:[%s8715_s22 + $0x220] sm:$0xff] %vm877_vm0, %v849_v5  ;;  %947 = vst.msk [vmem:[%s8715_s22 + $0x228] sm:$0xff] %vm877_vm0, %v850_v6 }
  0x7b   : > { %948 = vst.msk [vmem:[%s8715_s22 + $0x230] sm:$0xff] %vm877_vm0, %v851_v7  ;;  %949 = vst.msk [vmem:[%s8715_s22 + $0x238] sm:$0xff] %vm877_vm0, %v852_v8 }
  0x7c   : > { %950 = vst.msk [vmem:[%s8715_s22 + $0x240] sm:$0xff] %vm877_vm0, %v853_v9  ;;  %951 = vst.msk [vmem:[%s8715_s22 + $0x248] sm:$0xff] %vm877_vm0, %v854_v10 }
  0x7d   : > { %952 = vst.msk [vmem:[%s8715_s22 + $0x250] sm:$0xff] %vm877_vm0, %v855_v11  ;;  %953 = vst.msk [vmem:[%s8715_s22 + $0x258] sm:$0xff] %vm877_vm0, %v856_v12 }
  0x7e   : > { %954 = vst.msk [vmem:[%s8715_s22 + $0x260] sm:$0xff] %vm877_vm0, %v857_v13  ;;  %955 = vst.msk [vmem:[%s8715_s22 + $0x268] sm:$0xff] %vm877_vm0, %v858_v14 }
  0x7f   : > { %956 = vst.msk [vmem:[%s8715_s22 + $0x270] sm:$0xff] %vm877_vm0, %v859_v15  ;;  %957 = vst.msk [vmem:[%s8715_s22 + $0x278] sm:$0xff] %vm877_vm0, %v860_v16 }
  0x80   : > { %958 = vst.msk [vmem:[%s8715_s22 + $0x280] sm:$0xff] %vm877_vm0, %v861_v17  ;;  %959 = vst.msk [vmem:[%s8715_s22 + $0x288] sm:$0xff] %vm877_vm0, %v862_v18 }
  0x81   : > { %960 = vst.msk [vmem:[%s8715_s22 + $0x290] sm:$0xff] %vm877_vm0, %v863_v19  ;;  %961 = vst.msk [vmem:[%s8715_s22 + $0x298] sm:$0xff] %vm877_vm0, %v864_v20 }
  0x82   : > { %962 = vst.msk [vmem:[%s8715_s22 + $0x2a0] sm:$0xff] %vm877_vm0, %v865_v21  ;;  %963 = vst.msk [vmem:[%s8715_s22 + $0x2a8] sm:$0xff] %vm877_vm0, %v866_v22 }
  0x83   : > { %964 = vst.msk [vmem:[%s8715_s22 + $0x2b0] sm:$0xff] %vm877_vm0, %v867_v23  ;;  %965 = vst.msk [vmem:[%s8715_s22 + $0x2b8] sm:$0xff] %vm877_vm0, %v868_v24 }
  0x84   : > { %966 = vst.msk [vmem:[%s8715_s22 + $0x2c0] sm:$0xff] %vm877_vm0, %v869_v25  ;;  %967 = vst.msk [vmem:[%s8715_s22 + $0x2c8] sm:$0xff] %vm877_vm0, %v870_v26 }
  0x85   : > { %968 = vst.msk [vmem:[%s8715_s22 + $0x2d0] sm:$0xff] %vm877_vm0, %v871_v27  ;;  %969 = vst.msk [vmem:[%s8715_s22 + $0x2d8] sm:$0xff] %vm877_vm0, %v872_v28 }
  0x86   : > { %970 = vst.msk [vmem:[%s8715_s22 + $0x2e0] sm:$0xff] %vm877_vm0, %v873_v29  ;;  %971 = vst.msk [vmem:[%s8715_s22 + $0x2e8] sm:$0xff] %vm877_vm0, %v874_v30 }
  0x87   : > { %972 = vst.msk [vmem:[%s8715_s22 + $0x2f0] sm:$0xff] %vm877_vm0, %v875_v31  ;;  %973 = vst.msk [vmem:[%s8715_s22 + $0x2f8] sm:$0xff] %vm877_vm0, %v876_v32 }
  0x88   : > { %1006 = vst [vmem:[%s8716_s23] sm:$0xff] %v974_v33   ;;  %1010 = vst [vmem:[%s8716_s23 + $0x8] sm:$0xff] %v978_v34  }
  0x89   : > { %1014 = vst [vmem:[%s8716_s23 + $0x10] sm:$0xff] %v982_v35   ;;  %1018 = vst [vmem:[%s8716_s23 + $0x18] sm:$0xff] %v986_v36  }
  0x8a   : > { %1022 = vst [vmem:[%s8716_s23 + $0x20] sm:$0xff] %v990_v37   ;;  %1026 = vst [vmem:[%s8716_s23 + $0x28] sm:$0xff] %v994_v38  }
  0x8b   : > { %1030 = vst [vmem:[%s8716_s23 + $0x30] sm:$0xff] %v998_v39   ;;  %1034 = vst [vmem:[%s8716_s23 + $0x38] sm:$0xff] %v1002_v40  }
  0x8c   : > { %1046 = vst [vmem:[%s8717_s24] sm:$0xff] %v1038_v41   ;;  %1050 = vst [vmem:[%s8717_s24 + $0x8] sm:$0xff] %v1042_v42  }
  0x8d   : > { %1057 = vst.msk [vmem:[%s8718_s25] sm:$0x3] %vm1056_vm2, %v1054_v43  ;;  %1058 = vst.msk [vmem:[%s8718_s25 + $0x2] sm:$0x3] %vm1056_vm2, %v1055_v44 }
  0x8e   : > { %1061 = vst.msk [vmem:[%s8719_s26] sm:$0x3] %vm1060_vm3, %v1059_v45 }
  0x8f PF: > { %s8791_s1 = sld [smem:[#allocation21_spill]]  ;;  %vm1328_vm4 = vcmask 1040384   ;;  %vm1303_vm5 = vcmask 146432   ;;  %v5100_v49 = vld [vmem:[%s5426_s7] sm:$0xff]   ;;  %v5101_v50 = vld [vmem:[%s5426_s7 + $0x8] sm:$0xff]   ;;  %v5102_v51 = vld [vmem:[%s5426_s7 + $0x10] sm:$0xff]   ;;  %v1197_v62 = vlaneseq }
  0x90   : > { %4819 = vmatprep.mubr.msk.bf16.mxu0 %vm1303_vm5, %v5100_v49  ;;  %v5103_v52 = vld [vmem:[%s5426_s7 + $0x18] sm:$0xff]   ;;  %v5104_v53 = vld [vmem:[%s5426_s7 + $0x20] sm:$0xff]   ;;  %v5105_v54 = vld [vmem:[%s5426_s7 + $0x28] sm:$0xff]   ;;  %v8757_v57 = vmov 0.0   ;;  %s8792_s0 = sld [smem:[#allocation25_spill]]  ;;  %vm1513_vm6 = vcmask 523264  }
  0x91   : > { %v5106_v55 = vld [vmem:[%s5426_s7 + $0x30] sm:$0xff]   ;;  %v5107_v56 = vld [vmem:[%s5426_s7 + $0x38] sm:$0xff]   ;;  %4218 = vst [vmem:[%s5428_s29] sm:$0x3] %v8757_v57  ;;  %v6346_v63 = vshrl.u32 %v1197_v62, 7  ;;  %s8795_s30 = sld [smem:[#allocation22_spill]]  ;;  %v1162_v5 = vld [vmem:[%s8715_s22] sm:$0xff] }
  0x92   : > { %v1164_v2 = vld [vmem:[%s8715_s22 + $0x10] sm:$0xff]  ;;  %v4331_v6 = vld [vmem:[%s8715_s22 + $0x80] sm:$0xff]  ;;  %v1165_v7 = vld [vmem:[%s8715_s22 + $0x18] sm:$0xff]  ;;  %s8796_s9 = sld [smem:[#allocation23_spill]]  ;;  %s4709_s5 = sshll.u32 %s5391_s8, 5 }
  0x93   : > { %8793 = vst [vmem:[#allocation14_spill] sm:$0xff] %v6346_v63  ;;  %v6349_v0 = vsub.s32 0, %v6346_v63  ;;  %v4333_v4 = vld [vmem:[%s8715_s22 + $0x90] sm:$0xff]  ;;  %v4334_v8 = vld [vmem:[%s8715_s22 + $0x98] sm:$0xff]  ;;  %v1163_v9 = vld [vmem:[%s8715_s22 + $0x8] sm:$0xff]  ;;  %v8746_v10 = vsub.s32 1, %v6346_v63 }
  0x94   : > { %v4332_v11 = vld [vmem:[%s8715_s22 + $0x88] sm:$0xff]  ;;  %v1168_v12 = vld [vmem:[%s8715_s22 + $0x30] sm:$0xff]  ;;  %v1219_v15 = vsub.f32 1.0, %v4333_v4  ;;  %v1166_v19 = vld [vmem:[%s8715_s22 + $0x20] sm:$0xff]  ;;  %v1217_v21 = vsub.f32 1.0, %v4331_v6  ;;  %v1220_v23 = vsub.f32 1.0, %v4334_v8 }
  0x95   : > { %v5098_v46 = vld [vmem:[%s8791_s1 + $0x8] ss:$0 sps:$4 sm:$0x11]   ;;  %v5099_v47 = vld [vmem:[%s8791_s1] sm:$0xff]   ;;  %8794 = vst [vmem:[#allocation15_spill] sm:$0xff] %v6349_v0  ;;  %v4337_v18 = vld [vmem:[%s8715_s22 + $0xb0] sm:$0xff] }
  0x96   : > { %5038 = vmatprep.subr.msk.bf16.mxu0 %vm1328_vm4, %v5098_v46  ;;  %v1330_v48 = vsel %vm1328_vm4, %v5098_v46, 0  ;;  %v5108_v58 = vld [vmem:[%s8792_s0 + $0x18] sm:$0xff]   ;;  %v5109_v59 = vld [vmem:[%s8792_s0 + $0x10] sm:$0xff]   ;;  %v5110_v60 = vld [vmem:[%s8792_s0 + $0x8] sm:$0xff]   ;;  %v1218_v25 = vsub.f32 1.0, %v4332_v11  ;;  %v8745_v28 = vsub.s32 2, %v6346_v63 }
  0x97   : > { %4816 = vmatpush3.bf16.msra.mxu0 %v1330_v48  ;;  %4835 = vmatprep.subr.bf16.mxu1 %v5108_v58  ;;  %v5111_v61 = vld [vmem:[%s8792_s0] sm:$0xff]   ;;  %v1223_v30 = vsub.f32 1.0, %v4337_v18  ;;  %v1169_v35 = vld [vmem:[%s8715_s22 + $0x38] sm:$0xff]  ;;  %v1167_v40 = vld [vmem:[%s8715_s22 + $0x28] sm:$0xff]  ;;  %v8744_v62 = vsub.s32 3, %v6346_v63  ;;  %v8742_v8 = vsub.s32 5, %v6346_v63 }
  0x98   : > { %4817 = vmatprep.subr.bf16.mxu0 %v5099_v47  ;;  %4836 = vmatpush3.bf16.msra.mxu1 %v5108_v58  ;;  %v1196_v1 = vld [vmem:[%s8795_s30 + $0x1] sm:$0x1]  ;;  %v4338_v39 = vld [vmem:[%s8715_s22 + $0xb8] sm:$0xff]  ;;  %v4336_v41 = vld [vmem:[%s8715_s22 + $0xa8] sm:$0xff]  ;;  %s8797_s21 = sld [smem:[#allocation24_spill]]  ;;  %s5231_s1 = smov 64  }
  0x99   : > { %4837 = vmatprep.subr.bf16.mxu1 %v5109_v59  ;;  %v6358_v3 = vrot.slane %v1196_v1, %v6349_v0  ;;  %v6388_v13 = vld [vmem:[%s8796_s9] sm:$0xff]  ;;  %v1249_v16 = vsub.f32 1.0, %v1196_v1  ;;  %v1172_v43 = vld [vmem:[%s8715_s22 + $0x50] sm:$0xff]  ;;  %v1222_v58 = vsub.f32 1.0, %v4336_v41  ;;  %v4340_v4 = vld [vmem:[%s8715_s22 + $0xc8] sm:$0xff]  ;;  %s8808_s7 = sld [smem:[#allocation26_spill]] }
  0x9a   : > { %v4335_v20 = vld [vmem:[%s8715_s22 + $0xa0] sm:$0xff]  ;;  %v6405_v26 = vrot.slane %v6388_v13, %v6349_v0  ;;  %v6410_v27 = vrot.slane %v6388_v13, %v8746_v10  ;;  %v4341_v44 = vld [vmem:[%s8715_s22 + $0xd0] sm:$0xff]  ;;  %v4344_v41 = vld [vmem:[%s8715_s22 + $0xe8] sm:$0xff]  ;;  %s8811_s28 = sld [smem:[#allocation29_spill]] }
  0x9b   : > { %4818 = vmatpush3.bf16.msra.mxu0 %v5099_v47  ;;  %v1203_v14 = vmul.f32 %v6358_v3, %v1164_v2  ;;  %v1201_v17 = vmul.f32 %v6358_v3, %v1162_v5  ;;  %v1204_v22 = vmul.f32 %v6358_v3, %v1165_v7  ;;  %v1202_v24 = vmul.f32 %v6358_v3, %v1163_v9  ;;  %v1565_v33 = vld [vmem:[#allocation2] sm:$0xff]  ;;  %v1176_v5 = vld [vmem:[%s8715_s22 + $0x70] sm:$0xff]  ;;  %s8813_s16 = sld [smem:[#allocation27_spill]] }
  0x9c   : > { %4859 = vmatprep.subr.bf16.mxu0 %v8757_v57  ;;  %4838 = vmatpush3.bf16.msra.mxu1 %v5109_v59  ;;  %v1207_v29 = vmul.f32 %v6358_v3, %v1168_v12  ;;  %v1205_v31 = vmul.f32 %v6358_v3, %v1166_v19  ;;  %v1221_v32 = vsub.f32 1.0, %v4335_v20  ;;  %v1617_v34 = vld [vmem:[#allocation2 + $0x1] sm:$0xff]  ;;  %v6421_v37 = vrot.slane %v1249_v16, %v6349_v0  ;;  %v1173_v59 = vld [vmem:[%s8715_s22 + $0x58] sm:$0xff]  ;;  %v4345_v6 = vld [vmem:[%s8715_s22 + $0xf0] sm:$0xff]  ;;  %s8817_s27 = sld [smem:[#allocation28_spill]] }
  0x9d   : > { %4839 = vmatprep.subr.bf16.mxu1 %v5110_v60  ;;  %v6418_v36 = vmul.f32 %v1219_v15, %v1203_v14  ;;  %v6423_v38 = vmul.f32 %v1217_v21, %v1201_v17  ;;  %v6434_v42 = vmul.f32 %v1220_v23, %v1204_v22  ;;  %v1585_v45 = vmul.f32 %v6405_v26, %v1565_v33  ;;  %v1174_v12 = vld [vmem:[%s8715_s22 + $0x60] sm:$0xff]  ;;  %v4346_v33 = vld [vmem:[%s8715_s22 + $0xf8] sm:$0xff]  ;;  %s8837_s4 = sld [smem:[#allocation30_spill]] }
  0x9e   : > { %4820 = vmatmul.mubr.msk.bf16.vlgmr.msra.gmra.mxu0 %vm1303_vm5, %v5101_v50  ;;  %v1637_v46 = vmul.f32 %v6410_v27, %v1617_v34  ;;  %v6447_v47 = vrot.slane %v6388_v13, %v8745_v28  ;;  %v6449_v48 = vmul.f32 %v1218_v25, %v1202_v24  ;;  %v6451_v49 = vmul.f32 %v1223_v30, %v1207_v29  ;;  %v4343_v14 = vld [vmem:[%s8715_s22 + $0xe0] sm:$0xff]  ;;  %v1175_v34 = vld [vmem:[%s8715_s22 + $0x68] sm:$0xff]  ;;  %v1989_v28 = vld [vmem:[#allocation2 + $0x92] sm:$0xff]  ;;  %s8839_s0 = sld [smem:[#allocation34_spill]] }
  0x9f   : > { %4823 = vmatprep.mubr.msk.bf16.mxu0 %vm1303_vm5, %v5102_v51  ;;  %v6453_v50 = vmul.f32 %v1221_v32, %v1205_v31  ;;  %v1208_v51 = vmul.f32 %v6358_v3, %v1169_v35  ;;  %v1211_v1 = vmul.f32 %v6358_v3, %v1172_v43  ;;  %v1227_v2 = vsub.f32 1.0, %v4341_v44  ;;  %v6501_v25 = vld [vmem:[%s8797_s21 + $0x1] sm:$0x1]  ;;  %v1177_v32 = vld [vmem:[%s8715_s22 + $0x78] sm:$0xff] }
  0xa0   : > { %4840 = vmatpush3.bf16.msra.mxu1 %v5110_v60  ;;  %v4342_v60 = vld [vmem:[%s8715_s22 + $0xd8] sm:$0xff]  ;;  %v8743_v7 = vsub.s32 4, %v6346_v63  ;;  %v1653_v15 = vadd.f32 %v1637_v46, %v1585_v45  ;;  %v1212_v17 = vmul.f32 %v6358_v3, %v1173_v59  ;;  %v8741_v19 = vsub.s32 6, %v6346_v63  ;;  %v4399_v45 = vld [vmem:[%s8715_s22 + $0x100] sm:$0xff]  ;;  %v4400_v46 = vld [vmem:[%s8715_s22 + $0x108] sm:$0xff]  ;;  %s8812_s10 = smov %s8811_s28 }
  0xa1   : > { %4841 = vmatprep.subr.bf16.mxu1 %v5111_v61  ;;  %v1228_v18 = vsub.f32 1.0, %v4342_v60  ;;  %v8740_v20 = vsub.s32 7, %v6346_v63  ;;  %v1226_v22 = vsub.f32 1.0, %v4340_v4  ;;  %v1215_v23 = vmul.f32 %v6358_v3, %v1176_v5  ;;  %v4401_v4 = vld [vmem:[%s8715_s22 + $0x110] sm:$0xff]  ;;  %v4402_v5 = vld [vmem:[%s8715_s22 + $0x118] sm:$0xff] }
  0xa2   : > { %v1231_v24 = vsub.f32 1.0, %v4345_v6  ;;  %v1213_v30 = vmul.f32 %v6358_v3, %v1174_v12  ;;  %v1229_v31 = vsub.f32 1.0, %v4343_v14  ;;  %v6518_v35 = vrot.slane %v6388_v13, %v8744_v62  ;;  %v4417_v12 = vld [vmem:[%s8715_s22 + $0x190] sm:$0xff]  ;;  %v4418_v14 = vld [vmem:[%s8715_s22 + $0x198] sm:$0xff] }
  0xa3   : > { %v6530_v43 = vrot.slane %v6388_v13, %v8743_v7  ;;  %v6535_v44 = vrot.slane %v6388_v13, %v8742_v8  ;;  %v1885_v7 = vld [vmem:[#allocation2 + $0x90] sm:$0xff] }
  0xa4   : > { %4842 = vmatpush3.bf16.msra.mxu1 %v5111_v61  ;;  %v1171_v61 = vld [vmem:[%s8715_s22 + $0x48] sm:$0xff]  ;;  %v6558_v60 = vmul.f32 %v1231_v24, %v1215_v23  ;;  %v6579_v6 = vmul.f32 %v1229_v31, %v1213_v30  ;;  %v1937_v62 = vld [vmem:[#allocation2 + $0x91] sm:$0xff]  ;;  %s4232_s6 = scalar_lea.hbm %s8839_s0, %s4709_s5 }
  0xa5   : > { %4879 = vmatprep.subr.bf16.mxu1 %v8757_v57  ;;  %v1210_v21 = vmul.f32 %v6358_v3, %v1171_v61  ;;  %v6563_v61 = vrot.slane %v6388_v13, %v8741_v19  ;;  %v4421_v19 = vld [vmem:[%s8715_s22 + $0x1b0] sm:$0xff] }
  0xa6   : > { %4824 = vmatmul.mubr.msk.bf16.gmra.mxu0 %vm1303_vm5, %v5103_v52  ;;  %v1170_v52 = vld [vmem:[%s8715_s22 + $0x40] sm:$0xff] }
  0xa7   : > { %4827 = vmatprep.mubr.msk.bf16.mxu0 %vm1303_vm5, %v5104_v53  ;;  %v4339_v53 = vld [vmem:[%s8715_s22 + $0xc0] sm:$0xff]  ;;  %v1209_v9 = vmul.f32 %v6358_v3, %v1170_v52  ;;  %v6545_v52 = vmul.f32 %v1228_v18, %v1212_v17  ;;  %v6556_v59 = vmul.f32 %v1226_v22, %v1210_v21  ;;  %v4404_v18 = vld [vmem:[%s8715_s22 + $0x128] sm:$0xff] }
  0xa8   : > { %v1225_v11 = vsub.f32 1.0, %v4339_v53  ;;  %v4420_v21 = vld [vmem:[%s8715_s22 + $0x1a8] sm:$0xff] }
  0xae   : > { %4828 = vmatmul.mubr.msk.bf16.gmra.mxu0 %vm1303_vm5, %v5105_v54  ;;  %v1669_v54 = vld [vmem:[#allocation2 + $0x2] sm:$0xff] }
  0xaf   : > { %4831 = vmatprep.mubr.msk.bf16.mxu0 %vm1303_vm5, %v5106_v55  ;;  %v1224_v55 = vsub.f32 1.0, %v4338_v39  ;;  %v1689_v16 = vmul.f32 %v6447_v47, %v1669_v54  ;;  %v4415_v54 = vld [vmem:[%s8715_s22 + $0x180] sm:$0xff] }
  0xb0   : > { %v2090_v17 = vsub.f32 1.0, %v4415_v54 }
  0xb1   : > { %v6503_v29 = vmul.f32 %v1224_v55, %v1208_v51  ;;  %v6543_v51 = vmul.f32 %v1225_v11, %v1209_v9  ;;  %v6547_v53 = vadd.f32 %v1689_v16, %v1653_v15  ;;  %v6554_v55 = vrot.slane %v6501_v25, %v6349_v0  ;;  %v4403_v15 = vld [vmem:[%s8715_s22 + $0x120] sm:$0xff] }
  0xb2   : > { %v1216_v9 = vmul.f32 %v6358_v3, %v1177_v32  ;;  %v1232_v11 = vsub.f32 1.0, %v4346_v33  ;;  %v1230_v16 = vsub.f32 1.0, %v4344_v41  ;;  %v2122_v32 = vsub.f32 1.0, %v6501_v25  ;;  %v1677_v33 = vld [vmem:[#allocation2 + $0xa2] sm:$0xff]  ;;  %v4405_v25 = vld [vmem:[%s8715_s22 + $0x130] sm:$0xff] }
  0xb3   : > { %8798 = vst [vmem:[#allocation16_spill] sm:$0xff] %v6554_v55  ;;  %v2074_v24 = vmul.f32 %v4399_v45, %v6554_v55  ;;  %v2075_v30 = vmul.f32 %v4400_v46, %v6554_v55  ;;  %v2076_v41 = vmul.f32 %v4401_v4, %v6554_v55  ;;  %v2077_v54 = vmul.f32 %v4402_v5, %v6554_v55 }
  0xb4   : > { %v2079_v45 = vmul.f32 %v4404_v18, %v6554_v55  ;;  %v6621_v4 = vmul.f32 %v1232_v11, %v1216_v9  ;;  %v6637_v9 = vld [vmem:[%s8796_s9 + $0x8] ss:$0 sm:$0xff] }
  0xb5   : > { %v6627_v18 = vmul.f32 %v2090_v17, %v2074_v24  ;;  %v2096_v17 = vsub.f32 1.0, %v4421_v19  ;;  %v4408_v19 = vld [vmem:[%s8715_s22 + $0x148] sm:$0xff] }
  0xb6   : > { %4832 = vmatmul.mubr.msk.bf16.gmra.mxu0 %vm1303_vm5, %v5107_v56  ;;  %v1206_v56 = vmul.f32 %v6358_v3, %v1167_v40  ;;  %v6522_v40 = vmul.f32 %v1227_v2, %v1211_v1  ;;  %v6568_v1 = vrot.slane %v6388_v13, %v8740_v20  ;;  %v4416_v2 = vld [vmem:[%s8715_s22 + $0x188] sm:$0xff]  ;;  %v1214_v13 = vmul.f32 %v6358_v3, %v1175_v34  ;;  %v4419_v3 = vld [vmem:[%s8715_s22 + $0x1a0] sm:$0xff] }
  0xb7   : > { %v2091_v31 = vsub.f32 1.0, %v4416_v2  ;;  %v6609_v34 = vld [vmem:[%s8795_s30] ss:$0 sm:$0xff]  ;;  %v2093_v20 = vsub.f32 1.0, %v4418_v14  ;;  %v2094_v46 = vsub.f32 1.0, %v4419_v3  ;;  %v2095_v2 = vsub.f32 1.0, %v4420_v21 }
  0xb8   : > { %v6520_v39 = vmul.f32 %v1222_v58, %v1206_v56  ;;  %v1573_v56 = vld [vmem:[#allocation2 + $0xa0] sm:$0xff]  ;;  %v6623_v5 = vmul.f32 %v1230_v16, %v1214_v13  ;;  %v1697_v14 = vmul.f32 %v6447_v47, %v1677_v33  ;;  %v6632_v21 = vrot.slane %v2122_v32, %v6349_v0 }
  0xb9   : > { %v1625_v58 = vld [vmem:[#allocation2 + $0xa1] sm:$0xff]  ;;  %v1593_v22 = vmul.f32 %v6405_v26, %v1573_v56  ;;  %v2092_v56 = vsub.f32 1.0, %v4417_v12  ;;  %v6629_v3 = vmul.f32 %v2091_v31, %v2075_v30  ;;  %v6641_v13 = vmul.f32 %v2093_v20, %v2077_v54  ;;  %v4422_v20 = vld [vmem:[%s8715_s22 + $0x1b8] sm:$0xff] }
  0xba   : > { %v1645_v23 = vmul.f32 %v6410_v27, %v1625_v58  ;;  %v2078_v58 = vmul.f32 %v4403_v15, %v6554_v55  ;;  %v2080_v16 = vmul.f32 %v4405_v25, %v6554_v55  ;;  %v6651_v30 = vmul.f32 %v2095_v2, %v2079_v45  ;;  %v4407_v31 = vld [vmem:[%s8715_s22 + $0x140] sm:$0xff] }
  0xbb   : > { %v6639_v11 = vmul.f32 %v2092_v56, %v2076_v41  ;;  %v6663_v33 = vmul.f32 %v6563_v61, %v1885_v7  ;;  %v6669_v41 = vmul.f32 %v6637_v9, %v1989_v28  ;;  %v4423_v7 = vld [vmem:[%s8715_s22 + $0x1c0] sm:$0xff]  ;;  %v4409_v28 = vld [vmem:[%s8715_s22 + $0x150] sm:$0xff] }
  0xbc   : > { %v1661_v12 = vadd.f32 %v1645_v23, %v1593_v22  ;;  %v6649_v24 = vmul.f32 %v2094_v46, %v2078_v58  ;;  %v6686_v25 = vmul.f32 %v2096_v17, %v2080_v16  ;;  %v4410_v16 = vld [vmem:[%s8715_s22 + $0x158] sm:$0xff]  ;;  %v4425_v17 = vld [vmem:[%s8715_s22 + $0x1d0] sm:$0xff] }
  0xbe   : > { %v6671_v54 = vadd.f32 %v1697_v14, %v1661_v12  ;;  %v2082_v12 = vmul.f32 %v4407_v31, %v6554_v55  ;;  %v2083_v14 = vmul.f32 %v4408_v19, %v6554_v55 }
 0x15e   : > { %v4821_v8 = vpop.f32.mrf.mxu0 }
 0x15f   : > { %v1375_v15 = vadd.f32 %v4821_v8, %v6609_v34  ;;  %v4406_v8 = vld [vmem:[%s8715_s22 + $0x138] sm:$0xff] }
 0x160   : > { %v1366_v10 = vpop.f32.mrf.mxu0  ;;  %v2081_v46 = vmul.f32 %v4406_v8, %v6554_v55 }
 0x161   : > { %v1435_v22 = vmul.f32 %v6421_v37, %v1375_v15  ;;  %v1367_v23 = vadd.f32 %v6609_v34, %v1366_v10  ;;  %v6666_v10 = vmul.f32 %v6568_v1, %v1937_v62  ;;  %v4424_v62 = vld [vmem:[%s8715_s22 + $0x1c8] sm:$0xff] }
 0x162   : > { %v4822_v32 = vpop.f32.mrf.mxu0  ;;  %v2099_v19 = vsub.f32 1.0, %v4424_v62 }
 0x163   : > { %v1451_v56 = vadd.f32 %v1435_v22, %v6418_v36  ;;  %v1433_v58 = vmul.f32 %v6421_v37, %v1367_v23  ;;  %v1378_v45 = vadd.f32 %v4822_v32, %v6609_v34  ;;  %v2097_v36 = vsub.f32 1.0, %v4422_v20  ;;  %v4426_v23 = vld [vmem:[%s8715_s22 + $0x1d8] sm:$0xff] }
 0x164   : > { %v1369_v2 = vpop.f32.mrf.mxu0  ;;  %v2084_v32 = vmul.f32 %v4409_v28, %v6554_v55  ;;  %v2085_v28 = vmul.f32 %v4410_v16, %v6554_v55  ;;  %v2101_v63 = vsub.f32 1.0, %v4426_v23 }
 0x165   : > { %vm1467_vm7 = vcmp.gt.f32.partialorder %v1451_v56, 0.5  ;;  %1516 = vst.msk [vmem:[%s8715_s22 + $0x10] sm:$0xff] %vm1513_vm6, %v1451_v56  ;;  %v1449_v15 = vadd.f32 %v1433_v58, %v6423_v38  ;;  %v1436_v8 = vmul.f32 %v6421_v37, %v1378_v45  ;;  %v1370_v22 = vadd.f32 %v6609_v34, %v1369_v2 }
 0x166   : > { %v4368_v20 = vsel %vm1467_vm7, 1.0, %v8757_v57  ;;  %v4825_v31 = vpop.f32.mrf.mxu0  ;;  %v2098_v38 = vsub.f32 1.0, %v4423_v7  ;;  %v2100_v2 = vsub.f32 1.0, %v4425_v17  ;;  %v6738_v23 = vmul.f32 %v2097_v36, %v2081_v46 }
 0x167   : > { %4384 = vst.msk [vmem:[%s8715_s22 + $0x90] sm:$0xff] %vm1513_vm6, %v4368_v20  ;;  %1549 = vst.msk [vmem:[#allocation2 + $0x31] sm:$0xff] %vm1513_vm6, %v4368_v20  ;;  %vm1465_vm8 = vcmp.gt.f32.partialorder %v1449_v15, 0.5  ;;  %v1452_v56 = vadd.f32 %v1436_v8, %v6434_v42  ;;  %v1434_v58 = vmul.f32 %v6421_v37, %v1370_v22  ;;  %v1391_v45 = vadd.f32 %v4825_v31, %v6609_v34  ;;  %v4411_v22 = vld [vmem:[%s8715_s22 + $0x160] sm:$0xff] }
 0x168   : > { %1514 = vst.msk [vmem:[%s8715_s22] sm:$0xff] %vm1513_vm6, %v1449_v15  ;;  %v4366_v7 = vsel %vm1465_vm8, 1.0, %v8757_v57  ;;  %v1382_v62 = vpop.f32.mrf.mxu0  ;;  %v6740_v20 = vmul.f32 %v2098_v38, %v2082_v12  ;;  %v6742_v31 = vmul.f32 %v2099_v19, %v2083_v14  ;;  %v4412_v12 = vld [vmem:[%s8715_s22 + $0x168] sm:$0xff]  ;;  %v6762_v14 = vld [vmem:[%s8715_s22 + $0x1e0] sm:$0xff] }
 0x169   : > { %4382 = vst.msk [vmem:[%s8715_s22 + $0x80] sm:$0xff] %vm1513_vm6, %v4366_v7  ;;  %1547 = vst.msk [vmem:[#allocation2 + $0x11] sm:$0xff] %vm1513_vm6, %v4366_v7  ;;  %vm1468_vm9 = vcmp.gt.f32.partialorder %v1452_v56, 0.5  ;;  %v1450_v42 = vadd.f32 %v1434_v58, %v6449_v48  ;;  %v1439_v15 = vmul.f32 %v6421_v37, %v1391_v45  ;;  %v1383_v8 = vadd.f32 %v6609_v34, %v1382_v62  ;;  %v6767_v38 = vld [vmem:[%s8715_s22 + $0x1e8] sm:$0xff] }
 0x16a   : > { %1517 = vst.msk [vmem:[%s8715_s22 + $0x18] sm:$0xff] %vm1513_vm6, %v1452_v56  ;;  %v4369_v16 = vsel %vm1468_vm9, 1.0, %v8757_v57  ;;  %v4826_v17 = vpop.f32.mrf.mxu0  ;;  %8799 = vst [vmem:[#allocation17_spill] sm:$0xff] %v6762_v14  ;;  %v6770_v56 = vmul.f32 %v2100_v2, %v2084_v32  ;;  %v6772_v58 = vmul.f32 %v2101_v63, %v2085_v28  ;;  %v6775_v45 = vmul.f32 %v4411_v22, %v6554_v55 }
 0x16b   : > { %4385 = vst.msk [vmem:[%s8715_s22 + $0x98] sm:$0xff] %vm1513_vm6, %v4369_v16  ;;  %1550 = vst.msk [vmem:[#allocation2 + $0x41] sm:$0xff] %vm1513_vm6, %v4369_v16  ;;  %vm1466_vm10 = vcmp.gt.f32.partialorder %v1450_v42, 0.5  ;;  %v1455_v48 = vadd.f32 %v1439_v15, %v6451_v49  ;;  %v1437_v46 = vmul.f32 %v6421_v37, %v1383_v8  ;;  %v1394_v36 = vadd.f32 %v4826_v17, %v6609_v34 }
 0x16c   : > { %1515 = vst.msk [vmem:[%s8715_s22 + $0x8] sm:$0xff] %vm1513_vm6, %v1450_v42  ;;  %8800 = vst [vmem:[#allocation18_spill] sm:$0xff] %v6767_v38  ;;  %v4367_v49 = vsel %vm1466_vm10, 1.0, %v8757_v57  ;;  %v1385_v19 = vpop.f32.mrf.mxu0  ;;  %v6797_v8 = vmul.f32 %v4412_v12, %v6554_v55 }
 0x16d   : > { %4383 = vst.msk [vmem:[%s8715_s22 + $0x88] sm:$0xff] %vm1513_vm6, %v4367_v49  ;;  %1548 = vst.msk [vmem:[#allocation2 + $0x21] sm:$0xff] %vm1513_vm6, %v4367_v49  ;;  %vm1471_vm11 = vcmp.gt.f32.partialorder %v1455_v48, 0.5  ;;  %v1453_v32 = vadd.f32 %v1437_v46, %v6453_v50  ;;  %v1440_v63 = vmul.f32 %v6421_v37, %v1394_v36  ;;  %v1386_v7 = vadd.f32 %v6609_v34, %v1385_v19 }
 0x16e   : > { %1520 = vst.msk [vmem:[%s8715_s22 + $0x30] sm:$0xff] %vm1513_vm6, %v1455_v48  ;;  %v4372_v62 = vsel %vm1471_vm11, 1.0, %v8757_v57  ;;  %v4829_v28 = vpop.f32.mrf.mxu0  ;;  %v6790_v2 = vld [vmem:[#allocation2 + $0x30] sm:$0xff]  ;;  %8801 = vst [vmem:[#allocation19_spill] sm:$0xff] %v6797_v8 }
 0x16f   : > { %v6792_v42 = vld [vmem:[#allocation2 + $0x31] sm:$0xff]  ;;  %4388 = vst.msk [vmem:[%s8715_s22 + $0xb0] sm:$0xff] %vm1513_vm6, %v4372_v62  ;;  %1553 = vst.msk [vmem:[#allocation2 + $0x71] sm:$0xff] %vm1513_vm6, %v4372_v62  ;;  %vm1469_vm12 = vcmp.gt.f32.partialorder %v1453_v32, 0.5  ;;  %v1456_v16 = vadd.f32 %v1440_v63, %v6503_v29  ;;  %v1438_v17 = vmul.f32 %v6421_v37, %v1386_v7  ;;  %v1407_v48 = vadd.f32 %v4829_v28, %v6609_v34 }
 0x170   : > { %v6794_v15 = vld [vmem:[#allocation2 + $0x32] sm:$0xff]  ;;  %1518 = vst.msk [vmem:[%s8715_s22 + $0x20] sm:$0xff] %vm1513_vm6, %v1453_v32  ;;  %v4370_v46 = vsel %vm1469_vm12, 1.0, %v8757_v57  ;;  %v1398_v36 = vpop.f32.mrf.mxu0  ;;  %v6818_v62 = vmul.f32 %v6563_v61, %v6790_v2  ;;  %v6822_v32 = vmul.f32 %v6568_v1, %v6792_v42 }
 0x171   : > { %v1566_v12 = vld [vmem:[#allocation2 + $0x10] sm:$0xff]  ;;  %v6826_v29 = vmul.f32 %v6637_v9, %v6794_v15  ;;  %4386 = vst.msk [vmem:[%s8715_s22 + $0xa0] sm:$0xff] %vm1513_vm6, %v4370_v46  ;;  %1551 = vst.msk [vmem:[#allocation2 + $0x51] sm:$0xff] %vm1513_vm6, %v4370_v46  ;;  %vm1472_vm13 = vcmp.gt.f32.partialorder %v1456_v16, 0.5  ;;  %v1454_v63 = vadd.f32 %v1438_v17, %v6520_v39  ;;  %v1443_v7 = vmul.f32 %v6421_v37, %v1407_v48 }
 0x172   : > { %v1618_v49 = vld [vmem:[#allocation2 + $0x11] sm:$0xff]  ;;  %1521 = vst.msk [vmem:[%s8715_s22 + $0x38] sm:$0xff] %vm1513_vm6, %v1456_v16  ;;  %v1399_v28 = vadd.f32 %v6609_v34, %v1398_v36  ;;  %v4373_v50 = vsel %vm1472_vm13, 1.0, %v8757_v57  ;;  %v4830_v22 = vpop.f32.mrf.mxu0  ;;  %v1586_v0 = vmul.f32 %v6405_v26, %v1566_v12 }
 0x173   : > { %v6814_v19 = vld [vmem:[#allocation2 + $0x12] sm:$0xff]  ;;  %v1638_v55 = vmul.f32 %v6410_v27, %v1618_v49  ;;  %4389 = vst.msk [vmem:[%s8715_s22 + $0xb8] sm:$0xff] %vm1513_vm6, %v4373_v50  ;;  %1554 = vst.msk [vmem:[#allocation2 + $0x81] sm:$0xff] %vm1513_vm6, %v4373_v50  ;;  %vm1470_vm14 = vcmp.gt.f32.partialorder %v1454_v63, 0.5  ;;  %v1459_v39 = vadd.f32 %v1443_v7, %v6522_v40  ;;  %v1410_v17 = vadd.f32 %v4830_v22, %v6609_v34 }
 0x174   : > { %v1690_v46 = vmul.f32 %v6447_v47, %v6814_v19  ;;  %1519 = vst.msk [vmem:[%s8715_s22 + $0x28] sm:$0xff] %vm1513_vm6, %v1454_v63  ;;  %v1441_v16 = vmul.f32 %v6421_v37, %v1399_v28  ;;  %v4371_v48 = vsel %vm1470_vm14, 1.0, %v8757_v57  ;;  %v1401_v36 = vpop.f32.mrf.mxu0  ;;  %v6858_v8 = vld [vmem:[#allocation2 + $0x20] sm:$0xff]  ;;  %v1741_v50 = vmul.f32 %v6518_v35, %v1566_v12 }
 0x175   : > { %v1654_v38 = vadd.f32 %v1638_v55, %v1586_v0  ;;  %v1793_v14 = vmul.f32 %v6530_v43, %v1618_v49  ;;  %4387 = vst.msk [vmem:[%s8715_s22 + $0xa8] sm:$0xff] %vm1513_vm6, %v4371_v48  ;;  %1552 = vst.msk [vmem:[#allocation2 + $0x61] sm:$0xff] %vm1513_vm6, %v4371_v48  ;;  %vm1475_vm15 = vcmp.gt.f32.partialorder %v1459_v39, 0.5  ;;  %v1444_v40 = vmul.f32 %v6421_v37, %v1410_v17  ;;  %v6874_v22 = vld [vmem:[#allocation2 + $0x21] sm:$0xff] }
 0x176   : > { %1524 = vst.msk [vmem:[%s8715_s22 + $0x50] sm:$0xff] %vm1513_vm6, %v1459_v39  ;;  %v1457_v0 = vadd.f32 %v1441_v16, %v6543_v51  ;;  %v1402_v55 = vadd.f32 %v6609_v34, %v1401_v36  ;;  %v4376_v12 = vsel %vm1475_vm15, 1.0, %v8757_v57  ;;  %v4833_v49 = vpop.f32.mrf.mxu0  ;;  %v1742_v7 = vmul.f32 %v6518_v35, %v6858_v8 }
 0x177   : > { %v1706_v63 = vadd.f32 %v1690_v46, %v1654_v38  ;;  %v1757_v28 = vadd.f32 %v1741_v50, %v6547_v53  ;;  %4392 = vst.msk [vmem:[%s8715_s22 + $0xd0] sm:$0xff] %vm1513_vm6, %v4376_v12  ;;  %1557 = vst.msk [vmem:[#allocation2 + $0xd1] sm:$0xff] %vm1513_vm6, %v4376_v12  ;;  %v1460_v51 = vadd.f32 %v1444_v40, %v6545_v52  ;;  %v6892_v53 = vld [vmem:[#allocation2 + $0x22] sm:$0xff] }
 0x178   : > { %vm1473_vm0 = vcmp.gt.f32.partialorder %v1457_v0, 0.5  ;;  %1522 = vst.msk [vmem:[%s8715_s22 + $0x40] sm:$0xff] %vm1513_vm6, %v1457_v0  ;;  %v1442_v38 = vmul.f32 %v6421_v37, %v1402_v55  ;;  %v1423_v46 = vadd.f32 %v4833_v49, %v6609_v34  ;;  %v1414_v16 = vpop.f32.mrf.mxu0  ;;  %v1794_v48 = vmul.f32 %v6530_v43, %v6874_v22 }
 0x179   : > { %v4374_v39 = vsel %vm1473_vm0, 1.0, %v8757_v57  ;;  %v1758_v17 = vadd.f32 %v1742_v7, %v1706_v63  ;;  %v1809_v36 = vadd.f32 %v1793_v14, %v1757_v28  ;;  %vm1476_vm1 = vcmp.gt.f32.partialorder %v1460_v51, 0.5  ;;  %1525 = vst.msk [vmem:[%s8715_s22 + $0x58] sm:$0xff] %vm1513_vm6, %v1460_v51 }
 0x17a   : > { %4390 = vst.msk [vmem:[%s8715_s22 + $0xc0] sm:$0xff] %vm1513_vm6, %v4374_v39  ;;  %1555 = vst.msk [vmem:[#allocation2 + $0xb1] sm:$0xff] %vm1513_vm6, %v4374_v39  ;;  %v1458_v52 = vadd.f32 %v1442_v38, %v6556_v59  ;;  %v1447_v50 = vmul.f32 %v6421_v37, %v1423_v46  ;;  %v1415_v0 = vadd.f32 %v6609_v34, %v1414_v16  ;;  %v4377_v14 = vsel %vm1476_vm1, 1.0, %v8757_v57  ;;  %v4834_v40 = vpop.f32.mrf.mxu0 }
 0x17b   : > { %v1810_v55 = vadd.f32 %v1794_v48, %v1758_v17  ;;  %v1845_v12 = vmul.f32 %v6535_v44, %v6814_v19  ;;  %v1846_v49 = vmul.f32 %v6535_v44, %v6892_v53  ;;  %4393 = vst.msk [vmem:[%s8715_s22 + $0xd8] sm:$0xff] %vm1513_vm6, %v4377_v14  ;;  %1558 = vst.msk [vmem:[#allocation2 + $0xe1] sm:$0xff] %vm1513_vm6, %v4377_v14 }
 0x17c   : > { %vm1474_vm2 = vcmp.gt.f32.partialorder %v1458_v52, 0.5  ;;  %1523 = vst.msk [vmem:[%s8715_s22 + $0x48] sm:$0xff] %vm1513_vm6, %v1458_v52  ;;  %v1463_v59 = vadd.f32 %v1447_v50, %v6558_v60  ;;  %v1445_v19 = vmul.f32 %v6421_v37, %v1415_v0  ;;  %v1426_v63 = vadd.f32 %v4834_v40, %v6609_v34  ;;  %v1417_v28 = vpop.f32.mrf.mxu0 }
 0x17d   : > { %v4375_v7 = vsel %vm1474_vm2, 1.0, %v8757_v57  ;;  %v1861_v51 = vadd.f32 %v1845_v12, %v1809_v36  ;;  %v1862_v38 = vadd.f32 %v1846_v49, %v1810_v55  ;;  %v1898_v46 = vmul.f32 %v6563_v61, %v6858_v8 }
 0x17e   : > { %4391 = vst.msk [vmem:[%s8715_s22 + $0xc8] sm:$0xff] %vm1513_vm6, %v4375_v7  ;;  %1556 = vst.msk [vmem:[#allocation2 + $0xc1] sm:$0xff] %vm1513_vm6, %v4375_v7  ;;  %vm1479_vm3 = vcmp.gt.f32.partialorder %v1463_v59, 0.5  ;;  %v1461_v60 = vadd.f32 %v1445_v19, %v6579_v6  ;;  %v1448_v39 = vmul.f32 %v6421_v37, %v1426_v63  ;;  %v1418_v16 = vadd.f32 %v6609_v34, %v1417_v28  ;;  %v1776_v63 = vld [vmem:[#allocation2 + $0x41] sm:$0xff] }
 0x17f   : > { %1528 = vst.msk [vmem:[%s8715_s22 + $0x70] sm:$0xff] %vm1513_vm6, %v1463_v59  ;;  %v4380_v17 = vsel %vm1479_vm3, 1.0, %v8757_v57  ;;  %v1914_v48 = vadd.f32 %v1898_v46, %v1861_v51  ;;  %v1915_v36 = vadd.f32 %v6818_v62, %v1862_v38  ;;  %v1950_v52 = vmul.f32 %v6568_v1, %v6874_v22  ;;  %v1828_v46 = vld [vmem:[#allocation2 + $0x42] sm:$0xff] }
 0x180   : > { %4396 = vst.msk [vmem:[%s8715_s22 + $0xf0] sm:$0xff] %vm1513_vm6, %v4380_v17  ;;  %1561 = vst.msk [vmem:[#allocation2 + $0x111] sm:$0xff] %vm1513_vm6, %v4380_v17  ;;  %vm1477_vm4 = vcmp.gt.f32.partialorder %v1461_v60, 0.5  ;;  %v1464_v6 = vadd.f32 %v1448_v39, %v6621_v4  ;;  %v1446_v34 = vmul.f32 %v6421_v37, %v1418_v16  ;;  %v2002_v62 = vmul.f32 %v6637_v9, %v6892_v53  ;;  %v6975_v4 = vld [vmem:[%s8797_s21] ss:$0 sm:$0xff]  ;;  %v1881_v17 = vld [vmem:[#allocation2 + $0x50] sm:$0xff] }
 0x181   : > { %1526 = vst.msk [vmem:[%s8715_s22 + $0x60] sm:$0xff] %vm1513_vm6, %v1461_v60  ;;  %v4378_v50 = vsel %vm1477_vm4, 1.0, %v8757_v57  ;;  %v1966_v0 = vadd.f32 %v1950_v52, %v1914_v48  ;;  %v1967_v14 = vadd.f32 %v6822_v32, %v1915_v36  ;;  %v1587_v40 = vmul.f32 %v6858_v8, %v6405_v26 }
 0x182   : > { %4394 = vst.msk [vmem:[%s8715_s22 + $0xe0] sm:$0xff] %vm1513_vm6, %v4378_v50  ;;  %1559 = vst.msk [vmem:[#allocation2 + $0xf1] sm:$0xff] %vm1513_vm6, %v4378_v50  ;;  %vm1480_vm5 = vcmp.gt.f32.partialorder %v1464_v6, 0.5  ;;  %v1462_v37 = vadd.f32 %v1446_v34, %v6623_v5  ;;  %v1588_v8 = vmul.f32 %v6790_v2, %v6405_v26  ;;  %v1639_v32 = vmul.f32 %v6874_v22, %v6410_v27  ;;  %v1724_v5 = vld [vmem:[#allocation2 + $0x40] sm:$0xff]  ;;  %v1933_v34 = vld [vmem:[#allocation2 + $0x51] sm:$0xff] }
 0x183   : > { %1529 = vst.msk [vmem:[%s8715_s22 + $0x78] sm:$0xff] %vm1513_vm6, %v1464_v6  ;;  %v4381_v55 = vsel %vm1480_vm5, 1.0, %v8757_v57  ;;  %v2018_v12 = vadd.f32 %v2002_v62, %v1966_v0  ;;  %v2019_v49 = vadd.f32 %v6826_v29, %v1967_v14  ;;  %v1640_v59 = vmul.f32 %v6792_v42, %v6410_v27  ;;  %v1985_v14 = vld [vmem:[#allocation2 + $0x52] sm:$0xff] }
 0x184   : > { %4397 = vst.msk [vmem:[%s8715_s22 + $0xf8] sm:$0xff] %vm1513_vm6, %v4381_v55  ;;  %1562 = vst.msk [vmem:[#allocation2 + $0x121] sm:$0xff] %vm1513_vm6, %v4381_v55  ;;  %vm1478_vm7 = vcmp.gt.f32.partialorder %v1462_v37, 0.5  ;;  %v1655_v22 = vadd.f32 %v1639_v32, %v1587_v40  ;;  %v1691_v29 = vmul.f32 %v6892_v53, %v6447_v47  ;;  %v1692_v19 = vmul.f32 %v6794_v15, %v6447_v47 }
 0x185   : > { %1527 = vst.msk [vmem:[%s8715_s22 + $0x68] sm:$0xff] %vm1513_vm6, %v1462_v37  ;;  %v4379_v7 = vsel %vm1478_vm7, 1.0, %v8757_v57  ;;  %v2127_v28 = vadd.f32 %v6975_v4, %v2018_v12  ;;  %v2128_v51 = vadd.f32 %v6975_v4, %v2019_v49  ;;  %v1656_v38 = vadd.f32 %v1640_v59, %v1588_v8 }
 0x186   : > { %4395 = vst.msk [vmem:[%s8715_s22 + $0xe8] sm:$0xff] %vm1513_vm6, %v4379_v7  ;;  %1560 = vst.msk [vmem:[#allocation2 + $0x101] sm:$0xff] %vm1513_vm6, %v4379_v7  ;;  %v1707_v53 = vadd.f32 %v1691_v29, %v1655_v22  ;;  %v1743_v60 = vmul.f32 %v6790_v2, %v6518_v35  ;;  %v1744_v39 = vmul.f32 %v6518_v35, %v1724_v5 }
 0x187   : > { %v1795_v16 = vmul.f32 %v6792_v42, %v6530_v43  ;;  %v2147_v48 = vmul.f32 %v6632_v21, %v2127_v28  ;;  %v2148_v36 = vmul.f32 %v6632_v21, %v2128_v51  ;;  %v1708_v52 = vadd.f32 %v1692_v19, %v1656_v38  ;;  %v1726_v19 = vld [vmem:[#allocation2 + $0x60] sm:$0xff] }
 0x188   : > { %v1796_v6 = vmul.f32 %v6530_v43, %v1776_v63  ;;  %v1759_v62 = vadd.f32 %v1743_v60, %v1707_v53  ;;  %v1847_v50 = vmul.f32 %v6794_v15, %v6535_v44  ;;  %v1848_v2 = vmul.f32 %v6535_v44, %v1828_v46  ;;  %v1778_v53 = vld [vmem:[#allocation2 + $0x61] sm:$0xff] }
 0x189   : > { %v1900_v0 = vmul.f32 %v6563_v61, %v1724_v5  ;;  %v2163_v42 = vadd.f32 %v2147_v48, %v6627_v18  ;;  %v2164_v40 = vadd.f32 %v2148_v36, %v6629_v3  ;;  %v1760_v37 = vadd.f32 %v1744_v39, %v1708_v52  ;;  %v1830_v48 = vld [vmem:[#allocation2 + $0x62] sm:$0xff] }
 0x18a   : > { %v1901_v8 = vmul.f32 %v6563_v61, %v1881_v17  ;;  %v1811_v32 = vadd.f32 %v1795_v16, %v1759_v62  ;;  %v1952_v55 = vmul.f32 %v6568_v1, %v1776_v63  ;;  %v1953_v12 = vmul.f32 %v6568_v1, %v1933_v34 }
 0x18b   : > { %v2004_v49 = vmul.f32 %v6637_v9, %v1828_v46  ;;  %vm2179_vm8 = vcmp.gt.f32.partialorder %v2163_v42, 0.5  ;;  %vm2180_vm9 = vcmp.gt.f32.partialorder %v2164_v40, 0.5  ;;  %4448 = vst.msk [vmem:[%s8715_s22 + $0x100] sm:$0xff] %vm1513_vm6, %v2163_v42  ;;  %4449 = vst.msk [vmem:[%s8715_s22 + $0x108] sm:$0xff] %vm1513_vm6, %v2164_v40  ;;  %v1812_v18 = vadd.f32 %v1796_v6, %v1760_v37  ;;  %v1935_v40 = vld [vmem:[#allocation2 + $0x71] sm:$0xff] }
 0x18c   : > { %v2005_v3 = vmul.f32 %v6637_v9, %v1985_v14  ;;  %v4432_v15 = vsel %vm2179_vm8, 1.0, %v8757_v57  ;;  %v4433_v59 = vsel %vm2180_vm9, 1.0, %v8757_v57  ;;  %v1863_v22 = vadd.f32 %v1847_v50, %v1811_v32  ;;  %v1883_v50 = vld [vmem:[#allocation2 + $0x70] sm:$0xff] }
 0x18d   : > { %v1589_v29 = vmul.f32 %v1724_v5, %v6405_v26  ;;  %4464 = vst.msk [vmem:[%s8715_s22 + $0x180] sm:$0xff] %vm1513_vm6, %v4432_v15  ;;  %4465 = vst.msk [vmem:[%s8715_s22 + $0x188] sm:$0xff] %vm1513_vm6, %v4433_v59  ;;  %v2259_v7 = vpack.c.bf16 %v4433_v59, %v4432_v15  ;;  %v1864_v28 = vadd.f32 %v1848_v2, %v1812_v18 }
 0x18e   : > { %v1590_v51 = vmul.f32 %v1881_v17, %v6405_v26  ;;  %v1641_v38 = vmul.f32 %v1776_v63, %v6410_v27  ;;  %v1916_v60 = vadd.f32 %v1900_v0, %v1863_v22  ;;  %v1642_v5 = vmul.f32 %v1933_v34, %v6410_v27 }
 0x18f   : > { %v1693_v39 = vmul.f32 %v1828_v46, %v6447_v47  ;;  %v1694_v16 = vmul.f32 %v1985_v14, %v6447_v47  ;;  %4843 = vmatprep.mubr.msk.bf16.mxu1 %vm1513_vm6, %v2259_v7  ;;  %v1917_v36 = vadd.f32 %v1901_v8, %v1864_v28  ;;  %v1745_v6 = vmul.f32 %v1881_v17, %v6518_v35  ;;  %v1987_v8 = vld [vmem:[#allocation2 + $0x72] sm:$0xff] }
 0x190   : > { %v1657_v52 = vadd.f32 %v1641_v38, %v1589_v29  ;;  %v1746_v62 = vmul.f32 %v6518_v35, %v1726_v19  ;;  %v1968_v2 = vadd.f32 %v1952_v55, %v1916_v60  ;;  %v1658_v63 = vadd.f32 %v1642_v5, %v1590_v51 }
 0x191   : > { %v1797_v0 = vmul.f32 %v1933_v34, %v6530_v43  ;;  %v1798_v42 = vmul.f32 %v6530_v43, %v1778_v53  ;;  %v1969_v46 = vadd.f32 %v1953_v12, %v1917_v36  ;;  %v1849_v32 = vmul.f32 %v1985_v14, %v6535_v44 }
 0x192   : > { %v1709_v37 = vadd.f32 %v1693_v39, %v1657_v52  ;;  %v1850_v18 = vmul.f32 %v6535_v44, %v1830_v48  ;;  %v2020_v15 = vadd.f32 %v2004_v49, %v1968_v2  ;;  %v1710_v59 = vadd.f32 %v1694_v16, %v1658_v63  ;;  %v1728_v52 = vld [vmem:[#allocation2 + $0x80] sm:$0xff] }
 0x193   : > { %v1902_v17 = vmul.f32 %v6563_v61, %v1726_v19  ;;  %v1903_v22 = vmul.f32 %v6563_v61, %v1883_v50  ;;  %v2021_v55 = vadd.f32 %v2005_v3, %v1969_v46  ;;  %v1954_v34 = vmul.f32 %v6568_v1, %v1778_v53 }
 0x194   : > { %v1761_v29 = vadd.f32 %v1745_v6, %v1709_v37  ;;  %v1955_v7 = vmul.f32 %v6568_v1, %v1935_v40  ;;  %v2129_v12 = vadd.f32 %v6975_v4, %v2020_v15  ;;  %v1762_v28 = vadd.f32 %v1746_v62, %v1710_v59 }
 0x195   : > { %v2006_v14 = vmul.f32 %v6637_v9, %v1830_v48  ;;  %v2007_v51 = vmul.f32 %v6637_v9, %v1987_v8  ;;  %v2130_v49 = vadd.f32 %v6975_v4, %v2021_v55  ;;  %v1591_v60 = vmul.f32 %v1726_v19, %v6405_v26 }
 0x196   : > { %v1813_v38 = vadd.f32 %v1797_v0, %v1761_v29  ;;  %v1592_v5 = vmul.f32 %v1883_v50, %v6405_v26  ;;  %v2149_v3 = vmul.f32 %v6632_v21, %v2129_v12  ;;  %v1814_v39 = vadd.f32 %v1798_v42, %v1762_v28 }
 0x197   : > { %v1643_v16 = vmul.f32 %v1778_v53, %v6410_v27  ;;  %v1644_v36 = vmul.f32 %v1935_v40, %v6410_v27  ;;  %v2150_v6 = vmul.f32 %v6632_v21, %v2130_v49  ;;  %v1695_v2 = vmul.f32 %v1830_v48, %v6447_v47 }
 0x198   : > { %v1865_v62 = vadd.f32 %v1849_v32, %v1813_v38  ;;  %v1696_v63 = vmul.f32 %v1987_v8, %v6447_v47  ;;  %v2165_v0 = vadd.f32 %v2149_v3, %v6639_v11  ;;  %v1866_v19 = vadd.f32 %v1850_v18, %v1814_v39  ;;  %v1780_v11 = vld [vmem:[#allocation2 + $0x81] sm:$0xff] }
 0x199   : > { %v1659_v46 = vadd.f32 %v1643_v16, %v1591_v60  ;;  %v1660_v37 = vadd.f32 %v1644_v36, %v1592_v5  ;;  %v2166_v15 = vadd.f32 %v2150_v6, %v6641_v13  ;;  %v1747_v53 = vmul.f32 %v1883_v50, %v6518_v35  ;;  %v1574_v60 = vld [vmem:[#allocation2 + $0xb0] sm:$0xff] }
 0x19a   : > { %v1918_v42 = vadd.f32 %v1902_v17, %v1865_v62  ;;  %v1748_v59 = vmul.f32 %v6518_v35, %v1728_v52  ;;  %vm2181_vm10 = vcmp.gt.f32.partialorder %v2165_v0, 0.5  ;;  %4450 = vst.msk [vmem:[%s8715_s22 + $0x110] sm:$0xff] %vm1513_vm6, %v2165_v0  ;;  %v1919_v48 = vadd.f32 %v1903_v22, %v1866_v19  ;;  %v1832_v17 = vld [vmem:[#allocation2 + $0x82] sm:$0xff]  ;;  %v1626_v5 = vld [vmem:[#allocation2 + $0xb1] sm:$0xff] }
 0x19b   : > { %v1711_v32 = vadd.f32 %v1695_v2, %v1659_v46  ;;  %v1712_v55 = vadd.f32 %v1696_v63, %v1660_v37  ;;  %vm2182_vm11 = vcmp.gt.f32.partialorder %v2166_v15, 0.5  ;;  %v4434_v18 = vsel %vm2181_vm10, 1.0, %v8757_v57  ;;  %4451 = vst.msk [vmem:[%s8715_s22 + $0x118] sm:$0xff] %vm1513_vm6, %v2166_v15  ;;  %v1678_v36 = vld [vmem:[#allocation2 + $0xb2] sm:$0xff]  ;;  %v1730_v63 = vld [vmem:[#allocation2 + $0xc0] sm:$0xff] }
 0x19c   : > { %v1970_v13 = vadd.f32 %v1954_v34, %v1918_v42  ;;  %v1799_v50 = vmul.f32 %v1935_v40, %v6530_v43  ;;  %v4435_v29 = vsel %vm2182_vm11, 1.0, %v8757_v57  ;;  %4466 = vst.msk [vmem:[%s8715_s22 + $0x190] sm:$0xff] %vm1513_vm6, %v4434_v18  ;;  %v1971_v22 = vadd.f32 %v1955_v7, %v1919_v48  ;;  %v1782_v42 = vld [vmem:[#allocation2 + $0xc1] sm:$0xff] }
 0x19d   : > { %v1763_v12 = vadd.f32 %v1747_v53, %v1711_v32  ;;  %v1764_v28 = vadd.f32 %v1748_v59, %v1712_v55  ;;  %4467 = vst.msk [vmem:[%s8715_s22 + $0x198] sm:$0xff] %vm1513_vm6, %v4435_v29  ;;  %v2260_v49 = vpack.c.bf16 %v4435_v29, %v4434_v18  ;;  %v1800_v40 = vmul.f32 %v6530_v43, %v1780_v11 }
 0x19e   : > { %v2022_v34 = vadd.f32 %v2006_v14, %v1970_v13  ;;  %v1851_v38 = vmul.f32 %v1987_v8, %v6535_v44  ;;  %v2023_v3 = vadd.f32 %v2007_v51, %v1971_v22  ;;  %v1852_v16 = vmul.f32 %v6535_v44, %v1832_v17 }
 0x19f   : > { %v1815_v39 = vadd.f32 %v1799_v50, %v1763_v12  ;;  %v1904_v7 = vmul.f32 %v6563_v61, %v1728_v52  ;;  %4844 = vmatmul.mubr.msk.bf16.vlgmr.msra.gmra.mxu1 %vm1513_vm6, %v2260_v49  ;;  %v1816_v62 = vadd.f32 %v1800_v40, %v1764_v28  ;;  %v1956_v14 = vmul.f32 %v6568_v1, %v1780_v11  ;;  %v1834_v12 = vld [vmem:[#allocation2 + $0xc2] sm:$0xff]  ;;  %v1939_v40 = vld [vmem:[#allocation2 + $0xd1] sm:$0xff] }
 0x1a0   : > { %v2131_v6 = vadd.f32 %v6975_v4, %v2022_v34  ;;  %v2008_v2 = vmul.f32 %v6637_v9, %v1832_v17  ;;  %v2132_v8 = vadd.f32 %v6975_v4, %v2023_v3  ;;  %v1594_v51 = vmul.f32 %v6405_v26, %v1574_v60  ;;  %v1887_v34 = vld [vmem:[#allocation2 + $0xd0] sm:$0xff] }
 0x1a1   : > { %v1867_v0 = vadd.f32 %v1851_v38, %v1815_v39  ;;  %v1646_v19 = vmul.f32 %v6410_v27, %v1626_v5  ;;  %v1868_v46 = vadd.f32 %v1852_v16, %v1816_v62  ;;  %v1698_v37 = vmul.f32 %v6447_v47, %v1678_v36 }
 0x1a2   : > { %v2151_v52 = vmul.f32 %v6632_v21, %v2131_v6  ;;  %v1749_v15 = vmul.f32 %v6518_v35, %v1574_v60  ;;  %v2152_v53 = vmul.f32 %v6632_v21, %v2132_v8  ;;  %v1750_v32 = vmul.f32 %v6518_v35, %v1730_v63 }
 0x1a3   : > { %v1920_v59 = vadd.f32 %v1904_v7, %v1867_v0  ;;  %v1662_v48 = vadd.f32 %v1646_v19, %v1594_v51  ;;  %v1921_v11 = vadd.f32 %v6663_v33, %v1868_v46  ;;  %v1801_v13 = vmul.f32 %v6530_v43, %v1626_v5 }
 0x1a4   : > { %v2167_v55 = vadd.f32 %v2151_v52, %v6649_v24  ;;  %v1765_v18 = vadd.f32 %v1749_v15, %v6671_v54  ;;  %v2168_v50 = vadd.f32 %v2152_v53, %v6651_v30  ;;  %v1802_v22 = vmul.f32 %v6530_v43, %v1782_v42 }
 0x1a5   : > { %v1972_v17 = vadd.f32 %v1956_v14, %v1920_v59  ;;  %v1714_v29 = vadd.f32 %v1698_v37, %v1662_v48  ;;  %v1973_v24 = vadd.f32 %v6666_v10, %v1921_v11  ;;  %v1853_v54 = vmul.f32 %v6535_v44, %v1678_v36  ;;  %v1991_v36 = vld [vmem:[#allocation2 + $0xd2] sm:$0xff] }
 0x1a6   : > { %vm2183_vm12 = vcmp.gt.f32.partialorder %v2167_v55, 0.5  ;;  %4452 = vst.msk [vmem:[%s8715_s22 + $0x120] sm:$0xff] %vm1513_vm6, %v2167_v55  ;;  %v1817_v33 = vadd.f32 %v1801_v13, %v1765_v18  ;;  %vm2184_vm13 = vcmp.gt.f32.partialorder %v2168_v50, 0.5  ;;  %4453 = vst.msk [vmem:[%s8715_s22 + $0x128] sm:$0xff] %vm1513_vm6, %v2168_v50  ;;  %v1854_v60 = vmul.f32 %v6535_v44, %v1834_v12  ;;  %v1732_v50 = vld [vmem:[#allocation2 + $0xe0] sm:$0xff] }
 0x1a7   : > { %v4436_v28 = vsel %vm2183_vm12, 1.0, %v8757_v57  ;;  %v2024_v30 = vadd.f32 %v2008_v2, %v1972_v17  ;;  %v1766_v49 = vadd.f32 %v1750_v32, %v1714_v29  ;;  %v4437_v38 = vsel %vm2184_vm13, 1.0, %v8757_v57  ;;  %v1784_v29 = vld [vmem:[#allocation2 + $0xe1] sm:$0xff] }
 0x1a8   : > { %4468 = vst.msk [vmem:[%s8715_s22 + $0x1a0] sm:$0xff] %vm1513_vm6, %v4436_v28  ;;  %v2025_v10 = vadd.f32 %v6669_v41, %v1973_v24  ;;  %v1869_v5 = vadd.f32 %v1853_v54, %v1817_v33  ;;  %4469 = vst.msk [vmem:[%s8715_s22 + $0x1a8] sm:$0xff] %vm1513_vm6, %v4437_v38  ;;  %v2261_v3 = vpack.c.bf16 %v4437_v38, %v4436_v28  ;;  %v1836_v54 = vld [vmem:[#allocation2 + $0xe2] sm:$0xff]  ;;  %v1889_v38 = vld [vmem:[#allocation2 + $0xf0] sm:$0xff] }
 0x1a9   : > { %v2133_v39 = vadd.f32 %v6975_v4, %v2024_v30  ;;  %v1818_v16 = vadd.f32 %v1802_v22, %v1766_v49  ;;  %v1906_v7 = vmul.f32 %v6563_v61, %v1730_v63  ;;  %v1907_v62 = vmul.f32 %v6563_v61, %v1887_v34 }
 0x1aa   : > { %v2134_v6 = vadd.f32 %v6975_v4, %v2025_v10  ;;  %v1958_v41 = vmul.f32 %v6568_v1, %v1782_v42  ;;  %v1959_v14 = vmul.f32 %v6568_v1, %v1939_v40  ;;  %4847 = vmatprep.mubr.msk.bf16.mxu1 %vm1513_vm6, %v2261_v3  ;;  %v2010_v51 = vmul.f32 %v6637_v9, %v1834_v12 }
 0x1ab   : > { %v2153_v2 = vmul.f32 %v6632_v21, %v2133_v39  ;;  %v1870_v8 = vadd.f32 %v1854_v60, %v1818_v16  ;;  %v1922_v0 = vadd.f32 %v1906_v7, %v1869_v5  ;;  %v2011_v52 = vmul.f32 %v6637_v9, %v1991_v36 }
 0x1ac   : > { %v2154_v19 = vmul.f32 %v6632_v21, %v2134_v6  ;;  %v1595_v46 = vmul.f32 %v1730_v63, %v6405_v26  ;;  %v1596_v37 = vmul.f32 %v1887_v34, %v6405_v26  ;;  %v1647_v48 = vmul.f32 %v1782_v42, %v6410_v27 }
 0x1ad   : > { %v2169_v15 = vadd.f32 %v2153_v2, %v6686_v25  ;;  %v1923_v53 = vadd.f32 %v1907_v62, %v1870_v8  ;;  %v1974_v59 = vadd.f32 %v1958_v41, %v1922_v0  ;;  %v1648_v55 = vmul.f32 %v1939_v40, %v6410_v27  ;;  %v1941_v2 = vld [vmem:[#allocation2 + $0xf1] sm:$0xff] }
 0x1ae   : > { %v2170_v32 = vadd.f32 %v2154_v19, %v6738_v23  ;;  %v1699_v11 = vmul.f32 %v1834_v12, %v6447_v47  ;;  %v1700_v18 = vmul.f32 %v1991_v36, %v6447_v47  ;;  %v1663_v13 = vadd.f32 %v1647_v48, %v1595_v46  ;;  %v1993_v19 = vld [vmem:[#allocation2 + $0xf2] sm:$0xff] }
 0x1af   : > { %vm2185_vm14 = vcmp.gt.f32.partialorder %v2169_v15, 0.5  ;;  %4454 = vst.msk [vmem:[%s8715_s22 + $0x130] sm:$0xff] %vm1513_vm6, %v2169_v15  ;;  %v1975_v63 = vadd.f32 %v1959_v14, %v1923_v53  ;;  %v2026_v25 = vadd.f32 %v2010_v51, %v1974_v59  ;;  %v1664_v23 = vadd.f32 %v1648_v55, %v1596_v37 }
 0x1b0   : > { %vm2186_vm15 = vcmp.gt.f32.partialorder %v2170_v32, 0.5  ;;  %v4438_v42 = vsel %vm2185_vm14, 1.0, %v8757_v57  ;;  %4455 = vst.msk [vmem:[%s8715_s22 + $0x138] sm:$0xff] %vm1513_vm6, %v2170_v32  ;;  %v1751_v17 = vmul.f32 %v1887_v34, %v6518_v35  ;;  %v1715_v33 = vadd.f32 %v1699_v11, %v1663_v13  ;;  %v1734_v32 = vld [vmem:[#allocation2 + $0x100] sm:$0xff] }
 0x1b1   : > { %v4439_v22 = vsel %vm2186_vm15, 1.0, %v8757_v57  ;;  %4470 = vst.msk [vmem:[%s8715_s22 + $0x1b0] sm:$0xff] %vm1513_vm6, %v4438_v42  ;;  %v2027_v12 = vadd.f32 %v2011_v52, %v1975_v63  ;;  %v2135_v24 = vadd.f32 %v6975_v4, %v2026_v25  ;;  %v1716_v30 = vadd.f32 %v1700_v18, %v1664_v23  ;;  %v1786_v25 = vld [vmem:[#allocation2 + $0x101] sm:$0xff] }
 0x1b2   : > { %4471 = vst.msk [vmem:[%s8715_s22 + $0x1b8] sm:$0xff] %vm1513_vm6, %v4439_v22  ;;  %v2262_v28 = vpack.c.bf16 %v4439_v22, %v4438_v42  ;;  %v1752_v49 = vmul.f32 %v6518_v35, %v1732_v50  ;;  %v1803_v34 = vmul.f32 %v1939_v40, %v6530_v43  ;;  %v1767_v5 = vadd.f32 %v1751_v17, %v1715_v33  ;;  %v1838_v17 = vld [vmem:[#allocation2 + $0x102] sm:$0xff] }
 0x1b3   : > { %v2136_v10 = vadd.f32 %v6975_v4, %v2027_v12  ;;  %v2155_v60 = vmul.f32 %v6632_v21, %v2135_v24  ;;  %v1804_v3 = vmul.f32 %v6530_v43, %v1784_v29  ;;  %v1855_v16 = vmul.f32 %v1991_v36, %v6535_v44 }
 0x1b4   : > { %4848 = vmatmul.mubr.msk.bf16.gmra.mxu1 %vm1513_vm6, %v2262_v28  ;;  %v1768_v39 = vadd.f32 %v1752_v49, %v1716_v30  ;;  %v1856_v7 = vmul.f32 %v6535_v44, %v1836_v54  ;;  %v1908_v6 = vmul.f32 %v6563_v61, %v1732_v50  ;;  %v1819_v41 = vadd.f32 %v1803_v34, %v1767_v5 }
 0x1b5   : > { %v2156_v62 = vmul.f32 %v6632_v21, %v2136_v10  ;;  %v2171_v40 = vadd.f32 %v2155_v60, %v6740_v20  ;;  %v1909_v14 = vmul.f32 %v6563_v61, %v1889_v38  ;;  %v1960_v0 = vmul.f32 %v6568_v1, %v1784_v29  ;;  %v1891_v60 = vld [vmem:[#allocation2 + $0x110] sm:$0xff] }
 0x1b6   : > { %v1820_v8 = vadd.f32 %v1804_v3, %v1768_v39  ;;  %v1961_v51 = vmul.f32 %v6568_v1, %v1941_v2  ;;  %v2012_v36 = vmul.f32 %v6637_v9, %v1836_v54  ;;  %v1871_v20 = vadd.f32 %v1855_v16, %v1819_v41  ;;  %v1995_v41 = vld [vmem:[#allocation2 + $0x112] sm:$0xff] }
 0x1b7   : > { %v2172_v52 = vadd.f32 %v2156_v62, %v6742_v31  ;;  %vm2187_vm0 = vcmp.gt.f32.partialorder %v2171_v40, 0.5  ;;  %4456 = vst.msk [vmem:[%s8715_s22 + $0x140] sm:$0xff] %vm1513_vm6, %v2171_v40  ;;  %v2013_v46 = vmul.f32 %v6637_v9, %v1993_v19  ;;  %v1597_v53 = vmul.f32 %v1732_v50, %v6405_v26 }
 0x1b8   : > { %v4440_v37 = vsel %vm2187_vm0, 1.0, %v8757_v57  ;;  %v1872_v15 = vadd.f32 %v1856_v7, %v1820_v8  ;;  %v1598_v59 = vmul.f32 %v1889_v38, %v6405_v26  ;;  %v1924_v31 = vadd.f32 %v1908_v6, %v1871_v20  ;;  %v1943_v7 = vld [vmem:[#allocation2 + $0x111] sm:$0xff] }
 0x1b9   : > { %vm2188_vm1 = vcmp.gt.f32.partialorder %v2172_v52, 0.5  ;;  %4457 = vst.msk [vmem:[%s8715_s22 + $0x148] sm:$0xff] %vm1513_vm6, %v2172_v52  ;;  %4472 = vst.msk [vmem:[%s8715_s22 + $0x1c0] sm:$0xff] %vm1513_vm6, %v4440_v37  ;;  %v1649_v9 = vmul.f32 %v1784_v29, %v6410_v27  ;;  %v1650_v48 = vmul.f32 %v1941_v2, %v6410_v27  ;;  %v1701_v18 = vmul.f32 %v1836_v54, %v6447_v47 }
 0x1ba   : > { %v4441_v55 = vsel %vm2188_vm1, 1.0, %v8757_v57  ;;  %v1925_v11 = vadd.f32 %v1909_v14, %v1872_v15  ;;  %v1702_v63 = vmul.f32 %v1993_v19, %v6447_v47  ;;  %v1976_v50 = vadd.f32 %v1960_v0, %v1924_v31  ;;  %v7235_v14 = vld [vmem:[%s8796_s9 + $0x8] ss:$0 sm:$0xff]  ;;  %s8809_s9 = smov %s8808_s7 }
 0x1bb   : > { %4473 = vst.msk [vmem:[%s8715_s22 + $0x1c8] sm:$0xff] %vm1513_vm6, %v4441_v55  ;;  %v2263_v13 = vpack.c.bf16 %v4441_v55, %v4440_v37  ;;  %v1665_v42 = vadd.f32 %v1649_v9, %v1597_v53  ;;  %v1666_v23 = vadd.f32 %v1650_v48, %v1598_v59  ;;  %v1753_v22 = vmul.f32 %v1889_v38, %v6518_v35 }
 0x1bc   : > { %v1977_v29 = vadd.f32 %v1961_v51, %v1925_v11  ;;  %v1754_v12 = vmul.f32 %v6518_v35, %v1734_v32  ;;  %v1805_v24 = vmul.f32 %v1941_v2, %v6530_v43  ;;  %v2028_v33 = vadd.f32 %v2012_v36, %v1976_v50  ;;  %v1736_v11 = vld [vmem:[#allocation2 + $0x120] sm:$0xff] }
 0x1bd   : > { %4851 = vmatprep.mubr.msk.bf16.mxu1 %vm1513_vm6, %v2263_v13  ;;  %v1717_v54 = vadd.f32 %v1701_v18, %v1665_v42  ;;  %v1718_v28 = vadd.f32 %v1702_v63, %v1666_v23  ;;  %v1806_v30 = vmul.f32 %v6530_v43, %v1786_v25  ;;  %v1857_v34 = vmul.f32 %v1993_v19, %v6535_v44  ;;  %v1788_v18 = vld [vmem:[#allocation2 + $0x121] sm:$0xff] }
 0x1be   : > { %v2029_v49 = vadd.f32 %v2013_v46, %v1977_v29  ;;  %v1858_v10 = vmul.f32 %v6535_v44, %v1838_v17  ;;  %v1910_v5 = vmul.f32 %v6563_v61, %v1734_v32  ;;  %v2137_v38 = vadd.f32 %v6975_v4, %v2028_v33 }
 0x1bf   : > { %v1769_v3 = vadd.f32 %v1753_v22, %v1717_v54  ;;  %v1770_v39 = vadd.f32 %v1754_v12, %v1718_v28  ;;  %v1911_v16 = vmul.f32 %v6563_v61, %v1891_v60  ;;  %v1962_v62 = vmul.f32 %v6568_v1, %v1786_v25  ;;  %v1893_v22 = vld [vmem:[#allocation2 + $0x130] sm:$0xff]  ;;  %v1840_v54 = vld [vmem:[#allocation2 + $0x122] sm:$0xff] }
 0x1c0   : > { %v2138_v6 = vadd.f32 %v6975_v4, %v2029_v49  ;;  %v1963_v40 = vmul.f32 %v6568_v1, %v1943_v7  ;;  %v2014_v2 = vmul.f32 %v7235_v14, %v1838_v17  ;;  %v2157_v8 = vmul.f32 %v6632_v21, %v2137_v38  ;;  %v8802_v28 = vld [vmem:[#allocation17_spill] sm:$0xff] }
 0x1c1   : > { %v1821_v0 = vadd.f32 %v1805_v24, %v1769_v3  ;;  %v1822_v51 = vadd.f32 %v1806_v30, %v1770_v39  ;;  %v2015_v19 = vmul.f32 %v7235_v14, %v1995_v41  ;;  %v1599_v52 = vmul.f32 %v1734_v32, %v6405_v26 }
 0x1c2   : > { %v2158_v36 = vmul.f32 %v6632_v21, %v2138_v6  ;;  %v1600_v20 = vmul.f32 %v1891_v60, %v6405_v26  ;;  %v1651_v46 = vmul.f32 %v1786_v25, %v6410_v27  ;;  %v2173_v37 = vadd.f32 %v2157_v8, %v6770_v56 }
 0x1c3   : > { %v1873_v15 = vadd.f32 %v1857_v34, %v1821_v0  ;;  %v1874_v53 = vadd.f32 %v1858_v10, %v1822_v51  ;;  %v1652_v59 = vmul.f32 %v1943_v7, %v6410_v27  ;;  %v1703_v48 = vmul.f32 %v1838_v17, %v6447_v47  ;;  %v4429_v51 = vld [vmem:[%s8715_s22 + $0x1f0] sm:$0xff] }
 0x1c4   : > { %v2174_v31 = vadd.f32 %v2158_v36, %v6772_v58  ;;  %v1667_v9 = vadd.f32 %v1651_v46, %v1599_v52  ;;  %v1704_v55 = vmul.f32 %v1995_v41, %v6447_v47  ;;  %vm2189_vm2 = vcmp.gt.f32.partialorder %v2173_v37, 0.5  ;;  %4458 = vst.msk [vmem:[%s8715_s22 + $0x150] sm:$0xff] %vm1513_vm6, %v2173_v37 }
 0x1c5   : > { %v1926_v26 = vadd.f32 %v1910_v5, %v1873_v15  ;;  %v1927_v32 = vadd.f32 %v1911_v16, %v1874_v53  ;;  %v1668_v56 = vadd.f32 %v1652_v59, %v1600_v20  ;;  %v4442_v27 = vsel %vm2189_vm2, 1.0, %v8757_v57  ;;  %v8805_v5 = vld [vmem:[#allocation18_spill] sm:$0xff]  ;;  %v4430_v20 = vld [vmem:[%s8715_s22 + $0x1f8] sm:$0xff] }
 0x1c6   : > { %vm2190_vm3 = vcmp.gt.f32.partialorder %v2174_v31, 0.5  ;;  %4459 = vst.msk [vmem:[%s8715_s22 + $0x158] sm:$0xff] %vm1513_vm6, %v2174_v31  ;;  %v1719_v58 = vadd.f32 %v1703_v48, %v1667_v9  ;;  %v1755_v47 = vmul.f32 %v1891_v60, %v6518_v35  ;;  %4474 = vst.msk [vmem:[%s8715_s22 + $0x1d0] sm:$0xff] %vm1513_vm6, %v4442_v27  ;;  %v1756_v23 = vmul.f32 %v6518_v35, %v1736_v11  ;;  %v8804_v35 = vld [vmem:[#allocation19_spill] sm:$0xff]  ;;  %v8807_v53 = vld [vmem:[#allocation16_spill] sm:$0xff] }
 0x1c7   : > { %v4443_v63 = vsel %vm2190_vm3, 1.0, %v8757_v57  ;;  %v1978_v25 = vadd.f32 %v1962_v62, %v1926_v26  ;;  %v1979_v13 = vadd.f32 %v1963_v40, %v1927_v32  ;;  %v1720_v50 = vadd.f32 %v1704_v55, %v1668_v56 }
 0x1c8   : > { %4475 = vst.msk [vmem:[%s8715_s22 + $0x1d8] sm:$0xff] %vm1513_vm6, %v4443_v63  ;;  %v2264_v42 = vpack.c.bf16 %v4443_v63, %v4442_v27  ;;  %v1771_v17 = vadd.f32 %v1755_v47, %v1719_v58  ;;  %v1807_v29 = vmul.f32 %v1943_v7, %v6530_v43  ;;  %v1808_v33 = vmul.f32 %v6530_v43, %v1788_v18  ;;  %v1945_v7 = vld [vmem:[#allocation2 + $0x131] sm:$0xff] }
 0x1c9   : > { %v2030_v12 = vadd.f32 %v2014_v2, %v1978_v25  ;;  %v2031_v24 = vadd.f32 %v2015_v19, %v1979_v13  ;;  %v8803_v30 = vsub.f32 1.0, %v8802_v28  ;;  %v1772_v34 = vadd.f32 %v1756_v23, %v1720_v50  ;;  %v1997_v2 = vld [vmem:[#allocation2 + $0x132] sm:$0xff]  ;;  %v4480_v28 = vld [vmem:[%s8715_s22 + $0x200] sm:$0xff] }
 0x1ca   : > { %4852 = vmatmul.mubr.msk.bf16.gmra.mxu1 %vm1513_vm6, %v2264_v42  ;;  %v1823_v10 = vadd.f32 %v1807_v29, %v1771_v17  ;;  %v1859_v60 = vmul.f32 %v1995_v41, %v6535_v44  ;;  %v8806_v38 = vsub.f32 1.0, %v8805_v5  ;;  %v1913_v43 = vmul.f32 %v6563_v61, %v1893_v22  ;;  %v4413_v41 = vld [vmem:[%s8715_s22 + $0x170] sm:$0xff]  ;;  %v2310_v29 = vld [vmem:[%s8808_s7 + $0x1] sm:$0x1]  ;;  %s4234_s7 = sshll.u32 %s5428_s29, 4  ;;  %s4235_s7 = int_to_ptr.vmem [resolvable:$true] %s4234_s7 }
 0x1cb   : > { %v2118_v49 = vmul.f32 %v8803_v30, %v6775_v45  ;;  %v2139_v39 = vadd.f32 %v6975_v4, %v2030_v12  ;;  %v2140_v16 = vadd.f32 %v6975_v4, %v2031_v24  ;;  %v1824_v6 = vadd.f32 %v1808_v33, %v1772_v34  ;;  %v8810_v22 = vld [vmem:[#allocation15_spill] sm:$0xff]  ;;  %v4496_v30 = vld [vmem:[%s8715_s22 + $0x280] sm:$0xff]  ;;  %s5167_s18 = scalar_lea.vmem %s4235_s7, 32 }
 0x1cc   : > { %v2119_v3 = vmul.f32 %v8806_v38, %v8804_v35  ;;  %v1860_v62 = vmul.f32 %v6535_v44, %v1840_v54  ;;  %v1875_v40 = vadd.f32 %v1859_v60, %v1823_v10  ;;  %v1912_v45 = vmul.f32 %v6563_v61, %v1736_v11  ;;  %v4414_v61 = vld [vmem:[%s8715_s22 + $0x178] sm:$0xff]  ;;  %v4482_v24 = vld [vmem:[%s8715_s22 + $0x210] sm:$0xff]  ;;  %v7368_v10 = vld [vmem:[%s8809_s9] ss:$0 sm:$0xff]  ;;  %p5168_p12 = scmp.ne.s32.totalorder %s4235_s7, %s5167_s18  ;;  %s5234_s9 = smov [#allocation5]  }
 0x1cd   : > { %v2159_v8 = vmul.f32 %v6632_v21, %v2139_v39  ;;  %v2160_v0 = vmul.f32 %v6632_v21, %v2140_v16  ;;  %v1964_v44 = vmul.f32 %v6568_v1, %v1788_v18  ;;  %v1965_v52 = vmul.f32 %v6568_v1, %v1945_v7  ;;  %v4498_v33 = vld [vmem:[%s8715_s22 + $0x290] sm:$0xff]  ;;  %v4483_v60 = vld [vmem:[%s8715_s22 + $0x218] sm:$0xff]  ;;  %v4481_v39 = vld [vmem:[%s8715_s22 + $0x208] sm:$0xff] }
 0x1ce   : > { %v1876_v19 = vadd.f32 %v1860_v62, %v1824_v6  ;;  %v1928_v36 = vadd.f32 %v1912_v45, %v1875_v40  ;;  %v2017_v15 = vmul.f32 %v7235_v14, %v1997_v2  ;;  %v2088_v59 = vmul.f32 %v4413_v41, %v8807_v53  ;;  %v4499_v35 = vld [vmem:[%s8715_s22 + $0x298] sm:$0xff]  ;;  %v4497_v16 = vld [vmem:[%s8715_s22 + $0x288] sm:$0xff]  ;;  %p5169_p13 = pnand %p5168_p12, %p5408_p5 }
 0x1cf   : > { %v2175_v46 = vadd.f32 %v2159_v8, %v2118_v49  ;;  %v2176_v37 = vadd.f32 %v2160_v0, %v2119_v3  ;;  %v2016_v48 = vmul.f32 %v7235_v14, %v1840_v54  ;;  %v2104_v55 = vsub.f32 1.0, %v4429_v51 }
 0x1d0   : > { %v1929_v31 = vadd.f32 %v1913_v43, %v1876_v19  ;;  %v1980_v9 = vadd.f32 %v1964_v44, %v1928_v36  ;;  %v2089_v1 = vmul.f32 %v4414_v61, %v8807_v53  ;;  %v2105_v26 = vsub.f32 1.0, %v4430_v20  ;;  %p5170_p0 = pneg %p5169_p13 }
 0x1d1   : > { %vm2191_vm4 = vcmp.gt.f32.partialorder %v2175_v46, 0.5  ;;  %vm2192_vm5 = vcmp.gt.f32.partialorder %v2176_v37, 0.5  ;;  %4460 = vst.msk [vmem:[%s8715_s22 + $0x160] sm:$0xff] %vm1513_vm6, %v2175_v46  ;;  %4461 = vst.msk [vmem:[%s8715_s22 + $0x168] sm:$0xff] %vm1513_vm6, %v2176_v37  ;;  %v2120_v47 = vmul.f32 %v2104_v55, %v2088_v59  ;;  %v7350_v12 = vrot.slane %v2310_v29, %v8810_v22 }
 0x1d2   : > { %v4444_v32 = vsel %vm2191_vm4, 1.0, %v8757_v57  ;;  %v4445_v14 = vsel %vm2192_vm5, 1.0, %v8757_v57  ;;  %v1981_v56 = vadd.f32 %v1965_v52, %v1929_v31  ;;  %v2032_v11 = vadd.f32 %v2016_v48, %v1980_v9 }
 0x1d3   : > { %4476 = vst.msk [vmem:[%s8715_s22 + $0x1e0] sm:$0xff] %vm1513_vm6, %v4444_v32  ;;  %4477 = vst.msk [vmem:[%s8715_s22 + $0x1e8] sm:$0xff] %vm1513_vm6, %v4445_v14  ;;  %v2265_v27 = vpack.c.bf16 %v4445_v14, %v4444_v32  ;;  %v2121_v63 = vmul.f32 %v2105_v26, %v2089_v1  ;;  %v2363_v54 = vsub.f32 1.0, %v2310_v29  ;;  %v2317_v49 = vmul.f32 %v4482_v24, %v7350_v12  ;;  %v4486_v26 = vld [vmem:[%s8715_s22 + $0x230] sm:$0xff] }
 0x1d4   : > { %v2033_v58 = vadd.f32 %v2017_v15, %v1981_v56  ;;  %v2141_v18 = vadd.f32 %v6975_v4, %v2032_v11  ;;  %v2333_v34 = vsub.f32 1.0, %v4498_v33  ;;  %v2315_v38 = vmul.f32 %v4480_v28, %v7350_v12  ;;  %v4502_v32 = vld [vmem:[%s8715_s22 + $0x2b0] sm:$0xff]  ;;  %v4484_v56 = vld [vmem:[%s8715_s22 + $0x220] sm:$0xff] }
 0x1d5   : > { %4855 = vmatprep.mubr.msk.bf16.mxu1 %vm1513_vm6, %v2265_v27  ;;  %v7377_v5 = vrot.slane %v2363_v54, %v8810_v22  ;;  %v2331_v3 = vsub.f32 1.0, %v4496_v30  ;;  %v2318_v62 = vmul.f32 %v4483_v60, %v7350_v12  ;;  %v2334_v40 = vsub.f32 1.0, %v4499_v35  ;;  %v4500_v11 = vld [vmem:[%s8715_s22 + $0x2a0] sm:$0xff] }
 0x1d6   : > { %v2142_v25 = vadd.f32 %v6975_v4, %v2033_v58  ;;  %v2161_v13 = vmul.f32 %v6632_v21, %v2141_v18  ;;  %v2349_v7 = vmul.f32 %v2333_v34, %v2317_v49  ;;  %v2316_v2 = vmul.f32 %v4481_v39, %v7350_v12  ;;  %v4503_v18 = vld [vmem:[%s8715_s22 + $0x2b8] sm:$0xff] }
 0x1d7   : > { %v2332_v41 = vsub.f32 1.0, %v4497_v16  ;;  %v2347_v0 = vmul.f32 %v2331_v3, %v2315_v38  ;;  %v2350_v52 = vmul.f32 %v2334_v40, %v2318_v62  ;;  %v2321_v27 = vmul.f32 %v4486_v26, %v7350_v12 }
 0x1d8   : > { %v2162_v50 = vmul.f32 %v6632_v21, %v2142_v25  ;;  %v2177_v42 = vadd.f32 %v2161_v13, %v2120_v47  ;;  %v2337_v58 = vsub.f32 1.0, %v4502_v32  ;;  %v4487_v47 = vld [vmem:[%s8715_s22 + $0x238] sm:$0xff]  ;;  %v2335_v25 = vsub.f32 1.0, %v4500_v11  ;;  %v4485_v13 = vld [vmem:[%s8715_s22 + $0x228] sm:$0xff] }
 0x1d9   : > { %v2348_v20 = vmul.f32 %v2332_v41, %v2316_v2  ;;  %v2320_v24 = vmul.f32 %v4485_v13, %v7350_v12 }
 0x1da   : > { %v2178_v23 = vadd.f32 %v2162_v50, %v2121_v63  ;;  %vm2193_vm7 = vcmp.gt.f32.partialorder %v2177_v42, 0.5  ;;  %4462 = vst.msk [vmem:[%s8715_s22 + $0x170] sm:$0xff] %vm1513_vm6, %v2177_v42  ;;  %v2319_v63 = vmul.f32 %v4484_v56, %v7350_v12  ;;  %v4501_v50 = vld [vmem:[%s8715_s22 + $0x2a8] sm:$0xff] }
 0x1db   : > { %v4446_v17 = vsel %vm2193_vm7, 1.0, %v8757_v57  ;;  %v2336_v33 = vsub.f32 1.0, %v4501_v50 }
 0x1dc   : > { %vm2194_vm8 = vcmp.gt.f32.partialorder %v2178_v23, 0.5  ;;  %4463 = vst.msk [vmem:[%s8715_s22 + $0x178] sm:$0xff] %vm1513_vm6, %v2178_v23  ;;  %4478 = vst.msk [vmem:[%s8715_s22 + $0x1f0] sm:$0xff] %vm1513_vm6, %v4446_v17  ;;  %v2353_v23 = vmul.f32 %v2337_v58, %v2321_v27  ;;  %v2351_v28 = vmul.f32 %v2335_v25, %v2319_v63 }
 0x1dd   : > { %v4447_v21 = vsel %vm2194_vm8, 1.0, %v8757_v57  ;;  %v2352_v3 = vmul.f32 %v2336_v33, %v2320_v24 }
 0x1de   : > { %4479 = vst.msk [vmem:[%s8715_s22 + $0x1f8] sm:$0xff] %vm1513_vm6, %v4447_v21  ;;  %v2266_v4 = vpack.c.bf16 %v4447_v21, %v4446_v17  ;;  %v2322_v21 = vmul.f32 %v4487_v47, %v7350_v12 }
 0x1e0   : > { %4856 = vmatmul.mubr.msk.bf16.gmra.mxu1 %vm1513_vm6, %v2266_v4  ;;  %v2338_v4 = vsub.f32 1.0, %v4503_v18 }
 0x1e2   : > { %v2354_v35 = vmul.f32 %v2338_v4, %v2322_v21 }
 0x25f   : > { %v4845_v43 = vpop.f32.mrf.mxu1 }
 0x260   : > { %v2459_v6 = vadd.f32 %v4845_v43, %v7368_v10 }
 0x261   : > { %v2450_v45 = vpop.f32.mrf.mxu1 }
 0x262   : > { %v2519_v8 = vmul.f32 %v7377_v5, %v2459_v6  ;;  %v2451_v51 = vadd.f32 %v7368_v10, %v2450_v45 }
 0x263   : > { %v4846_v19 = vpop.f32.mrf.mxu1 }
 0x264   : > { %v2535_v36 = vadd.f32 %v2519_v8, %v2349_v7  ;;  %v2517_v44 = vmul.f32 %v7377_v5, %v2451_v51  ;;  %v2462_v61 = vadd.f32 %v4846_v19, %v7368_v10  ;;  %v4506_v51 = vld [vmem:[%s8715_s22 + $0x2d0] sm:$0xff]  ;;  %v4488_v19 = vld [vmem:[%s8715_s22 + $0x240] sm:$0xff] }
 0x265   : > { %v2453_v46 = vpop.f32.mrf.mxu1 }
 0x266   : > { %vm2551_vm9 = vcmp.gt.f32.partialorder %v2535_v36, 0.5  ;;  %4543 = vst.msk [vmem:[%s8715_s22 + $0x210] sm:$0xff] %vm1513_vm6, %v2535_v36  ;;  %v2533_v37 = vadd.f32 %v2517_v44, %v2347_v0  ;;  %v2520_v15 = vmul.f32 %v7377_v5, %v2462_v61  ;;  %v2454_v53 = vadd.f32 %v7368_v10, %v2453_v46  ;;  %v4490_v0 = vld [vmem:[%s8715_s22 + $0x250] sm:$0xff]  ;;  %v4504_v36 = vld [vmem:[%s8715_s22 + $0x2c0] sm:$0xff]  ;;  %v4491_v61 = vld [vmem:[%s8715_s22 + $0x258] sm:$0xff] }
 0x267   : > { %v7400_v59 = vsel %vm2551_vm9, 1.0, %v8757_v57  ;;  %v2325_v44 = vmul.f32 %v4490_v0, %v7350_v12  ;;  %v2323_v46 = vmul.f32 %v4488_v19, %v7350_v12  ;;  %v2326_v26 = vmul.f32 %v4491_v61, %v7350_v12 }
 0x268   : > { %4541 = vst.msk [vmem:[%s8715_s22 + $0x200] sm:$0xff] %vm1513_vm6, %v2533_v37  ;;  %v2536_v31 = vadd.f32 %v2520_v15, %v2350_v52  ;;  %v2518_v9 = vmul.f32 %v7377_v5, %v2454_v53  ;;  %vm2549_vm10 = vcmp.gt.f32.partialorder %v2533_v37, 0.5  ;;  %4559 = vst.msk [vmem:[%s8715_s22 + $0x290] sm:$0xff] %vm1513_vm6, %v7400_v59  ;;  %v2341_v52 = vsub.f32 1.0, %v4506_v51  ;;  %v4489_v15 = vld [vmem:[%s8715_s22 + $0x248] sm:$0xff] }
 0x269   : > { %2632 = vst.msk [vmem:[#allocation3 + $0x31] sm:$0xff] %vm1513_vm6, %v7400_v59  ;;  %v7415_v48 = vsel %vm2549_vm10, 1.0, %v8757_v57  ;;  %v2339_v37 = vsub.f32 1.0, %v4504_v36  ;;  %v4505_v53 = vld [vmem:[%s8715_s22 + $0x2c8] sm:$0xff]  ;;  %v2324_v11 = vmul.f32 %v4489_v15, %v7350_v12  ;;  %vm2710_vm10 = vcmask 1048064  }
 0x26a   : > { %4544 = vst.msk [vmem:[%s8715_s22 + $0x218] sm:$0xff] %vm1513_vm6, %v2536_v31  ;;  %v2534_v55 = vadd.f32 %v2518_v9, %v2348_v20  ;;  %4557 = vst.msk [vmem:[%s8715_s22 + $0x280] sm:$0xff] %vm1513_vm6, %v7415_v48  ;;  %vm2552_vm11 = vcmp.gt.f32.partialorder %v2536_v31, 0.5  ;;  %v4507_v20 = vld [vmem:[%s8715_s22 + $0x2d8] sm:$0xff]  ;;  %v2357_v9 = vmul.f32 %v2341_v52, %v2325_v44  ;;  %v2340_v27 = vsub.f32 1.0, %v4505_v53 }
 0x26b   : > { %2630 = vst.msk [vmem:[#allocation3 + $0x11] sm:$0xff] %vm1513_vm6, %v7415_v48  ;;  %v7429_v1 = vsel %vm2552_vm11, 1.0, %v8757_v57  ;;  %v2342_v32 = vsub.f32 1.0, %v4507_v20  ;;  %v2355_v47 = vmul.f32 %v2339_v37, %v2323_v46  ;;  %vm2985_vm11 = vcmask 1041409  }
 0x26c   : > { %4542 = vst.msk [vmem:[%s8715_s22 + $0x208] sm:$0xff] %vm1513_vm6, %v2534_v55  ;;  %vm2550_vm12 = vcmp.gt.f32.partialorder %v2534_v55, 0.5  ;;  %4560 = vst.msk [vmem:[%s8715_s22 + $0x298] sm:$0xff] %vm1513_vm6, %v7429_v1 }
 0x26d   : > { %2633 = vst.msk [vmem:[#allocation3 + $0x41] sm:$0xff] %vm1513_vm6, %v7429_v1  ;;  %v7449_v14 = vsel %vm2550_vm12, 1.0, %v8757_v57  ;;  %v2358_v50 = vmul.f32 %v2342_v32, %v2326_v26  ;;  %vm2989_vm12 = vcmask 1043459  }
 0x26e   : > { %4558 = vst.msk [vmem:[%s8715_s22 + $0x288] sm:$0xff] %vm1513_vm6, %v7449_v14  ;;  %2631 = vst.msk [vmem:[#allocation3 + $0x21] sm:$0xff] %vm1513_vm6, %v7449_v14 }
 0x274   : > { %v4849_v42 = vpop.f32.mrf.mxu1 }
 0x275   : > { %v2475_v17 = vadd.f32 %v4849_v42, %v7368_v10 }
 0x276   : > { %v2466_v29 = vpop.f32.mrf.mxu1 }
 0x277   : > { %v2523_v54 = vmul.f32 %v7377_v5, %v2475_v17  ;;  %v2467_v30 = vadd.f32 %v7368_v10, %v2466_v29 }
 0x278   : > { %v4850_v49 = vpop.f32.mrf.mxu1 }
 0x279   : > { %v2539_v34 = vadd.f32 %v2523_v54, %v2353_v23  ;;  %v2521_v60 = vmul.f32 %v7377_v5, %v2467_v30  ;;  %v2478_v38 = vadd.f32 %v4850_v49, %v7368_v10  ;;  %v2356_v23 = vmul.f32 %v2340_v27, %v2324_v11  ;;  %v5112_v11 = vld [vmem:[%s8811_s28 + $0x38] sm:$0xff]  }
 0x27a   : > { %v2469_v39 = vpop.f32.mrf.mxu1  ;;  %4880 = vmatpush3.bf16.msra.mxu1 %v5112_v11  ;;  %4860 = vmatpush3.bf16.msra.mxu0 %v5112_v11 }
 0x27b   : > { %vm2555_vm13 = vcmp.gt.f32.partialorder %v2539_v34, 0.5  ;;  %4547 = vst.msk [vmem:[%s8715_s22 + $0x230] sm:$0xff] %vm1513_vm6, %v2539_v34  ;;  %v2537_v16 = vadd.f32 %v2521_v60, %v2351_v28  ;;  %v2524_v43 = vmul.f32 %v7377_v5, %v2478_v38  ;;  %v2470_v7 = vadd.f32 %v7368_v10, %v2469_v39  ;;  %v4494_v60 = vld [vmem:[%s8715_s22 + $0x270] sm:$0xff]  ;;  %v4492_v38 = vld [vmem:[%s8715_s22 + $0x260] sm:$0xff]  ;;  %4881 = vmatprep.subr.bf16.mxu1 %v8757_v57 }
 0x27c   : > { %v7492_v6 = vsel %vm2555_vm13, 1.0, %v8757_v57  ;;  %v2329_v39 = vmul.f32 %v4494_v60, %v7350_v12  ;;  %4861 = vmatprep.subr.bf16.mxu0 %v8757_v57  ;;  %v2789_v60 = vld [vmem:[#allocation3 + $0xa2] sm:$0xff]  ;;  %vm2994_vm13 = vcmask 1045509  }
 0x27d   : > { %4545 = vst.msk [vmem:[%s8715_s22 + $0x220] sm:$0xff] %vm1513_vm6, %v2537_v16  ;;  %v2540_v62 = vadd.f32 %v2524_v43, %v2354_v35  ;;  %v2522_v40 = vmul.f32 %v7377_v5, %v2470_v7  ;;  %vm2553_vm14 = vcmp.gt.f32.partialorder %v2537_v16, 0.5  ;;  %4563 = vst.msk [vmem:[%s8715_s22 + $0x2b0] sm:$0xff] %vm1513_vm6, %v7492_v6  ;;  %v4510_v35 = vld [vmem:[%s8715_s22 + $0x2f0] sm:$0xff]  ;;  %v4511_v43 = vld [vmem:[%s8715_s22 + $0x2f8] sm:$0xff]  ;;  %v2327_v7 = vmul.f32 %v4492_v38, %v7350_v12 }
 0x27e   : > { %2636 = vst.msk [vmem:[#allocation3 + $0x71] sm:$0xff] %vm1513_vm6, %v7492_v6  ;;  %v7507_v45 = vsel %vm2553_vm14, 1.0, %v8757_v57  ;;  %v2345_v16 = vsub.f32 1.0, %v4510_v35  ;;  %v2346_v36 = vsub.f32 1.0, %v4511_v43  ;;  %v2729_v35 = vld [vmem:[#allocation3] sm:$0xff]  ;;  %vm2999_vm14 = vcmask 1047559  }
 0x27f   : > { %vm2556_vm15 = vcmp.gt.f32.partialorder %v2540_v62, 0.5  ;;  %4548 = vst.msk [vmem:[%s8715_s22 + $0x238] sm:$0xff] %vm1513_vm6, %v2540_v62  ;;  %v2538_v2 = vadd.f32 %v2522_v40, %v2352_v3  ;;  %4561 = vst.msk [vmem:[%s8715_s22 + $0x2a0] sm:$0xff] %vm1513_vm6, %v7507_v45  ;;  %v4508_v3 = vld [vmem:[%s8715_s22 + $0x2e0] sm:$0xff]  ;;  %v4493_v40 = vld [vmem:[%s8715_s22 + $0x268] sm:$0xff] }
 0x280   : > { %2634 = vst.msk [vmem:[#allocation3 + $0x51] sm:$0xff] %vm1513_vm6, %v7507_v45  ;;  %v7521_v41 = vsel %vm2556_vm15, 1.0, %v8757_v57  ;;  %v2343_v62 = vsub.f32 1.0, %v4508_v3  ;;  %v2361_v0 = vmul.f32 %v2345_v16, %v2329_v39  ;;  %v2328_v52 = vmul.f32 %v4493_v40, %v7350_v12  ;;  %v2757_v38 = vld [vmem:[#allocation3 + $0x1] sm:$0xff] }
 0x281   : > { %4546 = vst.msk [vmem:[%s8715_s22 + $0x228] sm:$0xff] %vm1513_vm6, %v2538_v2  ;;  %vm2554_vm0 = vcmp.gt.f32.partialorder %v2538_v2, 0.5  ;;  %4564 = vst.msk [vmem:[%s8715_s22 + $0x2b8] sm:$0xff] %vm1513_vm6, %v7521_v41  ;;  %v3062_v3 = vld [vmem:[%s8817_s27 + $0x1] sm:$0x1]  ;;  %v2785_v40 = vld [vmem:[#allocation3 + $0x2] sm:$0xff] }
 0x282   : > { %2637 = vst.msk [vmem:[#allocation3 + $0x81] sm:$0xff] %vm1513_vm6, %v7521_v41  ;;  %v7535_v8 = vsel %vm2554_vm0, 1.0, %v8757_v57  ;;  %v2359_v46 = vmul.f32 %v2343_v62, %v2327_v7  ;;  %v4575_v16 = vld [vmem:[%s8716_s23 + $0x22] sm:$0x3] }
 0x283   : > { %4562 = vst.msk [vmem:[%s8715_s22 + $0x2a8] sm:$0xff] %vm1513_vm6, %v7535_v8  ;;  %2635 = vst.msk [vmem:[#allocation3 + $0x61] sm:$0xff] %vm1513_vm6, %v7535_v8 }
 0x28a   : > { %v4853_v31 = vpop.f32.mrf.mxu1 }
 0x28b   : > { %v2491_v55 = vadd.f32 %v4853_v31, %v7368_v10 }
 0x28c   : > { %v2482_v56 = vpop.f32.mrf.mxu1 }
 0x28d   : > { %v2527_v58 = vmul.f32 %v7377_v5, %v2491_v55  ;;  %v2483_v18 = vadd.f32 %v7368_v10, %v2482_v56 }
 0x28e   : > { %v4854_v63 = vpop.f32.mrf.mxu1 }
 0x28f   : > { %v2543_v25 = vadd.f32 %v2527_v58, %v2357_v9  ;;  %v2525_v13 = vmul.f32 %v7377_v5, %v2483_v18  ;;  %v2494_v42 = vadd.f32 %v4854_v63, %v7368_v10 }
 0x290   : > { %v2485_v17 = vpop.f32.mrf.mxu1 }
 0x291   : > { %vm2559_vm1 = vcmp.gt.f32.partialorder %v2543_v25, 0.5  ;;  %4551 = vst.msk [vmem:[%s8715_s22 + $0x250] sm:$0xff] %vm1513_vm6, %v2543_v25  ;;  %v2541_v21 = vadd.f32 %v2525_v13, %v2355_v47  ;;  %v2528_v4 = vmul.f32 %v7377_v5, %v2494_v42  ;;  %v2486_v29 = vadd.f32 %v7368_v10, %v2485_v17  ;;  %v5113_v47 = vld [vmem:[%s8812_s10 + $0x30] sm:$0xff]   ;;  %v5114_v13 = vld [vmem:[%s8812_s10 + $0x28] sm:$0xff]   ;;  %v7769_v17 = vld [vmem:[%s8813_s16] sm:$0xff] }
 0x292   : > { %v7584_v24 = vsel %vm2559_vm1, 1.0, %v8757_v57  ;;  %4882 = vmatpush3.bf16.msra.mxu1 %v5113_v47  ;;  %4862 = vmatpush3.bf16.msra.mxu0 %v5113_v47  ;;  %v5088_v25 = vpack.i.bf16 %v7492_v6, %v7400_v59  ;;  %v5115_v59 = vld [vmem:[%s8812_s10 + $0x20] sm:$0xff]   ;;  %v5116_v6 = vld [vmem:[%s8812_s10 + $0x18] sm:$0xff]   ;;  %v5118_v42 = vld [vmem:[%s8812_s10 + $0x8] sm:$0xff]  }
 0x293   : > { %4549 = vst.msk [vmem:[%s8715_s22 + $0x240] sm:$0xff] %vm1513_vm6, %v2541_v21  ;;  %v2544_v33 = vadd.f32 %v2528_v4, %v2358_v50  ;;  %v2526_v54 = vmul.f32 %v7377_v5, %v2486_v29  ;;  %vm2557_vm2 = vcmp.gt.f32.partialorder %v2541_v21, 0.5  ;;  %4567 = vst.msk [vmem:[%s8715_s22 + $0x2d0] sm:$0xff] %vm1513_vm6, %v7584_v24  ;;  %4883 = vmatprep.subr.bf16.mxu1 %v8757_v57  ;;  %4863 = vmatprep.subr.bf16.mxu0 %v8757_v57  ;;  %v8814_v4 = vld [vmem:[#allocation14_spill] sm:$0xff] }
 0x294   : > { %2640 = vst.msk [vmem:[#allocation3 + $0xd1] sm:$0xff] %vm1513_vm6, %v7584_v24  ;;  %v4533_v28 = vsel %vm2557_vm2, 1.0, %v8757_v57  ;;  %v7773_v21 = vrot.slane %v7769_v17, %v8810_v22  ;;  %v8815_v29 = vsub.s32 1, %v8814_v4 }
 0x295   : > { %4552 = vst.msk [vmem:[%s8715_s22 + $0x258] sm:$0xff] %vm1513_vm6, %v2544_v33  ;;  %v2542_v30 = vadd.f32 %v2526_v54, %v2356_v23  ;;  %2678 = vrot.lane.b32.xlu0 %v4533_v28, %s5231_s1  ;;  %4565 = vst.msk [vmem:[%s8715_s22 + $0x2c0] sm:$0xff] %vm1513_vm6, %v4533_v28  ;;  %vm2560_vm3 = vcmp.gt.f32.partialorder %v2544_v33, 0.5  ;;  %v5119_v23 = vld [vmem:[%s8812_s10] sm:$0xff]  }
 0x296   : > { %2638 = vst.msk [vmem:[#allocation3 + $0xb1] sm:$0xff] %vm1513_vm6, %v4533_v28  ;;  %v4536_v49 = vsel %vm2560_vm3, 1.0, %v8757_v57  ;;  %4884 = vmatpush3.bf16.msra.mxu1 %v5114_v13  ;;  %4864 = vmatpush3.bf16.msra.mxu0 %v5114_v13  ;;  %v2733_v33 = vld [vmem:[#allocation3 + $0xa0] sm:$0xff]  ;;  %v2741_v7 = vmul.f32 %v7773_v21, %v2729_v35 }
 0x297   : > { %4550 = vst.msk [vmem:[%s8715_s22 + $0x248] sm:$0xff] %vm1513_vm6, %v2542_v30  ;;  %vm2558_vm4 = vcmp.gt.f32.partialorder %v2542_v30, 0.5  ;;  %4568 = vst.msk [vmem:[%s8715_s22 + $0x2d8] sm:$0xff] %vm1513_vm6, %v4536_v49  ;;  %4885 = vmatprep.subr.bf16.mxu1 %v8757_v57  ;;  %4865 = vmatprep.subr.bf16.mxu0 %v8757_v57  ;;  %v2761_v54 = vld [vmem:[#allocation3 + $0xa1] sm:$0xff]  ;;  %v2745_v28 = vmul.f32 %v7773_v21, %v2733_v33 }
 0x298   : > { %2641 = vst.msk [vmem:[#allocation3 + $0xe1] sm:$0xff] %vm1513_vm6, %v4536_v49  ;;  %v4534_v34 = vsel %vm2558_vm4, 1.0, %v8757_v57  ;;  %v3067_v33 = vld [vmem:[%s8716_s23 + $0x8] sm:$0x3] }
 0x299   : > { %2680 = vrot.lane.b32.xlu1 %v4534_v34, %s5231_s1  ;;  %4566 = vst.msk [vmem:[%s8715_s22 + $0x2c8] sm:$0xff] %vm1513_vm6, %v4534_v34  ;;  %2639 = vst.msk [vmem:[#allocation3 + $0xc1] sm:$0xff] %vm1513_vm6, %v4534_v34  ;;  %2662 = vrot.lane.b32.xlu0 %v7415_v48, %s5231_s1  ;;  %v4495_v48 = vld [vmem:[%s8715_s22 + $0x278] sm:$0xff] }
 0x29a   : > { %v2330_v19 = vmul.f32 %v4495_v48, %v7350_v12  ;;  %4886 = vmatpush3.bf16.msra.mxu1 %v5115_v59  ;;  %4866 = vmatpush3.bf16.msra.mxu0 %v5115_v59 }
 0x29b   : > { %4887 = vmatprep.subr.bf16.mxu1 %v8757_v57  ;;  %4867 = vmatprep.subr.bf16.mxu0 %v8757_v57 }
 0x29c   : > { %v2362_v9 = vmul.f32 %v2346_v36, %v2330_v19  ;;  %v3117_v19 = vsub.f32 1.0, %v4575_v16  ;;  %v3072_v36 = vld [vmem:[%s8716_s23 + $0x12] sm:$0x3] }
 0x29d   : > { %2664 = vrot.lane.b32.xlu1 %v7449_v14, %s5231_s1  ;;  %2684 = vrot.lane.b32.xlu0 %v4536_v49, %s5231_s1  ;;  %v4509_v14 = vld [vmem:[%s8715_s22 + $0x2e8] sm:$0xff]  ;;  %v8816_v49 = vsub.s32 2, %v8814_v4 }
 0x29e   : > { %v2344_v61 = vsub.f32 1.0, %v4509_v14  ;;  %4888 = vmatpush3.bf16.msra.mxu1 %v5116_v6  ;;  %4868 = vmatpush3.bf16.msra.mxu0 %v5116_v6  ;;  %v3064_v14 = vld [vmem:[%s8716_s23 + $0x2] sm:$0x3] }
 0x29f   : > { %4889 = vmatprep.subr.bf16.mxu1 %v8757_v57  ;;  %4869 = vmatprep.subr.bf16.mxu0 %v8757_v57  ;;  %v7785_v34 = vrot.slane %v7769_v17, %v8816_v49  ;;  %v8823_v49 = vsub.s32 7, %v8814_v4 }
 0x2a0   : > { %v4857_v2 = vpop.f32.mrf.mxu1 }
 0x2a1   : > { %v2507_v51 = vadd.f32 %v4857_v2, %v7368_v10  ;;  %2668 = vrot.lane.b32.xlu1 %v7429_v1, %s5231_s1  ;;  %v2360_v1 = vmul.f32 %v2344_v61, %v2328_v52  ;;  %v2801_v43 = vmul.f32 %v7785_v34, %v2789_v60  ;;  %v3066_v2 = vld [vmem:[%s8716_s23 + $0x6] sm:$0x3]  ;;  %v8819_v52 = vsub.s32 3, %v8814_v4 }
 0x2a2   : > { %v2498_v44 = vpop.f32.mrf.mxu1  ;;  %v7871_v60 = vrot.slane %v7769_v17, %v8823_v49 }
 0x2a3   : > { %v2531_v20 = vmul.f32 %v7377_v5, %v2507_v51  ;;  %v2499_v37 = vadd.f32 %v7368_v10, %v2498_v44  ;;  %v7807_v51 = vrot.slane %v3062_v3, %v8810_v22  ;;  %v3074_v44 = vld [vmem:[%s8716_s23 + $0x16] sm:$0x3]  ;;  %v7818_v61 = vrot.slane %v7769_v17, %v8819_v52  ;;  %v3073_v52 = vld [vmem:[%s8716_s23 + $0x14] sm:$0x3] }
 0x2a4   : > { %v4858_v15 = vpop.f32.mrf.mxu1 }
 0x2a5   : > { %v2547_v53 = vadd.f32 %v2531_v20, %v2361_v0  ;;  %v2529_v31 = vmul.f32 %v7377_v5, %v2499_v37  ;;  %v2510_v55 = vadd.f32 %v4858_v15, %v7368_v10  ;;  %2670 = vrot.lane.b32.xlu1 %v7507_v45, %s5231_s1  ;;  %v4577_v0 = vld [vmem:[%s8716_s23 + $0x26] sm:$0x3]  ;;  %v4583_v37 = vld [vmem:[%s8716_s23 + $0x32] sm:$0x3]  ;;  %v4585_v15 = vld [vmem:[%s8716_s23 + $0x36] sm:$0x3]  ;;  %v3101_v11 = vmul.f32 %v7807_v51, %v3064_v14 }
 0x2a6   : > { %v2501_v26 = vpop.f32.mrf.mxu1  ;;  %v3127_v47 = vsub.f32 1.0, %v4585_v15 }
 0x2a7   : > { %vm2563_vm5 = vcmp.gt.f32.partialorder %v2547_v53, 0.5  ;;  %4555 = vst.msk [vmem:[%s8715_s22 + $0x270] sm:$0xff] %vm1513_vm6, %v2547_v53  ;;  %v2545_v12 = vadd.f32 %v2529_v31, %v2359_v46  ;;  %v2532_v32 = vmul.f32 %v7377_v5, %v2510_v55  ;;  %v2502_v56 = vadd.f32 %v7368_v10, %v2501_v26  ;;  %v3063_v53 = vld [vmem:[%s8716_s23] sm:$0x3] }
 0x2a8   : > { %v4539_v27 = vsel %vm2563_vm5, 1.0, %v8757_v57  ;;  %v2797_v26 = vmul.f32 %v7785_v34, %v2785_v40 }
 0x2a9   : > { %4553 = vst.msk [vmem:[%s8715_s22 + $0x260] sm:$0xff] %vm1513_vm6, %v2545_v12  ;;  %v2548_v45 = vadd.f32 %v2532_v32, %v2362_v9  ;;  %v2530_v58 = vmul.f32 %v7377_v5, %v2502_v56  ;;  %vm2561_vm7 = vcmp.gt.f32.partialorder %v2545_v12, 0.5  ;;  %2672 = vrot.lane.b32.xlu1 %v7535_v8, %s5231_s1  ;;  %4571 = vst.msk [vmem:[%s8715_s22 + $0x2f0] sm:$0xff] %vm1513_vm6, %v4539_v27  ;;  %v8820_v9 = vsub.s32 4, %v8814_v4  ;;  %v4574_v12 = vld [vmem:[%s8716_s23 + $0x20] sm:$0x3] }
 0x2aa   : > { %2644 = vst.msk [vmem:[#allocation3 + $0x111] sm:$0xff] %vm1513_vm6, %v4539_v27  ;;  %v4537_v10 = vsel %vm2561_vm7, 1.0, %v8757_v57  ;;  %v5083_v8 = vpack.i.bf16 %v4539_v27, %v7584_v24  ;;  %v7778_v24 = vrot.slane %v7769_v17, %v8815_v29  ;;  %v3065_v32 = vld [vmem:[%s8716_s23 + $0x4] sm:$0x3]  ;;  %v3103_v27 = vmul.f32 %v7807_v51, %v3066_v2 }
 0x2ab   : > { %vm2564_vm8 = vcmp.gt.f32.partialorder %v2548_v45, 0.5  ;;  %4556 = vst.msk [vmem:[%s8715_s22 + $0x278] sm:$0xff] %vm1513_vm6, %v2548_v45  ;;  %v2546_v5 = vadd.f32 %v2530_v58, %v2360_v1  ;;  %4569 = vst.msk [vmem:[%s8715_s22 + $0x2e0] sm:$0xff] %vm1513_vm6, %v4537_v10  ;;  %2686 = vrot.lane.b32.xlu0 %v4537_v10, %s5231_s1  ;;  %v7832_v55 = vrot.slane %v7769_v17, %v8820_v9  ;;  %v4576_v56 = vld [vmem:[%s8716_s23 + $0x24] sm:$0x3]  ;;  %v3119_v45 = vsub.f32 1.0, %v4577_v0 }
 0x2ac   : > { %2642 = vst.msk [vmem:[#allocation3 + $0xf1] sm:$0xff] %vm1513_vm6, %v4537_v10  ;;  %v4540_v18 = vsel %vm2564_vm8, 1.0, %v8757_v57  ;;  %v2773_v30 = vmul.f32 %v7778_v24, %v2761_v54  ;;  %v2769_v62 = vmul.f32 %v7778_v24, %v2757_v38  ;;  %v3148_v58 = vsub.f32 1.0, %v3062_v3  ;;  %v3068_v3 = vld [vmem:[%s8716_s23 + $0xa] sm:$0x3] }
 0x2ad   : > { %4554 = vst.msk [vmem:[%s8715_s22 + $0x268] sm:$0xff] %vm1513_vm6, %v2546_v5  ;;  %vm2562_vm9 = vcmp.gt.f32.partialorder %v2546_v5, 0.5  ;;  %5084 = vrot.lane.b32.xlu1 %v5083_v8, %s5231_s1  ;;  %4572 = vst.msk [vmem:[%s8715_s22 + $0x2f8] sm:$0xff] %vm1513_vm6, %v4540_v18  ;;  %v5093_v50 = vpack.i.bf16 %v7521_v41, %v4540_v18  ;;  %v5117_v41 = vld [vmem:[%s8812_s10 + $0x10] sm:$0xff]   ;;  %v3109_v10 = vmul.f32 %v7807_v51, %v3072_v36  ;;  %v3125_v8 = vsub.f32 1.0, %v4583_v37 }
 0x2ae   : > { %2645 = vst.msk [vmem:[#allocation3 + $0x121] sm:$0xff] %vm1513_vm6, %v4540_v18  ;;  %v4538_v63 = vsel %vm2562_vm9, 1.0, %v8757_v57  ;;  %4890 = vmatpush3.bf16.msra.mxu1 %v5117_v41  ;;  %4870 = vmatpush3.bf16.msra.mxu0 %v5117_v41  ;;  %v2781_v48 = vadd.f32 %v2773_v30, %v2745_v28  ;;  %v2777_v1 = vadd.f32 %v2769_v62, %v2741_v7  ;;  %v3116_v59 = vsub.f32 1.0, %v4574_v12  ;;  %v7893_v7 = vld [vmem:[%s8716_s23 + $0x28] sm:$0x3] }
 0x2af   : > { %4570 = vst.msk [vmem:[%s8715_s22 + $0x2e8] sm:$0xff] %vm1513_vm6, %v4538_v63  ;;  %2688 = vrot.lane.b32.xlu0 %v4538_v63, %s5231_s1  ;;  %2643 = vst.msk [vmem:[#allocation3 + $0x101] sm:$0xff] %vm1513_vm6, %v4538_v63  ;;  %4891 = vmatprep.subr.bf16.mxu1 %v8757_v57  ;;  %vm5232_vm6 = vmmov 0   ;;  %v3111_v5 = vmul.f32 %v7807_v51, %v3074_v44  ;;  %v3102_v6 = vmul.f32 %v7807_v51, %v3065_v32  ;;  %v3118_v41 = vsub.f32 1.0, %v4576_v56  ;;  %v3071_v62 = vld [vmem:[%s8716_s23 + $0x10] sm:$0x3] }
 0x2b0   : > { %4871 = vmatprep.subr.bf16.mxu0 %v8757_v57  ;;  %4875 = vmatprep.mubr.msk.bf16.mxu0 %vm5232_vm6, %v8757_v57  ;;  %v2809_v31 = vadd.f32 %v2801_v43, %v2781_v48  ;;  %v8822_v28 = vsub.s32 6, %v8814_v4  ;;  %v2805_v35 = vadd.f32 %v2797_v26, %v2777_v1  ;;  %v7874_v38 = vrot.slane %v3148_v58, %v8810_v22  ;;  %v4582_v44 = vld [vmem:[%s8716_s23 + $0x30] sm:$0x3]  ;;  %v4584_v9 = vld [vmem:[%s8716_s23 + $0x34] sm:$0x3] }
 0x2b1   : > { %5089 = vrot.lane.b32.xlu1 %v5088_v25, %s5231_s1  ;;  %4895 = vmatprep.mubr.msk.bf16.mxu1 %vm5232_vm6, %v8757_v57  ;;  %v7883_v43 = vmul.f32 %v3117_v19, %v3101_v11  ;;  %v7898_v2 = vmul.f32 %v3125_v8, %v3109_v10  ;;  %v7900_v0 = vmul.f32 %v3127_v47, %v3111_v5  ;;  %v7927_v12 = vld [vmem:[%s8716_s23 + $0x2a] sm:$0x3]  ;;  %v7932_v32 = vld [vmem:[%s8716_s23 + $0x2c] sm:$0x3]  ;;  %v7945_v5 = vld [vmem:[%s8716_s23 + $0x2e] sm:$0x3] }
 0x2b2   : > { %4892 = vmatpush3.bf16.msra.mxu1 %v5118_v42  ;;  %4872 = vmatpush3.bf16.msra.mxu0 %v5118_v42  ;;  %v8821_v42 = vsub.s32 5, %v8814_v4  ;;  %v7866_v30 = vrot.slane %v7769_v17, %v8822_v28  ;;  %v7885_v4 = vmul.f32 %v3119_v45, %v3103_v27  ;;  %v7904_v36 = vmul.f32 %v3118_v41, %v3102_v6  ;;  %v3075_v28 = vld [vmem:[%s8716_s23 + $0x18] sm:$0x3] }
 0x2b3   : > { %4893 = vmatprep.subr.bf16.mxu1 %v8757_v57  ;;  %4873 = vmatprep.subr.bf16.mxu0 %v8757_v57  ;;  %8824 = vst [vmem:[#allocation17_spill] sm:$0xff] %v7945_v5  ;;  %v3108_v8 = vmul.f32 %v7807_v51, %v3071_v62  ;;  %v3124_v47 = vsub.f32 1.0, %v4582_v44 }
 0x2b5   : > { %5094 = vrot.lane.b32.xlu1 %v5093_v50, %s5231_s1  ;;  %s8818_s1 = smov %s8817_s27  ;;  %v3100_v50 = vmul.f32 %v7807_v51, %v3063_v53  ;;  %v7915_v53 = vmul.f32 %v7807_v51, %v3067_v33  ;;  %v7970_v44 = vmul.f32 %v3124_v47, %v3108_v8  ;;  %v7992_v47 = vmul.f32 %v7807_v51, %v3075_v28 }
 0x2b6   : > { %4894 = vmatpush3.bf16.msra.mxu1 %v5119_v23  ;;  %4874 = vmatpush3.bf16.msra.mxu0 %v5119_v23  ;;  %v7855_v23 = vrot.slane %v7769_v17, %v8821_v42  ;;  %v3070_v17 = vld [vmem:[%s8716_s23 + $0xe] sm:$0x3] }
 0x2b7   : > { %4919 = vmatprep.subr.bf16.mxu1 %v8757_v57  ;;  %4899 = vmatprep.subr.bf16.mxu0 %v8757_v57  ;;  %v7902_v19 = vmul.f32 %v3116_v59, %v3100_v50  ;;  %v7938_v11 = vmul.f32 %v7807_v51, %v3070_v17  ;;  %v3110_v50 = vmul.f32 %v7807_v51, %v3073_v52  ;;  %v3126_v59 = vsub.f32 1.0, %v4584_v9 }
 0x2b8   : > { %8825 = vst [vmem:[#allocation19_spill] sm:$0xff] %v7992_v47 }
 0x307   : > { %v2679_v39 = vpop.permute.xlu0 %2678 }
 0x308   : > { %2719 = vst.msk [vmem:[#allocation3 + $0xb1] sm:$0xff] %vm2710_vm10, %v2679_v39  ;;  %v3069_v39 = vld [vmem:[%s8716_s23 + $0xc] sm:$0x3] }
 0x309   : > { %v7935_v56 = vmul.f32 %v7807_v51, %v3069_v39 }
 0x30b   : > { %v2681_v20 = vpop.permute.xlu1 %2680  ;;  %v2663_v46 = vpop.permute.xlu0 %2662 }
 0x30c   : > { %2720 = vst.msk [vmem:[#allocation3 + $0xc1] sm:$0xff] %vm2710_vm10, %v2681_v20  ;;  %2711 = vst.msk [vmem:[#allocation3 + $0x11] sm:$0xff] %vm2710_vm10, %v2663_v46 }
 0x30f   : > { %v2817_v18 = vld [vmem:[#allocation3 + $0xb0] sm:$0xff]  ;;  %v2665_v25 = vpop.permute.xlu1 %2664  ;;  %v2685_v13 = vpop.permute.xlu0 %2684 }
 0x310   : > { %v2845_v63 = vld [vmem:[#allocation3 + $0xb1] sm:$0xff]  ;;  %v2829_v29 = vmul.f32 %v7818_v61, %v2817_v18  ;;  %2712 = vst.msk [vmem:[#allocation3 + $0x21] sm:$0xff] %vm2710_vm10, %v2665_v25  ;;  %2722 = vst.msk [vmem:[#allocation3 + $0xe1] sm:$0xff] %vm2710_vm10, %v2685_v13  ;;  %v7951_v18 = vld [vmem:[%s8813_s16 + $0x8] ss:$0 sm:$0xff] }
 0x311   : > { %v2873_v54 = vld [vmem:[#allocation3 + $0xb2] sm:$0xff]  ;;  %v2857_v48 = vmul.f32 %v7832_v55, %v2845_v63 }
 0x312   : > { %v2837_v16 = vadd.f32 %v2829_v29, %v2809_v31  ;;  %v2885_v46 = vmul.f32 %v7855_v23, %v2873_v54  ;;  %v7918_v31 = vmul.f32 %v7807_v51, %v3068_v3 }
 0x313   : > { %v2734_v40 = vld [vmem:[#allocation3 + $0xc0] sm:$0xff]  ;;  %v2669_v14 = vpop.permute.xlu1 %2668  ;;  %v2813_v37 = vld [vmem:[#allocation3 + $0x10] sm:$0xff] }
 0x314   : > { %v2865_v20 = vadd.f32 %v2857_v48, %v2837_v16  ;;  %v2841_v15 = vld [vmem:[#allocation3 + $0x11] sm:$0xff]  ;;  %2714 = vst.msk [vmem:[#allocation3 + $0x41] sm:$0xff] %vm2710_vm10, %v2669_v14  ;;  %v2762_v1 = vld [vmem:[#allocation3 + $0xc1] sm:$0xff]  ;;  %v2825_v26 = vmul.f32 %v7818_v61, %v2813_v37  ;;  %v2914_v58 = vmul.f32 %v7866_v30, %v2734_v40  ;;  %v2746_v17 = vmul.f32 %v7773_v21, %v2734_v40 }
 0x315   : > { %v2869_v10 = vld [vmem:[#allocation3 + $0x12] sm:$0xff]  ;;  %v2853_v25 = vmul.f32 %v7832_v55, %v2841_v15  ;;  %v2790_v6 = vld [vmem:[#allocation3 + $0xc2] sm:$0xff]  ;;  %v2942_v42 = vmul.f32 %v7871_v60, %v2762_v1  ;;  %v2774_v62 = vmul.f32 %v7778_v24, %v2762_v1  ;;  %v7981_v40 = vmul.f32 %v3126_v59, %v3110_v50 }
 0x316   : > { %v2893_v45 = vadd.f32 %v2885_v46, %v2865_v20  ;;  %v2833_v63 = vadd.f32 %v2825_v26, %v2805_v35  ;;  %v2881_v35 = vmul.f32 %v7855_v23, %v2869_v10  ;;  %v2970_v52 = vmul.f32 %v7951_v18, %v2790_v6  ;;  %v3076_v26 = vld [vmem:[%s8716_s23 + $0x1a] sm:$0x3] }
 0x317   : > { %v2671_v13 = vpop.permute.xlu1 %2670  ;;  %v2730_v29 = vld [vmem:[#allocation3 + $0x20] sm:$0xff] }
 0x318   : > { %v2922_v41 = vadd.f32 %v2914_v58, %v2893_v45  ;;  %2715 = vst.msk [vmem:[#allocation3 + $0x51] sm:$0xff] %vm2710_vm10, %v2671_v13  ;;  %v2861_v49 = vadd.f32 %v2853_v25, %v2833_v63  ;;  %v2758_v3 = vld [vmem:[#allocation3 + $0x21] sm:$0xff]  ;;  %v2910_v46 = vmul.f32 %v7866_v30, %v2730_v29 }
 0x319   : > { %v7963_v39 = vld [vmem:[#allocation3 + $0xe0] sm:$0xff]  ;;  %v2938_v45 = vmul.f32 %v7871_v60, %v2758_v3 }
 0x31a   : > { %v7965_v16 = vld [vmem:[#allocation3 + $0xe1] sm:$0xff]  ;;  %v2950_v14 = vadd.f32 %v2942_v42, %v2922_v41  ;;  %v2889_v20 = vadd.f32 %v2881_v35, %v2861_v49  ;;  %v2747_v58 = vmul.f32 %v7773_v21, %v7963_v39  ;;  %v2782_v41 = vadd.f32 %v2774_v62, %v2746_v17 }
 0x31b   : > { %v7974_v37 = vld [vmem:[#allocation3 + $0x40] sm:$0xff]  ;;  %v2673_v9 = vpop.permute.xlu1 %2672  ;;  %v2775_v10 = vmul.f32 %v7778_v24, %v7965_v16  ;;  %v2742_v42 = vmul.f32 %v7773_v21, %v2730_v29  ;;  %v2770_v49 = vmul.f32 %v7778_v24, %v2758_v3  ;;  %v8002_v35 = vmul.f32 %v7807_v51, %v3076_v26  ;;  %v3077_v29 = vld [vmem:[%s8716_s23 + $0x1c] sm:$0x3] }
 0x31c   : > { %v7976_v15 = vld [vmem:[#allocation3 + $0x41] sm:$0xff]  ;;  %2716 = vst.msk [vmem:[#allocation3 + $0x61] sm:$0xff] %vm2710_vm10, %v2673_v9  ;;  %v2978_v63 = vadd.f32 %v2970_v52, %v2950_v14  ;;  %v2918_v25 = vadd.f32 %v2910_v46, %v2889_v20  ;;  %v2743_v13 = vmul.f32 %v7773_v21, %v7974_v37  ;;  %v2802_v3 = vmul.f32 %v7785_v34, %v2790_v6 }
 0x31d   : > { %v2786_v1 = vld [vmem:[#allocation3 + $0x22] sm:$0xff]  ;;  %v2771_v50 = vmul.f32 %v7778_v24, %v7976_v15  ;;  %v2687_v59 = vpop.permute.xlu0 %2686  ;;  %8826 = vst [vmem:[#allocation18_spill] sm:$0xff] %v8002_v35  ;;  %v2783_v17 = vadd.f32 %v2775_v10, %v2747_v58  ;;  %v2778_v27 = vadd.f32 %v2770_v49, %v2742_v42  ;;  %v8018_v6 = vmul.f32 %v7807_v51, %v3077_v29 }
 0x31e   : > { %v7988_v8 = vld [vmem:[#allocation3 + $0x42] sm:$0xff]  ;;  %2723 = vst.msk [vmem:[#allocation3 + $0xf1] sm:$0xff] %vm2710_vm10, %v2687_v59  ;;  %v2946_v28 = vadd.f32 %v2938_v45, %v2918_v25  ;;  %v2966_v14 = vmul.f32 %v7951_v18, %v2786_v1  ;;  %v2984_v45 = vrot.slane %v2978_v63, 7  ;;  %v8012_v33 = vadd.f32 %v2802_v3, %v2782_v41 }
 0x31f   : > { %v2791_v52 = vld [vmem:[#allocation3 + $0xe2] sm:$0xff]  ;;  %v2779_v20 = vadd.f32 %v2771_v50, %v2743_v13  ;;  %v2799_v46 = vmul.f32 %v7785_v34, %v7988_v8  ;;  %v2815_v9 = vld [vmem:[#allocation3 + $0x50] sm:$0xff]  ;;  %v5085_v48 = vpop.permute.xlu1 %5084  ;;  %8827 = vst [vmem:[#allocation16_spill] sm:$0xff] %v8018_v6  ;;  %v8029_v29 = vmul.f32 %v7866_v30, %v7963_v39 }
 0x320   : > { %v2827_v62 = vmul.f32 %v7818_v61, %v2815_v9  ;;  %v5087_v26 = vunpack.i.h.bf16 %v5085_v48  ;;  %v2974_v25 = vadd.f32 %v2966_v14, %v2946_v28  ;;  %v2843_v54 = vld [vmem:[#allocation3 + $0x51] sm:$0xff]  ;;  %v5086_v50 = vunpack.i.l.bf16 %v5085_v48 }
 0x321   : > { %v2807_v59 = vadd.f32 %v2799_v46, %v2779_v20  ;;  %v2689_v13 = vpop.permute.xlu0 %2688  ;;  %v2803_v57 = vmul.f32 %v7785_v34, %v2791_v52  ;;  %v2871_v41 = vld [vmem:[#allocation3 + $0x52] sm:$0xff]  ;;  %v2798_v14 = vmul.f32 %v7785_v34, %v2786_v1  ;;  %v2855_v9 = vmul.f32 %v7832_v55, %v2843_v54 }
 0x322   : > { %2724 = vst.msk [vmem:[#allocation3 + $0x101] sm:$0xff] %vm2710_vm10, %v2689_v13  ;;  %2725 = vst.msk [vmem:[#allocation3 + $0x111] sm:$0xff] %vm2710_vm10, %v5087_v26  ;;  %v2986_v58 = vsel %vm2985_vm11, %v2984_v45, %v2974_v25  ;;  %v2990_v10 = vsel %vm2989_vm12, %v2984_v45, %v2974_v25  ;;  %v2995_v63 = vsel %vm2994_vm13, %v2984_v45, %v2974_v25 }
 0x323   : > { %v3000_v48 = vsel %vm2999_vm14, %v2984_v45, %v2974_v25  ;;  %v2732_v28 = vld [vmem:[#allocation3 + $0x60] sm:$0xff]  ;;  %2721 = vst.msk [vmem:[#allocation3 + $0xd1] sm:$0xff] %vm2710_vm10, %v5086_v50  ;;  %v5090_v49 = vpop.permute.xlu1 %5089  ;;  %2988 = vst [vmem:[#allocation4] sm:$0x3] %v2986_v58  ;;  %v2811_v20 = vadd.f32 %v2803_v57, %v2783_v17  ;;  %v2835_v46 = vadd.f32 %v2827_v62, %v2807_v59 }
 0x324   : > { %v2760_v42 = vld [vmem:[#allocation3 + $0x61] sm:$0xff]  ;;  %2993 = vst [vmem:[#allocation4] sm:$0xc] %v2990_v10  ;;  %2998 = vst [vmem:[#allocation4] sm:$0x30] %v2995_v63  ;;  %v2744_v45 = vmul.f32 %v7773_v21, %v2732_v28  ;;  %v5092_v13 = vunpack.i.h.bf16 %v5090_v49  ;;  %v8033_v1 = vadd.f32 %v2798_v14, %v2778_v27  ;;  %v2883_v57 = vmul.f32 %v7855_v23, %v2871_v41 }
 0x325   : > { %3003 = vst [vmem:[#allocation4] sm:$0xc0] %v3000_v48  ;;  %v2819_v3 = vld [vmem:[#allocation3 + $0xf0] sm:$0xff]  ;;  %v2772_v25 = vmul.f32 %v7778_v24, %v2760_v42  ;;  %v2863_v58 = vadd.f32 %v2855_v9, %v2835_v46  ;;  %v2788_v17 = vld [vmem:[#allocation3 + $0x62] sm:$0xff]  ;;  %v8039_v54 = vmul.f32 %v7871_v60, %v7965_v16  ;;  %v8042_v39 = vmul.f32 %v7951_v18, %v2791_v52  ;;  %v8049_v63 = vld [vmem:[%s8818_s1] ss:$0 sm:$0xff] }
 0x326   : > { %v2847_v26 = vld [vmem:[#allocation3 + $0xf1] sm:$0xff]  ;;  %v2831_v50 = vmul.f32 %v7818_v61, %v2819_v3  ;;  %2717 = vst.msk [vmem:[#allocation3 + $0x71] sm:$0xff] %vm2710_vm10, %v5092_v13  ;;  %v5091_v27 = vunpack.i.l.bf16 %v5090_v49  ;;  %v2912_v22 = vmul.f32 %v7866_v30, %v2732_v28  ;;  %v2940_v49 = vmul.f32 %v7871_v60, %v2760_v42  ;;  %s8840_s1 = sand.u32 1, %s5219_s3  }
 0x327   : > { %v2859_v62 = vmul.f32 %v7832_v55, %v2847_v26  ;;  %v2875_v59 = vld [vmem:[#allocation3 + $0xf2] sm:$0xff]  ;;  %v5095_v10 = vpop.permute.xlu1 %5094  ;;  %v2891_v41 = vadd.f32 %v2883_v57, %v2863_v58  ;;  %v2780_v3 = vadd.f32 %v2772_v25, %v2744_v45  ;;  %v2800_v26 = vmul.f32 %v7785_v34, %v2788_v17  ;;  %s4221_s27 = scalar_lea.sflag [#allocation6], %s8840_s1 }
 0x328   : > { %v2839_v48 = vadd.f32 %v2831_v50, %v2811_v20  ;;  %v5097_v14 = vunpack.i.h.bf16 %v5095_v10  ;;  %v5096_v16 = vunpack.i.l.bf16 %v5095_v10  ;;  %2713 = vst.msk [vmem:[#allocation3 + $0x31] sm:$0xff] %vm2710_vm10, %v5091_v27  ;;  %v2887_v6 = vmul.f32 %v7855_v23, %v2875_v59 }
 0x329   : > { %v2736_v46 = vld [vmem:[#allocation3 + $0x100] sm:$0xff]  ;;  %v2820_v58 = vld [vmem:[#allocation3 + $0x110] sm:$0xff]  ;;  %v2920_v57 = vadd.f32 %v2912_v22, %v2891_v41 }
 0x32a   : > { %v2764_v9 = vld [vmem:[#allocation3 + $0x101] sm:$0xff]  ;;  %v2867_v13 = vadd.f32 %v2859_v62, %v2839_v48  ;;  %v2748_v20 = vmul.f32 %v7773_v21, %v2736_v46  ;;  %2718 = vst.msk [vmem:[#allocation3 + $0x81] sm:$0xff] %vm2710_vm10, %v5097_v14  ;;  %2726 = vst.msk [vmem:[#allocation3 + $0x121] sm:$0xff] %vm2710_vm10, %v5096_v16  ;;  %v2916_v42 = vmul.f32 %v7866_v30, %v2736_v46  ;;  %v2848_v10 = vld [vmem:[#allocation3 + $0x111] sm:$0xff] }
 0x32b   : > { %v2792_v52 = vld [vmem:[#allocation3 + $0x102] sm:$0xff]  ;;  %v2776_v50 = vmul.f32 %v7778_v24, %v2764_v9  ;;  %v2968_v62 = vmul.f32 %v7951_v18, %v2788_v17  ;;  %v2818_v48 = vld [vmem:[#allocation3 + $0xd0] sm:$0xff]  ;;  %v2944_v14 = vmul.f32 %v7871_v60, %v2764_v9  ;;  %v2808_v16 = vadd.f32 %v2800_v26, %v2780_v3 }
 0x32c   : > { %v3150_v45 = vld [vmem:[#allocation4 + $0x2] sm:$0x3]  ;;  %v3152_v25 = vld [vmem:[#allocation4 + $0x6] sm:$0x3]  ;;  %v2804_v28 = vmul.f32 %v7785_v34, %v2792_v52  ;;  %v2895_v27 = vadd.f32 %v2887_v6, %v2867_v13  ;;  %v2948_v35 = vadd.f32 %v2940_v49, %v2920_v57  ;;  %v2832_v47 = vmul.f32 %v7818_v61, %v2820_v58  ;;  %v2846_v46 = vld [vmem:[#allocation3 + $0xd1] sm:$0xff] }
 0x32d   : > { %v3170_v59 = vadd.f32 %v8049_v63, %v3150_v45  ;;  %v3172_v21 = vadd.f32 %v8049_v63, %v3152_v25  ;;  %v2784_v24 = vadd.f32 %v2776_v50, %v2748_v20  ;;  %v2874_v45 = vld [vmem:[#allocation3 + $0xd2] sm:$0xff]  ;;  %v2972_v6 = vmul.f32 %v7951_v18, %v2792_v52 }
 0x32e   : > { %v2924_v17 = vadd.f32 %v2916_v42, %v2895_v27  ;;  %v2816_v5 = vld [vmem:[#allocation3 + $0x70] sm:$0xff]  ;;  %v2976_v13 = vadd.f32 %v2968_v62, %v2948_v35  ;;  %v2860_v20 = vmul.f32 %v7832_v55, %v2848_v10  ;;  %v2830_v9 = vmul.f32 %v7818_v61, %v2818_v48 }
 0x32f   : > { %v3190_v34 = vmul.f32 %v7874_v38, %v3170_v59  ;;  %v3192_v22 = vmul.f32 %v7874_v38, %v3172_v21  ;;  %v2812_v41 = vadd.f32 %v2804_v28, %v2784_v24  ;;  %v2844_v3 = vld [vmem:[#allocation3 + $0x71] sm:$0xff]  ;;  %v2858_v42 = vmul.f32 %v7832_v55, %v2846_v46 }
 0x330   : > { %v2952_v50 = vadd.f32 %v2944_v14, %v2924_v17  ;;  %v2876_v25 = vld [vmem:[#allocation3 + $0x112] sm:$0xff]  ;;  %v2838_v28 = vadd.f32 %v2830_v9, %v8012_v33  ;;  %v2886_v57 = vmul.f32 %v7855_v23, %v2874_v45  ;;  %v2828_v35 = vmul.f32 %v7818_v61, %v2816_v5 }
 0x331   : > { %v3206_v26 = vadd.f32 %v3190_v34, %v7883_v43  ;;  %v3208_v49 = vadd.f32 %v3192_v22, %v7885_v4  ;;  %v2840_v58 = vadd.f32 %v2832_v47, %v2812_v41  ;;  %v2814_v52 = vld [vmem:[#allocation3 + $0x30] sm:$0xff]  ;;  %v2856_v4 = vmul.f32 %v7832_v55, %v2844_v3  ;;  %v2901_v34 = vld [vmem:[#allocation3 + $0x80] sm:$0xff] }
 0x332   : > { %v2980_v43 = vadd.f32 %v2972_v6, %v2952_v50  ;;  %v2872_v33 = vld [vmem:[#allocation3 + $0x72] sm:$0xff]  ;;  %v8828_v62 = vmov 0.0   ;;  %v2866_v21 = vadd.f32 %v2858_v42, %v2838_v28  ;;  %v2836_v27 = vadd.f32 %v2828_v35, %v2808_v16  ;;  %v2929_v45 = vld [vmem:[#allocation3 + $0x81] sm:$0xff] }
 0x333   : > { %vm3222_vm15 = vcmp.gt.f32.partialorder %v3206_v26, 0.5  ;;  %vm3224_vm0 = vcmp.gt.f32.partialorder %v3208_v49, 0.5  ;;  %3270 = vst [vmem:[%s8716_s23 + $0x2] sm:$0x3] %v3206_v26  ;;  %3272 = vst [vmem:[%s8716_s23 + $0x6] sm:$0x3] %v3208_v49  ;;  %v2888_v10 = vmul.f32 %v7855_v23, %v2876_v25  ;;  %v2868_v48 = vadd.f32 %v2860_v20, %v2840_v58 }
 0x334   : > { %v2842_v47 = vld [vmem:[#allocation3 + $0x31] sm:$0xff]  ;;  %v4592_v59 = vsel %vm3222_vm15, 1.0, %v8828_v62  ;;  %v4594_v5 = vsel %vm3224_vm0, 1.0, %v8828_v62  ;;  %v3025_v24 = vrot.slane %v2980_v43, 7  ;;  %v2826_v14 = vmul.f32 %v7818_v61, %v2814_v52  ;;  %v2905_v6 = vld [vmem:[#allocation3 + $0x120] sm:$0xff] }
 0x335   : > { %4608 = vst [vmem:[%s8716_s23 + $0x22] sm:$0x3] %v4592_v59  ;;  %4610 = vst [vmem:[%s8716_s23 + $0x26] sm:$0x3] %v4594_v5  ;;  %v2894_v22 = vadd.f32 %v2886_v57, %v2866_v21  ;;  %v2864_v41 = vadd.f32 %v2856_v4, %v2836_v27  ;;  %v2884_v17 = vmul.f32 %v7855_v23, %v2872_v33  ;;  %v2870_v46 = vld [vmem:[#allocation3 + $0x32] sm:$0xff]  ;;  %v2933_v25 = vld [vmem:[#allocation3 + $0x121] sm:$0xff] }
 0x336   : > { %v2854_v16 = vmul.f32 %v7832_v55, %v2842_v47  ;;  %v3026_v9 = vsel %vm2985_vm11, %v3025_v24, %v2976_v13  ;;  %v3030_v3 = vsel %vm2989_vm12, %v3025_v24, %v2976_v13  ;;  %v3034_v26 = vsel %vm2994_vm13, %v3025_v24, %v2976_v13  ;;  %v3149_v49 = vld [vmem:[#allocation4] sm:$0x3]  ;;  %v3151_v28 = vld [vmem:[#allocation4 + $0x4] sm:$0x3] }
 0x337   : > { %v3038_v20 = vsel %vm2999_vm14, %v3025_v24, %v2976_v13  ;;  %3029 = vst [vmem:[#allocation4 + $0x10] sm:$0x3] %v3026_v9  ;;  %3033 = vst [vmem:[#allocation4 + $0x10] sm:$0xc] %v3030_v3  ;;  %v2923_v61 = vadd.f32 %v8029_v29, %v2894_v22  ;;  %v2892_v50 = vadd.f32 %v2884_v17, %v2864_v41  ;;  %v2957_v4 = vld [vmem:[#allocation3 + $0x82] sm:$0xff] }
 0x338   : > { %3037 = vst [vmem:[#allocation4 + $0x10] sm:$0x30] %v3034_v26  ;;  %3041 = vst [vmem:[#allocation4 + $0x10] sm:$0xc0] %v3038_v20  ;;  %v2834_v55 = vadd.f32 %v2826_v14, %v8033_v1  ;;  %v2913_v58 = vmul.f32 %v7866_v30, %v2901_v34  ;;  %v2896_v42 = vadd.f32 %v2888_v10, %v2868_v48  ;;  %v2961_v29 = vld [vmem:[#allocation3 + $0x122] sm:$0xff] }
 0x339   : > { %v2882_v57 = vmul.f32 %v7855_v23, %v2870_v46  ;;  %v2941_v35 = vmul.f32 %v7871_v60, %v2929_v45  ;;  %v2917_v13 = vmul.f32 %v7866_v30, %v2905_v6  ;;  %v2951_v52 = vadd.f32 %v8039_v54, %v2923_v61 }
 0x33a   : > { %v2862_v43 = vadd.f32 %v2854_v16, %v2834_v55  ;;  %v2921_v33 = vadd.f32 %v2913_v58, %v2892_v50  ;;  %v3169_v47 = vadd.f32 %v8049_v63, %v3149_v49  ;;  %v2911_v1 = vmul.f32 %v7866_v30, %v7974_v37  ;;  %v8145_v50 = vld [vmem:[%s8716_s23 + $0x38] sm:$0x3] }
 0x33b   : > { %v2925_v59 = vadd.f32 %v2917_v13, %v2896_v42  ;;  %v2945_v5 = vmul.f32 %v7871_v60, %v2933_v25  ;;  %v3171_v23 = vadd.f32 %v8049_v63, %v3151_v28  ;;  %v2979_v21 = vadd.f32 %v8042_v39, %v2951_v52  ;;  %v8155_v25 = vld [vmem:[%s8716_s23 + $0x3a] sm:$0x3] }
 0x33c   : > { %v2890_v27 = vadd.f32 %v2882_v57, %v2862_v43  ;;  %v2949_v24 = vadd.f32 %v2941_v35, %v2921_v33  ;;  %v3189_v54 = vmul.f32 %v7874_v38, %v3169_v47  ;;  %v2969_v10 = vmul.f32 %v7951_v18, %v2957_v4  ;;  %v5122_v47 = vld [vmem:[%s8704_s11 + $0x70] sm:$0xff]  }
 0x33d   : > { %v2953_v48 = vadd.f32 %v2945_v5, %v2925_v59  ;;  %v2973_v14 = vmul.f32 %v7951_v18, %v2961_v29  ;;  %v3191_v34 = vmul.f32 %v7874_v38, %v3171_v23  ;;  %v2939_v30 = vmul.f32 %v7871_v60, %v7976_v15  ;;  %v5120_v60 = vld [vmem:[%s8704_s11 + $0x78] sm:$0xff]   ;;  %v5123_v23 = vld [vmem:[%s8704_s11 + $0x30] sm:$0xff]  }
 0x33e   : > { %v3006_v37 = vrot.slane %v2979_v21, 7  ;;  %v2919_v22 = vadd.f32 %v2911_v1, %v2890_v27  ;;  %v3205_v41 = vadd.f32 %v3189_v54, %v7902_v19  ;;  %v2967_v39 = vmul.f32 %v7951_v18, %v7988_v8  ;;  %v3158_v17 = vld [vmem:[#allocation4 + $0x12] sm:$0x3]  ;;  %v3157_v9 = vld [vmem:[#allocation4 + $0x10] sm:$0x3] }
 0x33f   : > { %v3160_v16 = vld [vmem:[#allocation4 + $0x16] sm:$0x3]  ;;  %v2977_v46 = vadd.f32 %v2969_v10, %v2949_v24  ;;  %v2981_v45 = vadd.f32 %v2973_v14, %v2953_v48  ;;  %v3207_v6 = vadd.f32 %v3191_v34, %v7904_v36  ;;  %v3178_v3 = vadd.f32 %v8049_v63, %v3158_v17  ;;  %v5121_v36 = vld [vmem:[%s8704_s11 + $0x38] sm:$0xff]   ;;  %v3159_v13 = vld [vmem:[#allocation4 + $0x14] sm:$0x3] }
 0x340   : > { %v3180_v26 = vadd.f32 %v8049_v63, %v3160_v16  ;;  %v2947_v20 = vadd.f32 %v2939_v30, %v2919_v22  ;;  %vm3221_vm1 = vcmp.gt.f32.partialorder %v3205_v41, 0.5  ;;  %3269 = vst [vmem:[%s8716_s23] sm:$0x3] %v3205_v41  ;;  %v3177_v15 = vadd.f32 %v8049_v63, %v3157_v9  ;;  %v4588_v29 = vld [vmem:[%s8716_s23 + $0x3c] sm:$0x3]  ;;  %v3078_v1 = vld [vmem:[%s8716_s23 + $0x1e] sm:$0x3] }
 0x341   : > { %v3044_v19 = vrot.slane %v2981_v45, 7  ;;  %v4591_v18 = vsel %vm3221_vm1, 1.0, %v8828_v62  ;;  %vm4633_vm2 = vmpackc.low %vm3221_vm1, %vm3221_vm1  ;;  %vm3223_vm3 = vcmp.gt.f32.partialorder %v3207_v6, 0.5  ;;  %3271 = vst [vmem:[%s8716_s23 + $0x4] sm:$0x3] %v3207_v6  ;;  %v3198_v8 = vmul.f32 %v7874_v38, %v3178_v3  ;;  %v5126_v16 = vld [vmem:[%s8704_s11 + $0x60] sm:$0xff]  }
 0x342   : > { %v3200_v49 = vmul.f32 %v7874_v38, %v3180_v26  ;;  %v2975_v61 = vadd.f32 %v2967_v39, %v2947_v20  ;;  %4607 = vst [vmem:[%s8716_s23 + $0x20] sm:$0x3] %v4591_v18  ;;  %v5233_v55 = vmov 1.0|1.0   ;;  %v4593_v58 = vsel %vm3223_vm3, 1.0, %v8828_v62  ;;  %vm4639_vm4 = vmpackc.low %vm3223_vm3, %vm3223_vm3  ;;  %v5125_v39 = vld [vmem:[%s8704_s11 + $0x28] sm:$0xff]  }
 0x343   : > { %4876 = vmatmul.mubr.msk.bf16.vlgmr.msra.gmra.mxu0 %vm4633_vm2, %v5233_v55  ;;  %v3045_v28 = vsel %vm2985_vm11, %v3044_v19, %v2977_v46  ;;  %v3049_v42 = vsel %vm2989_vm12, %v3044_v19, %v2977_v46  ;;  %v3053_v57 = vsel %vm2994_vm13, %v3044_v19, %v2977_v46  ;;  %v3057_v35 = vsel %vm2999_vm14, %v3044_v19, %v2977_v46  ;;  %v4589_v59 = vld [vmem:[%s8716_s23 + $0x3e] sm:$0x3]  ;;  %v8834_v9 = vld [vmem:[#allocation19_spill] sm:$0xff]  ;;  %v8836_v26 = vld [vmem:[#allocation16_spill] sm:$0xff] }
 0x344   : > { %4609 = vst [vmem:[%s8716_s23 + $0x24] sm:$0x3] %v4593_v58  ;;  %4896 = vmatmul.mubr.msk.bf16.vlgmr.msra.gmra.mxu1 %vm4639_vm4, %v5233_v55  ;;  %v3214_v52 = vadd.f32 %v3198_v8, %v7898_v2  ;;  %v3216_v43 = vadd.f32 %v3200_v49, %v7900_v0  ;;  %v3007_v4 = vsel %vm2985_vm11, %v3006_v37, %v2975_v61  ;;  %3048 = vst [vmem:[#allocation4 + $0x18] sm:$0x3] %v3045_v28 }
 0x345   : > { %v3011_v33 = vsel %vm2989_vm12, %v3006_v37, %v2975_v61  ;;  %3052 = vst [vmem:[#allocation4 + $0x18] sm:$0xc] %v3049_v42  ;;  %3056 = vst [vmem:[#allocation4 + $0x18] sm:$0x30] %v3053_v57  ;;  %4900 = vmatpush3.bf16.msra.mxu0 %v5120_v60  ;;  %v3015_v2 = vsel %vm2994_vm13, %v3006_v37, %v2975_v61  ;;  %v3019_v0 = vsel %vm2999_vm14, %v3006_v37, %v2975_v61  ;;  %v5124_v37 = vld [vmem:[%s8704_s11 + $0x68] sm:$0xff]   ;;  %v5127_v57 = vld [vmem:[%s8704_s11 + $0x20] sm:$0xff]  }
 0x346   : > { %3060 = vst [vmem:[#allocation4 + $0x18] sm:$0xc0] %v3057_v35  ;;  %3010 = vst [vmem:[#allocation4 + $0x8] sm:$0x3] %v3007_v4  ;;  %v3128_v5 = vsub.f32 1.0, %v8145_v50  ;;  %4920 = vmatpush3.bf16.msra.mxu1 %v5121_v36  ;;  %4901 = vmatprep.subr.bf16.mxu0 %v8828_v62  ;;  %v3197_v21 = vmul.f32 %v7874_v38, %v3177_v15  ;;  %vm3230_vm5 = vcmp.gt.f32.partialorder %v3214_v52, 0.5 }
 0x347   : > { %3014 = vst [vmem:[#allocation4 + $0x8] sm:$0xc] %v3011_v33  ;;  %vm3232_vm7 = vcmp.gt.f32.partialorder %v3216_v43, 0.5  ;;  %3278 = vst [vmem:[%s8716_s23 + $0x12] sm:$0x3] %v3214_v52  ;;  %v3129_v27 = vsub.f32 1.0, %v8155_v25  ;;  %4921 = vmatprep.subr.bf16.mxu1 %v8828_v62  ;;  %4915 = vmatprep.mubr.msk.bf16.mxu0 %vm5232_vm6, %v8828_v62  ;;  %v3179_v24 = vadd.f32 %v8049_v63, %v3159_v13 }
 0x348   : > { %3280 = vst [vmem:[%s8716_s23 + $0x16] sm:$0x3] %v3216_v43  ;;  %3018 = vst [vmem:[#allocation4 + $0x8] sm:$0x30] %v3015_v2  ;;  %v4600_v54 = vsel %vm3230_vm5, 1.0, %v8828_v62  ;;  %v4602_v10 = vsel %vm3232_vm7, 1.0, %v8828_v62  ;;  %4935 = vmatprep.mubr.msk.bf16.mxu1 %vm5232_vm6, %v8828_v62  ;;  %v8205_v14 = vadd.f32 %v3197_v21, %v7970_v44  ;;  %v3115_v34 = vmul.f32 %v7807_v51, %v3078_v1 }
 0x349   : > { %3022 = vst [vmem:[#allocation4 + $0x8] sm:$0xc0] %v3019_v0  ;;  %v3130_v48 = vsub.f32 1.0, %v4588_v29  ;;  %4616 = vst [vmem:[%s8716_s23 + $0x32] sm:$0x3] %v4600_v54  ;;  %v3131_v30 = vsub.f32 1.0, %v4589_v59  ;;  %4902 = vmatpush3.bf16.msra.mxu0 %v5122_v47  ;;  %v3199_v22 = vmul.f32 %v7874_v38, %v3179_v24 }
 0x34a   : > { %4618 = vst [vmem:[%s8716_s23 + $0x36] sm:$0x3] %v4602_v10  ;;  %v8829_v44 = vsub.f32 1.0, %v7893_v7  ;;  %4922 = vmatpush3.bf16.msra.mxu1 %v5123_v23  ;;  %4903 = vmatprep.subr.bf16.mxu0 %v8828_v62  ;;  %vm3229_vm8 = vcmp.gt.f32.partialorder %v8205_v14, 0.5  ;;  %3277 = vst [vmem:[%s8716_s23 + $0x10] sm:$0x3] %v8205_v14 }
 0x34b   : > { %v8830_v51 = vsub.f32 1.0, %v7927_v12  ;;  %v8831_v7 = vsub.f32 1.0, %v7932_v32  ;;  %4923 = vmatprep.subr.bf16.mxu1 %v8828_v62  ;;  %v4599_v46 = vsel %vm3229_vm8, 1.0, %v8828_v62  ;;  %v8244_v45 = vadd.f32 %v3199_v22, %v7981_v40  ;;  %v8832_v12 = vld [vmem:[#allocation17_spill] sm:$0xff]  ;;  %v3161_v60 = vld [vmem:[#allocation4 + $0x18] sm:$0x3]  ;;  %vm4666_vm7 = vmpackc.low %vm3229_vm8, %vm3229_vm8 }
 0x34c   : > { %v3136_v41 = vmul.f32 %v8829_v44, %v7915_v53  ;;  %v3144_v32 = vmul.f32 %v3128_v5, %v8834_v9  ;;  %v3146_v20 = vmul.f32 %v3130_v48, %v8836_v26  ;;  %v3162_v19 = vld [vmem:[#allocation4 + $0x1a] sm:$0x3]  ;;  %v3163_v18 = vld [vmem:[#allocation4 + $0x1c] sm:$0x3]  ;;  %4615 = vst [vmem:[%s8716_s23 + $0x30] sm:$0x3] %v4599_v46  ;;  %v3147_v15 = vmul.f32 %v3131_v30, %v3115_v34 }
 0x34d   : > { %v3137_v17 = vmul.f32 %v8830_v51, %v7918_v31  ;;  %v3138_v53 = vmul.f32 %v8831_v7, %v7935_v56  ;;  %v8833_v31 = vsub.f32 1.0, %v8832_v12  ;;  %v8835_v56 = vld [vmem:[#allocation18_spill] sm:$0xff]  ;;  %v3164_v8 = vld [vmem:[#allocation4 + $0x1e] sm:$0x3]  ;;  %v3181_v49 = vadd.f32 %v8049_v63, %v3161_v60  ;;  %4904 = vmatpush3.bf16.msra.mxu0 %v5124_v37  ;;  %3279 = vst [vmem:[%s8716_s23 + $0x14] sm:$0x3] %v8244_v45 }
 0x34e   : > { %v3145_v3 = vmul.f32 %v3129_v27, %v8835_v56  ;;  %v3153_v36 = vld [vmem:[#allocation4 + $0x8] sm:$0x3]  ;;  %v3154_v40 = vld [vmem:[#allocation4 + $0xa] sm:$0x3]  ;;  %v3183_v61 = vadd.f32 %v8049_v63, %v3163_v18  ;;  %v3184_v42 = vadd.f32 %v8049_v63, %v3164_v8  ;;  %4924 = vmatpush3.bf16.msra.mxu1 %v5125_v39  ;;  %4905 = vmatprep.subr.bf16.mxu0 %v8828_v62  ;;  %vm3231_vm9 = vcmp.gt.f32.partialorder %v8244_v45, 0.5  ;;  %v5128_v59 = vld [vmem:[%s8704_s11 + $0x58] sm:$0xff]  }
 0x34f   : > { %v3139_v6 = vmul.f32 %v8833_v31, %v7938_v11  ;;  %v3182_v11 = vadd.f32 %v8049_v63, %v3162_v19  ;;  %v3155_v50 = vld [vmem:[#allocation4 + $0xc] sm:$0x3]  ;;  %v3173_v25 = vadd.f32 %v8049_v63, %v3153_v36  ;;  %v3174_v28 = vadd.f32 %v8049_v63, %v3154_v40  ;;  %4925 = vmatprep.subr.bf16.mxu1 %v8828_v62  ;;  %v5129_v24 = vld [vmem:[%s8704_s11 + $0x18] sm:$0xff]   ;;  %v5130_v34 = vld [vmem:[%s8704_s11 + $0x50] sm:$0xff]  }
 0x350   : > { %v3156_v58 = vld [vmem:[#allocation4 + $0xe] sm:$0x3]  ;;  %v3175_v35 = vadd.f32 %v8049_v63, %v3155_v50  ;;  %v3201_v52 = vmul.f32 %v7874_v38, %v3181_v49  ;;  %v3203_v29 = vmul.f32 %v7874_v38, %v3183_v61  ;;  %v3204_v47 = vmul.f32 %v7874_v38, %v3184_v42  ;;  %v5135_v46 = vld [vmem:[%s8704_s11] sm:$0xff]   ;;  %v4638_v26 = vld [vmem:[%s8717_s24 + $0xa] sm:$0x3] }
 0x351   : > { %v3176_v13 = vadd.f32 %v8049_v63, %v3156_v58  ;;  %v3202_v43 = vmul.f32 %v7874_v38, %v3182_v11  ;;  %v3193_v4 = vmul.f32 %v7874_v38, %v3173_v25  ;;  %v3194_v33 = vmul.f32 %v7874_v38, %v3174_v28  ;;  %4906 = vmatpush3.bf16.msra.mxu0 %v5126_v16  ;;  %v5132_v7 = vld [vmem:[%s8704_s11 + $0x48] sm:$0xff]   ;;  %v5134_v16 = vld [vmem:[%s8704_s11 + $0x40] sm:$0xff]   ;;  %vm4683_vm8 = vmpackc.low %vm3231_vm9, %vm3231_vm9 }
 0x352   : > { %v3195_v2 = vmul.f32 %v7874_v38, %v3175_v35  ;;  %v3217_v1 = vadd.f32 %v3201_v52, %v3144_v32  ;;  %v3219_v21 = vadd.f32 %v3203_v29, %v3146_v20  ;;  %v3220_v27 = vadd.f32 %v3204_v47, %v3147_v15  ;;  %4926 = vmatpush3.bf16.msra.mxu1 %v5127_v57  ;;  %v3302_v12 = vld [vmem:[%s8837_s4 + $0x1] sm:$0x1]  ;;  %v8838_v31 = vld [vmem:[#allocation15_spill] sm:$0xff]  ;;  %v4623_v32 = vld [vmem:[%s8717_s24 + $0x8] sm:$0x3] }
 0x353   : > { %v3196_v0 = vmul.f32 %v7874_v38, %v3176_v13  ;;  %v3218_v63 = vadd.f32 %v3202_v43, %v3145_v3  ;;  %v3209_v5 = vadd.f32 %v3193_v4, %v3136_v41  ;;  %v3210_v23 = vadd.f32 %v3194_v33, %v3137_v17  ;;  %4907 = vmatprep.subr.bf16.mxu0 %v8828_v62  ;;  %v5131_v41 = vld [vmem:[%s8704_s11 + $0x10] sm:$0xff]   ;;  %v3320_v9 = vld [vmem:[%s8717_s24] sm:$0x3]  ;;  %v4637_v3 = vld [vmem:[%s8717_s24 + $0x2] sm:$0x3] }
 0x354   : > { %v3211_v54 = vadd.f32 %v3195_v2, %v3138_v53  ;;  %vm3233_vm10 = vcmp.gt.f32.partialorder %v3217_v1, 0.5  ;;  %3281 = vst [vmem:[%s8716_s23 + $0x18] sm:$0x3] %v3217_v1  ;;  %4927 = vmatprep.subr.bf16.mxu1 %v8828_v62  ;;  %vm3235_vm14 = vcmp.gt.f32.partialorder %v3219_v21, 0.5  ;;  %vm3236_vm15 = vcmp.gt.f32.partialorder %v3220_v27, 0.5  ;;  %v5133_v53 = vld [vmem:[%s8704_s11 + $0x8] sm:$0xff]  }
 0x355   : > { %v3212_v10 = vadd.f32 %v3196_v0, %v3139_v6  ;;  %vm3234_vm11 = vcmp.gt.f32.partialorder %v3218_v63, 0.5  ;;  %3282 = vst [vmem:[%s8716_s23 + $0x1a] sm:$0x3] %v3218_v63  ;;  %vm3225_vm12 = vcmp.gt.f32.partialorder %v3209_v5, 0.5  ;;  %vm3226_vm13 = vcmp.gt.f32.partialorder %v3210_v23, 0.5  ;;  %4908 = vmatpush3.bf16.msra.mxu0 %v5128_v59  ;;  %v5159_v47 = vld [vmem:[%s8812_s10 + $0x38] sm:$0xff]  }
 0x356   : > { %3273 = vst [vmem:[%s8716_s23 + $0x8] sm:$0x3] %v3209_v5  ;;  %3274 = vst [vmem:[%s8716_s23 + $0xa] sm:$0x3] %v3210_v23  ;;  %vm3227_vm0 = vcmp.gt.f32.partialorder %v3211_v54, 0.5  ;;  %v4595_v38 = vsel %vm3225_vm12, 1.0, %v8828_v62  ;;  %4928 = vmatpush3.bf16.msra.mxu1 %v5129_v24  ;;  %4909 = vmatprep.subr.bf16.mxu0 %v8828_v62  ;;  %v8385_v6 = vrot.slane %v3302_v12, %v8838_v31 }
 0x357   : > { %3283 = vst [vmem:[%s8716_s23 + $0x1c] sm:$0x3] %v3219_v21  ;;  %3284 = vst [vmem:[%s8716_s23 + $0x1e] sm:$0x3] %v3220_v27  ;;  %vm3228_vm1 = vcmp.gt.f32.partialorder %v3212_v10, 0.5  ;;  %v4596_v48 = vsel %vm3226_vm13, 1.0, %v8828_v62  ;;  %4929 = vmatprep.subr.bf16.mxu1 %v8828_v62 }
 0x358   : > { %3275 = vst [vmem:[%s8716_s23 + $0xc] sm:$0x3] %v3211_v54  ;;  %3276 = vst [vmem:[%s8716_s23 + $0xe] sm:$0x3] %v3212_v10  ;;  %v4597_v30 = vsel %vm3227_vm0, 1.0, %v8828_v62  ;;  %v4598_v37 = vsel %vm3228_vm1, 1.0, %v8828_v62  ;;  %v3327_v20 = vmul.f32 %v8385_v6, %v3320_v9  ;;  %v3456_v18 = vmul.f32 %v4637_v3, %v8385_v6 }
 0x359   : > { %4611 = vst [vmem:[%s8716_s23 + $0x28] sm:$0x3] %v4595_v38  ;;  %4612 = vst [vmem:[%s8716_s23 + $0x2a] sm:$0x3] %v4596_v48  ;;  %v4603_v22 = vsel %vm3233_vm10, 1.0, %v8828_v62  ;;  %v4604_v44 = vsel %vm3234_vm11, 1.0, %v8828_v62  ;;  %4910 = vmatpush3.bf16.msra.mxu0 %v5130_v34 }
 0x35a   : > { %4613 = vst [vmem:[%s8716_s23 + $0x2c] sm:$0x3] %v4597_v30  ;;  %4614 = vst [vmem:[%s8716_s23 + $0x2e] sm:$0x3] %v4598_v37  ;;  %v4605_v39 = vsel %vm3235_vm14, 1.0, %v8828_v62  ;;  %v4606_v51 = vsel %vm3236_vm15, 1.0, %v8828_v62  ;;  %4930 = vmatpush3.bf16.msra.mxu1 %v5131_v41  ;;  %4911 = vmatprep.subr.bf16.mxu0 %v8828_v62 }
 0x35b   : > { %4619 = vst [vmem:[%s8716_s23 + $0x38] sm:$0x3] %v4603_v22  ;;  %4620 = vst [vmem:[%s8716_s23 + $0x3a] sm:$0x3] %v4604_v44  ;;  %v4601_v17 = vsel %vm3231_vm9, 1.0, %v8828_v62  ;;  %4931 = vmatprep.subr.bf16.mxu1 %v8828_v62  ;;  %v3330_v56 = vsub.f32 1.0, %v3302_v12 }
 0x35c   : > { %4621 = vst [vmem:[%s8716_s23 + $0x3c] sm:$0x3] %v4605_v39  ;;  %4622 = vst [vmem:[%s8716_s23 + $0x3e] sm:$0x3] %v4606_v51  ;;  %v3328_v60 = vsub.f32 1.0, %v4623_v32  ;;  %v3457_v36 = vsub.f32 1.0, %v4638_v26 }
 0x35d   : > { %4617 = vst [vmem:[%s8716_s23 + $0x34] sm:$0x3] %v4601_v17  ;;  %4912 = vmatpush3.bf16.msra.mxu0 %v5132_v7  ;;  %v8403_v19 = vld [vmem:[%s8837_s4] ss:$0 sm:$0xff]  ;;  %v8407_v40 = vrot.slane %v3330_v56, %v8838_v31  ;;  %v5160_v2 = vld [vmem:[%s8812_s10 + $0x30] sm:$0xff]   ;;  %v5161_v0 = vld [vmem:[%s8812_s10 + $0x28] sm:$0xff]  }
 0x35e   : > { %4932 = vmatpush3.bf16.msra.mxu1 %v5133_v53  ;;  %4913 = vmatprep.subr.bf16.mxu0 %v8828_v62  ;;  %v3329_v8 = vmul.f32 %v3328_v60, %v3327_v20  ;;  %v3458_v61 = vmul.f32 %v3457_v36, %v3456_v18  ;;  %v5162_v1 = vld [vmem:[%s8812_s10 + $0x20] sm:$0xff]   ;;  %v5163_v63 = vld [vmem:[%s8812_s10 + $0x18] sm:$0xff]   ;;  %v5164_v59 = vld [vmem:[%s8812_s10 + $0x10] sm:$0xff]   ;;  %vm4043_vm9 = vcmask 261120   ;;  %vm4110_vm13 = vcmask 254976   ;;  %s5171_s4 = sshll.u32 %s5234_s9, 4  ;;  %s5172_s4 = int_to_ptr.vmem [resolvable:$false] %s5171_s4 }
 0x35f   : > { %4933 = vmatprep.subr.bf16.mxu1 %v8828_v62  ;;  %v5165_v5 = vld [vmem:[%s8812_s10 + $0x8] sm:$0xff]   ;;  %v5166_v23 = vld [vmem:[%s8812_s10] sm:$0xff]   ;;  %v5136_v14 = vld [vmem:[%s8704_s11 + $0xb8] sm:$0xff]   ;;  %vm4204_vm15 = vcmask 74752   ;;  %s5173_s8 = scalar_lea.vmem %s5172_s4, 64  ;;  %p5174_p1 = scmp.lt.s32.totalorder %s4235_s7, %s5172_s4 }
 0x360   : > { %v5137_v21 = vld [vmem:[%s8704_s11 + $0xb0] sm:$0xff]   ;;  %v5138_v45 = vld [vmem:[%s8704_s11 + $0xa8] sm:$0xff]   ;;  %v5139_v27 = vld [vmem:[%s8704_s11 + $0xa0] sm:$0xff]   ;;  %p5175_p2 = scmp.lt.s32.totalorder %s5173_s8, %s5167_s18 }
 0x361   : > { %4914 = vmatpush3.bf16.msra.mxu0 %v5134_v16  ;;  %v5140_v24 = vld [vmem:[%s8704_s11 + $0x98] sm:$0xff]   ;;  %v5141_v54 = vld [vmem:[%s8704_s11 + $0x90] sm:$0xff]   ;;  %v5142_v10 = vld [vmem:[%s8704_s11 + $0x88] sm:$0xff]  }
 0x362   : > { %4934 = vmatpush3.bf16.msra.mxu1 %v5135_v46  ;;  %4939 = vmatprep.subr.bf16.mxu0 %v8828_v62  ;;  %v5143_v38 = vld [vmem:[%s8704_s11 + $0x80] sm:$0xff]   ;;  %v5150_v48 = vld [vmem:[%s8705_s12 + $0x8] sm:$0xff]   ;;  %p5176_p3 = por %p5175_p2, %p5174_p1 }
 0x363   : > { %4959 = vmatprep.subr.bf16.mxu1 %v8828_v62  ;;  %v5152_v34 = vld [vmem:[%s8705_s12] sm:$0xff]   ;;  %v4665_v12 = vld [vmem:[%s8717_s24 + $0xc] sm:$0x3] }
 0x364   : > { %v8527_v30 = vld [vmem:[%s8718_s25 + $0x2] sm:$0x3]  ;;  %v4664_v46 = vld [vmem:[%s8717_s24 + $0x4] sm:$0x3]  ;;  %v3705_v32 = vsub.f32 1.0, %v4665_v12  ;;  %p5177_p4 = pnand %p5176_p3, %p5170_p0 }
 0x365   : > { %v4026_v37 = vpack.c.bf16 %v8527_v30, %v8527_v30  ;;  %v3704_v9 = vmul.f32 %v4664_v46, %v8385_v6 }
 0x367   : > { %v3706_v3 = vmul.f32 %v3705_v32, %v3704_v9 }
 0x403   : > { %v3417_v15 = vpop.f32.mrf.mxu0 }
 0x404   : > { %v3418_v49 = vadd.f32 %v8403_v19, %v3417_v15  ;;  %v3493_v11 = vpop.f32.mrf.mxu1 }
 0x405   : > { %v3494_v50 = vadd.f32 %v8403_v19, %v3493_v11  ;;  %v4877_v58 = vpop.f32.mrf.mxu0  ;;  %v5145_v11 = vld [vmem:[%s8704_s11 + $0xf0] sm:$0xff]  }
 0x406   : > { %v3427_v25 = vmul.f32 %v8407_v40, %v3418_v49  ;;  %v4897_v28 = vpop.f32.mrf.mxu1  ;;  %v5148_v58 = vld [vmem:[%s8704_s11 + $0xd8] sm:$0xff]  }
 0x407   : > { %v3499_v42 = vmul.f32 %v3494_v50, %v8407_v40  ;;  %v3420_v57 = vpop.f32.mrf.mxu0  ;;  %v5147_v50 = vld [vmem:[%s8704_s11 + $0xe0] sm:$0xff]  }
 0x408   : > { %v3428_v35 = vadd.f32 %v3427_v25, %v3329_v8  ;;  %v3496_v13 = vpop.f32.mrf.mxu1  ;;  %v5144_v8 = vld [vmem:[%s8704_s11 + $0xf8] sm:$0xff]   ;;  %v5149_v25 = vld [vmem:[%s8704_s11 + $0xd0] sm:$0xff]   ;;  %v4681_v28 = vld [vmem:[%s8717_s24 + $0x6] sm:$0x3] }
 0x409   : > { %v3500_v52 = vadd.f32 %v3499_v42, %v3458_v61  ;;  %v4878_v43 = vpop.f32.mrf.mxu0  ;;  %v5146_v61 = vld [vmem:[%s8704_s11 + $0xe8] sm:$0xff]   ;;  %v3865_v57 = vmul.f32 %v4681_v28, %v8385_v6 }
 0x40a   : > { %vm3429_vm2 = vcmp.gt.f32.partialorder %v3428_v35, 0.5  ;;  %3432 = vst [vmem:[%s8717_s24] sm:$0x3] %v3428_v35  ;;  %v4898_v4 = vpop.f32.mrf.mxu1  ;;  %v4682_v42 = vld [vmem:[%s8717_s24 + $0xe] sm:$0x3] }
 0x40b   : > { %v4635_v33 = vsel %vm3429_vm2, 1.0, %v8828_v62  ;;  %vm3501_vm3 = vcmp.gt.f32.partialorder %v3500_v52, 0.5  ;;  %4642 = vst [vmem:[%s8717_s24 + $0x2] sm:$0x3] %v3500_v52  ;;  %vm4662_vm4 = vmpackc.low %vm3429_vm2, %vm3429_vm2  ;;  %v3866_v35 = vsub.f32 1.0, %v4682_v42  ;;  %v5151_v13 = vld [vmem:[%s8704_s11 + $0xc8] sm:$0xff]  }
 0x40c   : > { %4636 = vst [vmem:[%s8717_s24 + $0x8] sm:$0x3] %v4635_v33  ;;  %v4641_v29 = vsel %vm3501_vm3, 1.0, %v8828_v62  ;;  %vm4652_vm5 = vmpackc.low %vm3501_vm3, %vm3501_vm3  ;;  %4936 = vmatmul.mubr.msk.bf16.vlgmr.msra.gmra.mxu1 %vm4662_vm4, %v5233_v55 }
 0x40d   : > { %4643 = vst [vmem:[%s8717_s24 + $0xa] sm:$0x3] %v4641_v29  ;;  %4916 = vmatmul.mubr.msk.bf16.vlgmr.msra.gmra.mxu0 %vm4652_vm5, %v5233_v55  ;;  %4975 = vmatprep.mubr.msk.bf16.mxu1 %vm5232_vm6, %v8828_v62  ;;  %v3867_v43 = vmul.f32 %v3866_v35, %v3865_v57  ;;  %v5153_v29 = vld [vmem:[%s8704_s11 + $0xc0] sm:$0xff]  }
 0x40e   : > { %4940 = vmatpush3.bf16.msra.mxu0 %v5159_v47  ;;  %4955 = vmatprep.mubr.msk.bf16.mxu0 %vm5232_vm6, %v8828_v62 }
 0x40f   : > { %4941 = vmatprep.subr.bf16.mxu0 %v8828_v62  ;;  %4960 = vmatpush3.bf16.msra.mxu1 %v5136_v14  ;;  %v4116_v14 = vld [vmem:[%s8707_s14 + $0x8] sm:$0xff] }
 0x410   : > { %4961 = vmatprep.subr.bf16.mxu1 %v8828_v62 }
 0x412   : > { %4942 = vmatpush3.bf16.msra.mxu0 %v5160_v2 }
 0x413   : > { %4943 = vmatprep.subr.bf16.mxu0 %v8828_v62  ;;  %4962 = vmatpush3.bf16.msra.mxu1 %v5137_v21 }
 0x414   : > { %4963 = vmatprep.subr.bf16.mxu1 %v8828_v62 }
 0x416   : > { %4944 = vmatpush3.bf16.msra.mxu0 %v5161_v0 }
 0x417   : > { %4945 = vmatprep.subr.bf16.mxu0 %v8828_v62  ;;  %4964 = vmatpush3.bf16.msra.mxu1 %v5138_v45 }
 0x418   : > { %4965 = vmatprep.subr.bf16.mxu1 %v8828_v62 }
 0x41a   : > { %4946 = vmatpush3.bf16.msra.mxu0 %v5162_v1 }
 0x41b   : > { %4947 = vmatprep.subr.bf16.mxu0 %v8828_v62  ;;  %4966 = vmatpush3.bf16.msra.mxu1 %v5139_v27 }
 0x41c   : > { %4967 = vmatprep.subr.bf16.mxu1 %v8828_v62 }
 0x41e   : > { %4948 = vmatpush3.bf16.msra.mxu0 %v5163_v63 }
 0x41f   : > { %4949 = vmatprep.subr.bf16.mxu0 %v8828_v62  ;;  %4968 = vmatpush3.bf16.msra.mxu1 %v5140_v24 }
 0x420   : > { %4969 = vmatprep.subr.bf16.mxu1 %v8828_v62 }
 0x422   : > { %4950 = vmatpush3.bf16.msra.mxu0 %v5164_v59 }
 0x423   : > { %4951 = vmatprep.subr.bf16.mxu0 %v8828_v62  ;;  %4970 = vmatpush3.bf16.msra.mxu1 %v5141_v54  ;;  %v4022_v54 = vld [vmem:[%s8706_s13 + $0x1] sm:$0x1] }
 0x424   : > { %4971 = vmatprep.subr.bf16.mxu1 %v8828_v62 }
 0x426   : > { %4952 = vmatpush3.bf16.msra.mxu0 %v5165_v5 }
 0x427   : > { %4953 = vmatprep.subr.bf16.mxu0 %v8828_v62  ;;  %4972 = vmatpush3.bf16.msra.mxu1 %v5142_v10  ;;  %v4096_v10 = vrot.slane %v4022_v54, %v8838_v31 }
 0x428   : > { %4973 = vmatprep.subr.bf16.mxu1 %v8828_v62 }
 0x42a   : > { %4954 = vmatpush3.bf16.msra.mxu0 %v5166_v23 }
 0x42b   : > { %4979 = vmatprep.subr.bf16.mxu0 %v8828_v62  ;;  %4974 = vmatpush3.bf16.msra.mxu1 %v5143_v38  ;;  %v4023_v38 = vld [vmem:[%s8718_s25] sm:$0x3] }
 0x42c   : > { %4999 = vmatprep.subr.bf16.mxu1 %v8828_v62 }
 0x42d   : > { %4956 = vmatmul.mubr.msk.bf16.vlgmr.msra.gmra.mxu0 %vm4666_vm7, %v5233_v55 }
 0x42e   : > { %4980 = vmatpush3.bf16.msra.mxu0 %v5159_v47  ;;  %4995 = vmatprep.mubr.msk.bf16.mxu0 %vm5232_vm6, %v8828_v62 }
 0x42f   : > { %4981 = vmatprep.subr.bf16.mxu0 %v8828_v62 }
 0x432   : > { %4982 = vmatpush3.bf16.msra.mxu0 %v5160_v2 }
 0x433   : > { %4983 = vmatprep.subr.bf16.mxu0 %v8828_v62 }
 0x436   : > { %4984 = vmatpush3.bf16.msra.mxu0 %v5161_v0 }
 0x437   : > { %4985 = vmatprep.subr.bf16.mxu0 %v8828_v62 }
 0x43a   : > { %4986 = vmatpush3.bf16.msra.mxu0 %v5162_v1 }
 0x43b   : > { %4987 = vmatprep.subr.bf16.mxu0 %v8828_v62 }
 0x43e   : > { %4988 = vmatpush3.bf16.msra.mxu0 %v5163_v63 }
 0x43f   : > { %4989 = vmatprep.subr.bf16.mxu0 %v8828_v62 }
 0x442   : > { %4990 = vmatpush3.bf16.msra.mxu0 %v5164_v59 }
 0x443   : > { %4991 = vmatprep.subr.bf16.mxu0 %v8828_v62 }
 0x446   : > { %4992 = vmatpush3.bf16.msra.mxu0 %v5165_v5  ;;  %v4118_v5 = vld [vmem:[%s8707_s14 + $0x18] sm:$0xff] }
 0x447   : > { %4993 = vmatprep.subr.bf16.mxu0 %v8828_v62 }
 0x44a   : > { %4994 = vmatpush3.bf16.msra.mxu0 %v5166_v23  ;;  %v4117_v23 = vld [vmem:[%s8707_s14 + $0x10] sm:$0xff] }
 0x44b   : > { %5019 = vmatprep.subr.bf16.mxu0 %v8828_v62 }
 0x44d   : > { %4996 = vmatmul.mubr.msk.bf16.vlgmr.msra.gmra.mxu0 %vm4683_vm8, %v5233_v55 }
 0x44e   : > { %5023 = vmatprep.mubr.msk.bf16.mxu0 %vm5232_vm6, %v8828_v62  ;;  %5020 = vmatpush3.bf16.msra.mxu0 %v5150_v48 }
 0x44f   : > { %5021 = vmatprep.subr.bf16.mxu0 %v8828_v62 }
 0x452   : > { %5022 = vmatpush3.bf16.msra.mxu0 %v5152_v34  ;;  %v4100_v34 = vsub.f32 1.0, %v4022_v54 }
 0x453   : > { %5027 = vmatprep.subr.mxu0 %v8828_v62 }
 0x455   : > { %5024 = vmatmul.mubr.msk.bf16.vlgmr.msra.gmra.mxu0 %vm4043_vm9, %v4026_v37 }
 0x456   : > { %5035 = vmatprep.mubr.msk.f32.mxu0 %vm5232_vm6, %v8828_v62  ;;  %5028 = vmatpush3.msra.mxu0 %v4118_v5 }
 0x457   : > { %5029 = vmatprep.subr.mxu0 %v8828_v62 }
 0x458   : > { %5030 = vmatpush3.msra.mxu0 %v4117_v23 }
 0x459   : > { %5031 = vmatprep.subr.mxu0 %v8828_v62 }
 0x45a   : > { %5032 = vmatpush3.msra.mxu0 %v4116_v14 }
 0x45b   : > { %5033 = vmatprep.subr.mxu0 %v8828_v62 }
 0x4cc   : > { %v3693_v22 = vpop.f32.mrf.mxu1 }
 0x4cd   : > { %v3605_v44 = vpop.f32.mrf.mxu0 }
 0x4ce   : > { %v8535_v41 = vadd.f32 %v3693_v22, %v3605_v44  ;;  %v4937_v39 = vpop.f32.mrf.mxu1  ;;  %v4097_v44 = vmul.f32 %v4096_v10, %v4023_v38 }
 0x4cf   : > { %v4917_v51 = vpop.f32.mrf.mxu0  ;;  %v4098_v39 = vsub.f32 1.0, %v8527_v30 }
 0x4d0   : > { %v3696_v17 = vpop.f32.mrf.mxu1  ;;  %v4702_v51 = vld [vmem:[%s8706_s13] ss:$0 sm:$0xff] }
 0x4d1   : > { %v3608_v7 = vpop.f32.mrf.mxu0  ;;  %v4099_v12 = vmul.f32 %v4098_v39, %v4097_v44 }
 0x4d2   : > { %v4938_v53 = vpop.f32.mrf.mxu1 }
 0x4d3   : > { %v4918_v16 = vpop.f32.mrf.mxu0  ;;  %v4104_v53 = vrot.slane %v4100_v34, %v8838_v31  ;;  %v4705_v31 = vld [vmem:[%s8708_s15] ss:$0 sm:$0xff] }
 0x4ed   : > { %v3741_v56 = vpop.f32.mrf.mxu0 }
 0x4ee   : > { %v3742_v26 = vadd.f32 %v8403_v19, %v3741_v56 }
 0x4ef   : > { %v4957_v20 = vpop.f32.mrf.mxu0 }
 0x4f0   : > { %v3747_v60 = vmul.f32 %v3742_v26, %v8407_v40 }
 0x4f1   : > { %v3744_v18 = vpop.f32.mrf.mxu0 }
 0x4f2   : > { %v3748_v36 = vadd.f32 %v3747_v60, %v3706_v3  ;;  %v4196_v3 = vld [vmem:[%s8719_s26] sm:$0x3] }
 0x4f3   : > { %v4958_v15 = vpop.f32.mrf.mxu0 }
 0x4f4   : > { %vm3749_vm10 = vcmp.gt.f32.partialorder %v3748_v36, 0.5  ;;  %4669 = vst [vmem:[%s8717_s24 + $0x4] sm:$0x3] %v3748_v36 }
 0x4f5   : > { %v4668_v49 = vsel %vm3749_vm10, 1.0, %v8828_v62  ;;  %vm4679_vm11 = vmpackc.low %vm3749_vm10, %vm3749_vm10 }
 0x4f6   : > { %4670 = vst [vmem:[%s8717_s24 + $0xc] sm:$0x3] %v4668_v49  ;;  %4976 = vmatmul.mubr.msk.bf16.vlgmr.msra.gmra.mxu1 %vm4679_vm11, %v5233_v55 }
 0x4f7   : > { %5000 = vmatpush3.bf16.msra.mxu1 %v5144_v8  ;;  %5015 = vmatprep.mubr.msk.bf16.mxu1 %vm5232_vm6, %v8828_v62 }
 0x4f8   : > { %5001 = vmatprep.subr.bf16.mxu1 %v8828_v62 }
 0x4fb   : > { %5002 = vmatpush3.bf16.msra.mxu1 %v5145_v11 }
 0x4fc   : > { %5003 = vmatprep.subr.bf16.mxu1 %v8828_v62 }
 0x4ff   : > { %5004 = vmatpush3.bf16.msra.mxu1 %v5146_v61 }
 0x500   : > { %5005 = vmatprep.subr.bf16.mxu1 %v8828_v62 }
 0x503   : > { %5006 = vmatpush3.bf16.msra.mxu1 %v5147_v50 }
 0x504   : > { %5007 = vmatprep.subr.bf16.mxu1 %v8828_v62 }
 0x507   : > { %5008 = vmatpush3.bf16.msra.mxu1 %v5148_v58 }
 0x508   : > { %5009 = vmatprep.subr.bf16.mxu1 %v8828_v62 }
 0x50b   : > { %5010 = vmatpush3.bf16.msra.mxu1 %v5149_v25 }
 0x50c   : > { %5011 = vmatprep.subr.bf16.mxu1 %v8828_v62 }
 0x50d   : > { %v3902_v52 = vpop.f32.mrf.mxu0 }
 0x50e   : > { %v3903_v4 = vadd.f32 %v8403_v19, %v3902_v52 }
 0x50f   : > { %v4997_v33 = vpop.f32.mrf.mxu0  ;;  %5012 = vmatpush3.bf16.msra.mxu1 %v5151_v13 }
 0x510   : > { %v3908_v6 = vmul.f32 %v3903_v4, %v8407_v40  ;;  %5013 = vmatprep.subr.bf16.mxu1 %v8828_v62 }
 0x511   : > { %v3905_v47 = vpop.f32.mrf.mxu0 }
 0x512   : > { %v3909_v2 = vadd.f32 %v3908_v6, %v3867_v43 }
 0x513   : > { %v4998_v0 = vpop.f32.mrf.mxu0  ;;  %5014 = vmatpush3.bf16.msra.mxu1 %v5153_v29 }
 0x514   : > { %vm3910_vm6 = vcmp.gt.f32.partialorder %v3909_v2, 0.5  ;;  %4686 = vst [vmem:[%s8717_s24 + $0x6] sm:$0x3] %v3909_v2 }
 0x515   : > { %v4685_v19 = vsel %vm3910_vm6, 1.0, %v8828_v62  ;;  %vm4696_vm12 = vmpackc.low %vm3910_vm6, %vm3910_vm6  ;;  %v4081_v40 = vpop.f32.mrf.mxu0 }
 0x516   : > { %4687 = vst [vmem:[%s8717_s24 + $0xe] sm:$0x3] %v4685_v19  ;;  %5016 = vmatmul.mubr.msk.bf16.vlgmr.msra.gmra.mxu1 %vm4696_vm12, %v5233_v55  ;;  %v4115_v55 = vld [vmem:[%s8707_s14] sm:$0xff] }
 0x517   : > { %v5025_v1 = vpop.f32.mrf.mxu0  ;;  %5034 = vmatpush3.msra.mxu0 %v4115_v55 }
 0x519   : > { %v4084_v63 = vpop.f32.mrf.mxu0 }
 0x51b   : > { %v5026_v59 = vpop.f32.mrf.mxu0 }
 0x5b6   : > { %v3853_v21 = vpop.f32.mrf.mxu1 }
 0x5b7   : > { %v3859_v48 = vadd.f32 %v3853_v21, %v8535_v41 }
 0x5b8   : > { %v4977_v45 = vpop.f32.mrf.mxu1 }
 0x5ba   : > { %v3856_v27 = vpop.f32.mrf.mxu1 }
 0x5bc   : > { %v4978_v24 = vpop.f32.mrf.mxu1 }
 0x5d6   : > { %v4014_v37 = vpop.f32.mrf.mxu1 }
 0x5d7   : > { %v4020_v22 = vadd.f32 %v4014_v37, %v3859_v48 }
 0x5d8   : > { %v5017_v17 = vpop.f32.mrf.mxu1 }
 0x5d9   : > { %v4087_v7 = vadd.f32 %v4081_v40, %v4020_v22 }
 0x5da   : > { %v4017_v16 = vpop.f32.mrf.mxu1 }
 0x5db   : > { %v4092_v46 = vadd.f32 %v4702_v51, %v4087_v7 }
 0x5dc   : > { %v5018_v9 = vpop.f32.mrf.mxu1 }
 0x5dd   : > { %v4105_v32 = vmul.f32 %v4104_v53, %v4092_v46 }
 0x5df   : > { %v4106_v41 = vadd.f32 %v4105_v32, %v4099_v12 }
 0x5e1   : > { %vm4107_vm14 = vcmp.gt.f32.partialorder %v4106_v41, 0.5  ;;  %4111 = vst.msk [vmem:[%s8718_s25] sm:$0x3] %vm4110_vm13, %v4106_v41 }
 0x5e2   : > { %v4703_v30 = vsel %vm4107_vm14, 1.0, %v8828_v62  ;;  %v4707_v62 = vld [vmem:[%s8708_s15 + $0x1] ss:$0 sm:$0xff] }
 0x5e3   : > { %4704 = vst.msk [vmem:[%s8718_s25 + $0x2] sm:$0x3] %vm4110_vm13, %v4703_v30  ;;  %5036 = vmatmul.mubr.msk.f32.vlgmr.msra.gmra.mxu0 %vm4043_vm9, %v4703_v30 }
 0x6a3   : > { %v4192_v56 = vpop.f32.mrf.mxu0 }
 0x6a4   : > { %v4193_v26 = vadd.f32 %v4705_v31, %v4192_v56 }
 0x6a5   : > { %v5037_v20 = vpop.f32.mrf.mxu0 }
 0x6a6   : > { %v4197_v60 = vsub.f32 %v4193_v26, %v4196_v3 }
 0x6a8   : > { %v4202_v18 = vmul.f32 %v4707_v62, %v4197_v60 }
 0x6aa   : > { %v4203_v36 = vadd.f32 %v4202_v18, %v4196_v3 }
 0x6ac   : > { %v4206_v15 = vsel %vm4204_vm15, %v4203_v36, -inf  ;;  %4205 = vst.msk [vmem:[%s8719_s26] sm:$0x3] %vm4204_vm15, %v4203_v36 }
 0x6ad   : > { %4207 = vmax.xlane.f32.xlu0 %v4206_v15 }
 0x736   : > { %v4208_v8 = vpop.xlane.xlu0 %4207 }
 0x737   : > { %v4209_v49 = vsub.f32 %v4203_v36, %v4208_v8 }
 0x739   : > { %v4210_v11 = vmul.f32 1.442695, %v4209_v49 }
 0x73b   : > { %5154 = vpow2.f32 %v4210_v11 }
 0x748   : > { %v5155_v61 = vpop.eup %5154 }
 0x749   : > { %v4212_v50 = vsel %vm4204_vm15, %v5155_v61, 0.0 }
 0x74a   : > { %4213 = vadd.xlane.f32.xlu1 %v4212_v50 }
 0x7d3   : > { %v4214_v58 = vpop.xlane.xlu1 %4213 }
 0x7d4   : > { %5156 = vlog2.f32 %v4214_v58 }
 0x7e1   : > { %v5157_v25 = vpop.eup %5156 }
 0x7e2   : > { %v4216_v28 = vmul.f32 0.6931472, %v5157_v25 }
 0x7e4   : > { %v4217_v42 = vsub.f32 %v4209_v49, %v4216_v28 }
 0x7e6   : > { %4219 = vst.msk [vmem:[%s5428_s29] sm:$0x3] %vm4204_vm15, %v4217_v42 }
 0x7e7   : > { %5180 = shalt.err (!%p5177_p4)
}
 0x7e8   : > { %s5181_s5 = scalar_lea.hbm %s4232_s6, 32  ;;  %s5185_s17 = scalar_lea.hbm %s8839_s0, 128 }
 0x7e9   : > { %p5182_p7 = scmp.ne.s32.totalorder %s4232_s6, %s5181_s5  ;;  %p5186_p10 = scmp.lt.s32.totalorder %s4232_s6, %s8839_s0 }
 0x7ea   : > { %p5187_p11 = scmp.lt.s32.totalorder %s5185_s17, %s5181_s5 }
 0x7eb   : > { %p5183_p8 = pnand %p5182_p7, %p5408_p5 }
 0x7ec   : > { %p5188_p12 = por %p5187_p11, %p5186_p10 }
 0x7ed   : > { %p5184_p9 = pneg %p5183_p8 }
 0x7ef   : > { %p5189_p13 = pnand %p5188_p12, %p5184_p9 }
 0x7f1   : > { %5192 = shalt.err (!%p5189_p13)
}
 0x7f2   : > { %5039 = dma.vmem_to_hbm [thread:$0]  (%p5408_p5), %s4235_s7, 32, %s4232_s6, %s4221_s27  }
 0x7f3 PF: > { %s8841_s4 = sld [smem:[#allocation10_spill]] }
 0x7f4   : > { %s8842_s18 = sld [smem:[#allocation8_spill]] }
 0x7f9   : > { %p5045_p0 = scmp.ge.s32.totalorder %s8841_s4, 2 }
 0x7fa   : > { %s4276_s8 = sand.u32 1, %s8842_s18  }
 0x7fb   : > { %p5042_p1 = pnand %p5045_p0, %p5412_p6  ;;  %s4277_s29 = scalar_lea.sflag [#allocation6], %s4276_s8 }
 0x7fd   : > { %p5043_p2 = pneg %p5042_p1 }
 0x7ff   : > { %5210 = dma.done.wait (%p5043_p2), %s4277_s29, 32  }
 0x800   : > { %5212 = vsyncadd (%p5043_p2), %s4277_s29, 4294967264  ;;  %s8844_s28 = sld [smem:[#allocation11_spill]]  ;;  %s8847_s27 = smov %s5219_s3 }
 0x801   : > { %s8845_s10 = sld [smem:[#allocation9_spill]] }
 0x802   : > { %s8846_s7 = sld [smem:[#allocation12_spill]] }
 0x806   : > { %p37_p3 = scmp.ge.s32.totalorder %s8844_s28, 6  }
 0x807   : > { %s8848_s3 = smov %s8845_s10 }
 0x808   :  { %39 = sbr.rel (!%p37_p3) target bundleno = 19 (0x13), region = 216 }
 0x80d   :  { %4282 = vsyncpa [#allocation6], 1 }
 0x80e   :  { %4284 = vsyncpa [#allocation6 + $0x1], 1 }

</bundles_post_ra>
